<compile_context>
chip_gen: v5e
topology: v5e:2x2
jax: 0.10.0
libtpu: 0.0.40
codegen_flags: <defaults>
</compile_context>

<pallas_src>
import functools

import jax
import jax.numpy as jnp
from jax.experimental import pallas as pl
from jax.experimental.pallas import tpu as pltpu


# ---------------------------------------------------------------------------
# Kernel
# ---------------------------------------------------------------------------
def _hetero_qmix_kernel(x_ref, h_ref,
                        w1_ref, b1_ref,
                        wih_ref, bih_ref,
                        whh_ref, bhh_ref,
                        w2_ref, b2_ref,
                        q_ref, h_out_ref):
    cdt = w1_ref.dtype                      # matmul compute dtype (bf16 or f32)
    x = x_ref[...]                          # (tm, Fp)  already in cdt
    h = h_ref[...].astype(jnp.float32)      # (tm, Hp)  f32 carried state
    hp = h.shape[-1]

    # fc1 + ReLU  (f32 accumulation)
    x1 = jnp.dot(x.astype(cdt), w1_ref[...],
                 preferred_element_type=jnp.float32) + b1_ref[...]
    x1 = jnp.maximum(x1, 0.0)

    # GRUCell gates, packed [r | z | n] along the lane axis (each block = Hp,
    # a multiple of 128, so the slices below are whole-vreg slices).
    gx = jnp.dot(x1.astype(cdt), wih_ref[...],
                 preferred_element_type=jnp.float32) + bih_ref[...]
    gh = jnp.dot(h.astype(cdt), whh_ref[...],
                 preferred_element_type=jnp.float32) + bhh_ref[...]

    r = jax.nn.sigmoid(gx[:, 0 * hp:1 * hp] + gh[:, 0 * hp:1 * hp])
    z = jax.nn.sigmoid(gx[:, 1 * hp:2 * hp] + gh[:, 1 * hp:2 * hp])
    n = jnp.tanh(gx[:, 2 * hp:3 * hp] + r * gh[:, 2 * hp:3 * hp])

    h_new = (1.0 - z) * n + z * h           # f32 element-wise

    # fc2
    q = jnp.dot(h_new.astype(cdt), w2_ref[...],
                preferred_element_type=jnp.float32) + b2_ref[...]

    q_ref[...] = q.astype(q_ref.dtype)
    h_out_ref[...] = h_new.astype(h_out_ref.dtype)


# ---------------------------------------------------------------------------
# Parameter preparation (PyTorch layout -> padded / transposed / cast)
# ---------------------------------------------------------------------------
def _round_up(x, m):
    return ((x + m - 1) // m) * m


def prepare_params(params, *, compute_dtype=jnp.bfloat16, lane=128):
    """Transpose torch-layout weights to [in, out], zero-pad every feature dim
    to a multiple of `lane`, and cast weight matrices to `compute_dtype`.
    Gate blocks of the packed GRU weights are padded independently so gate k
    occupies columns [k*Hp, (k+1)*Hp)."""
    H, F = params["fc1_w"].shape
    A = params["fc2_w"].shape[0]
    Fp, Hp, Ap = (_round_up(d, lane) for d in (F, H, A))

    def pad2(a, rows, cols):
        return jnp.pad(a, ((0, rows - a.shape[0]), (0, cols - a.shape[1])))

    def pad1(a, n):
        return jnp.pad(a, (0, n - a.shape[0]))

    def pack_gates(w, b):
        # torch GRUCell packs gate rows as [r; z; n]; transpose each to (in,out).
        wg = jnp.concatenate(
            [pad2(w[k * H:(k + 1) * H, :].T, Hp, Hp) for k in range(3)], axis=1)
        bg = jnp.concatenate([pad1(b[k * H:(k + 1) * H], Hp) for k in range(3)])
        return wg, bg

    wih, bih = pack_gates(params["gru_w_ih"], params["gru_b_ih"])
    whh, bhh = pack_gates(params["gru_w_hh"], params["gru_b_hh"])

    return {
        "w1": pad2(params["fc1_w"].T, Fp, Hp).astype(compute_dtype),
        "b1": pad1(params["fc1_b"], Hp).reshape(1, Hp).astype(jnp.float32),
        "wih": wih.astype(compute_dtype),
        "bih": bih.reshape(1, 3 * Hp).astype(jnp.float32),
        "whh": whh.astype(compute_dtype),
        "bhh": bhh.reshape(1, 3 * Hp).astype(jnp.float32),
        "w2": pad2(params["fc2_w"].T, Hp, Ap).astype(compute_dtype),
        "b2": pad1(params["fc2_b"], Ap).reshape(1, Ap).astype(jnp.float32),
    }


# ---------------------------------------------------------------------------
# Forward wrapper
# ---------------------------------------------------------------------------
@functools.partial(jax.jit,
                   static_argnames=("rnn_hidden_dim", "n_actions", "block_m"))
def hetero_qmix_forward(inputs, hidden_state, prepared, *,
                        rnn_hidden_dim, n_actions, block_m=256):
    """inputs: [B, input_shape]; hidden_state: reshapable to [B, H].
    Returns (q [B, n_actions], h [B, H]) exactly like the PyTorch module."""
    B, F = inputs.shape
    H = rnn_hidden_dim
    Fp, Hp = prepared["w1"].shape
    Np = prepared["w2"].shape[1]
    cdt = prepared["w1"].dtype

    h_in = hidden_state.reshape(-1, H).astype(jnp.float32)

    # Batch tile: biggest of block_m rows, padded so every tile is full.
    tm = min(block_m, _round_up(B, 8))
    Bp = _round_up(B, tm)

    x_p = jnp.pad(inputs.astype(jnp.float32),
                  ((0, Bp - B), (0, Fp - F))).astype(cdt)
    h_p = jnp.pad(h_in, ((0, Bp - B), (0, Hp - H)))

    grid = (Bp // tm,)

    def row_spec(cols):                       # batch-tiled operand
        return pl.BlockSpec((tm, cols), lambda i: (i, 0))

    def resident_spec(shape):                 # VMEM-resident weight/bias
        return pl.BlockSpec(shape, lambda i: (0, 0))

    in_specs = [
        row_spec(Fp),                         # x tile
        row_spec(Hp),                         # h tile
        resident_spec((Fp, Hp)),              # w1
        resident_spec((1, Hp)),               # b1
        resident_spec((Hp, 3 * Hp)),          # wih
        resident_spec((1, 3 * Hp)),           # bih
        resident_spec((Hp, 3 * Hp)),          # whh
        resident_spec((1, 3 * Hp)),           # bhh
        resident_spec((Hp, Np)),              # w2
        resident_spec((1, Np)),               # b2
    ]
    out_specs = (row_spec(Np), row_spec(Hp))

    q_p, h_out_p = pl.pallas_call(
        _hetero_qmix_kernel,
        grid=grid,
        in_specs=in_specs,
        out_specs=out_specs,
        out_shape=(
            jax.ShapeDtypeStruct((Bp, Np), jnp.float32),
            jax.ShapeDtypeStruct((Bp, Hp), jnp.float32),
        ),
        input_output_aliases={1: 1},          # reuse h_in HBM buffer for h_out
        compiler_params=pltpu.CompilerParams(
            dimension_semantics=("parallel",),
            vmem_limit_bytes=32 * 1024 * 1024,
        ),
    )(x_p, h_p, prepared["w1"], prepared["b1"], prepared["wih"],
      prepared["bih"], prepared["whh"], prepared["bhh"],
      prepared["w2"], prepared["b2"])

    return q_p[:B, :n_actions], h_out_p[:B, :H]


# ---------------------------------------------------------------------------
# Parameter init (PyTorch layout + init scheme) and pure-JAX references
# ---------------------------------------------------------------------------
def init_params(key, input_shape, rnn_hidden_dim, n_actions):
    H, F, A = rnn_hidden_dim, input_shape, n_actions
    ks = jax.random.split(key, 8)

    def unif(k, shape, fan_in):
        bound = 1.0 / (fan_in ** 0.5)
        return jax.random.uniform(k, shape, jnp.float32, -bound, bound)

    return {
        "fc1_w": unif(ks[0], (H, F), F),          # nn.Linear: [out, in]
        "fc1_b": unif(ks[1], (H,), F),
        "gru_w_ih": unif(ks[2], (3 * H, H), H),   # GRUCell rows [r; z; n]
        "gru_b_ih": unif(ks[3], (3 * H,), H),
        "gru_w_hh": unif(ks[4], (3 * H, H), H),
        "gru_b_hh": unif(ks[5], (3 * H,), H),
        "fc2_w": unif(ks[6], (A, H), H),
        "fc2_b": unif(ks[7], (A,), H),
    }


def reference_forward(inputs, hidden_state, params, rnn_hidden_dim):
    """Full-f32 pure-JAX reference of the PyTorch forward."""
    H = rnn_hidden_dim
    h = hidden_state.reshape(-1, H)
    x1 = jax.nn.relu(inputs @ params["fc1_w"].T + params["fc1_b"])
    gx = x1 @ params["gru_w_ih"].T + params["gru_b_ih"]
    gh = h @ params["gru_w_hh"].T + params["gru_b_hh"]
    r = jax.nn.sigmoid(gx[:, :H] + gh[:, :H])
    z = jax.nn.sigmoid(gx[:, H:2 * H] + gh[:, H:2 * H])
    n = jnp.tanh(gx[:, 2 * H:] + r * gh[:, 2 * H:])
    h_new = (1.0 - z) * n + z * h
    q = h_new @ params["fc2_w"].T + params["fc2_b"]
    return q, h_new


def reference_forward_mixed(inputs, hidden_state, prepared,
                            rnn_hidden_dim, n_actions):
    """Pure-JAX reference that mirrors the kernel's exact dtypes/padding."""
    H = rnn_hidden_dim
    cdt = prepared["w1"].dtype
    Fp, Hp = prepared["w1"].shape
    B, F = inputs.shape
    x = jnp.pad(inputs, ((0, 0), (0, Fp - F))).astype(cdt)
    h = jnp.pad(hidden_state.reshape(-1, H).astype(jnp.float32),
                ((0, 0), (0, Hp - H)))
    x1 = jnp.maximum(jnp.dot(x, prepared["w1"],
                             preferred_element_type=jnp.float32)
                     + prepared["b1"], 0.0)
    gx = jnp.dot(x1.astype(cdt), prepared["wih"],
                 preferred_element_type=jnp.float32) + prepared["bih"]
    gh = jnp.dot(h.astype(cdt), prepared["whh"],
                 preferred_element_type=jnp.float32) + prepared["bhh"]
    r = jax.nn.sigmoid(gx[:, :Hp] + gh[:, :Hp])
    z = jax.nn.sigmoid(gx[:, Hp:2 * Hp] + gh[:, Hp:2 * Hp])
    n = jnp.tanh(gx[:, 2 * Hp:] + r * gh[:, 2 * Hp:])
    h_new = (1.0 - z) * n + z * h
    q = jnp.dot(h_new.astype(cdt), prepared["w2"],
                preferred_element_type=jnp.float32) + prepared["b2"]
    return q[:, :n_actions], h_new[:, :H]


# ---------------------------------------------------------------------------
# Self-test
# ---------------------------------------------------------------------------
if __name__ == "__main__":
    # Small shapes consistent with the module (batch = n_envs * n_agents rows,
    # flattened observation features, args.rnn_hidden_dim, args.n_actions).
    batch = 300            # exercises multi-tile grid + row padding
    input_shape = 48       # not a multiple of 128 -> exercises lane padding
    rnn_hidden_dim = 32    # args.rnn_hidden_dim
    n_actions = 9          # args.n_actions (agent_type == 0)

    key = jax.random.PRNGKey(0)
    k_params, k_x = jax.random.split(key)

    params = init_params(k_params, input_shape, rnn_hidden_dim, n_actions)
    inputs = jax.random.normal(k_x, (batch, input_shape), jnp.float32)
    hidden_state = jnp.zeros((batch, rnn_hidden_dim), jnp.float32)  # init_hidden

    prepared = prepare_params(params, compute_dtype=jnp.bfloat16)

    q, h = hetero_qmix_forward(inputs, hidden_state, prepared,
                               rnn_hidden_dim=rnn_hidden_dim,
                               n_actions=n_actions)
    jax.block_until_ready((q, h))

    assert q.shape == (batch, n_actions) and h.shape == (batch, rnn_hidden_dim)

    # Tight check against a reference with identical bf16 matmul dtypes.
    q_mx, h_mx = reference_forward_mixed(inputs, hidden_state, prepared,
                                         rnn_hidden_dim, n_actions)
    assert float(jnp.max(jnp.abs(q - q_mx))) < 5e-3, "q mismatch (mixed ref)"
    assert float(jnp.max(jnp.abs(h - h_mx))) < 5e-3, "h mismatch (mixed ref)"

    # Loose sanity check against the full-f32 reference (bf16 matmul rounding).
    q_f32, h_f32 = reference_forward(inputs, hidden_state, params,
                                     rnn_hidden_dim)
    assert float(jnp.max(jnp.abs(q - q_f32))) < 5e-2, "q mismatch (f32 ref)"
    assert float(jnp.max(jnp.abs(h - h_f32))) < 5e-2, "h mismatch (f32 ref)"

    print("KERNEL_OK")
</pallas_src>

<mosaic_0001>
module attributes {stable_mosaic.version = 11 : i64} {
  func.func @_hetero_qmix_kernel(%arg0: i32, %arg1: memref<256x128xbf16, #tpu.memory_space<vmem>>, %arg2: memref<256x128xf32, #tpu.memory_space<vmem>>, %arg3: memref<128x128xbf16, #tpu.memory_space<vmem>>, %arg4: memref<1x128xf32, #tpu.memory_space<vmem>>, %arg5: memref<128x384xbf16, #tpu.memory_space<vmem>>, %arg6: memref<1x384xf32, #tpu.memory_space<vmem>>, %arg7: memref<128x384xbf16, #tpu.memory_space<vmem>>, %arg8: memref<1x384xf32, #tpu.memory_space<vmem>>, %arg9: memref<128x128xbf16, #tpu.memory_space<vmem>>, %arg10: memref<1x128xf32, #tpu.memory_space<vmem>>, %arg11: memref<256x128xf32, #tpu.memory_space<vmem>>, %arg12: memref<256x128xf32, #tpu.memory_space<vmem>>) attributes {dimension_semantics = [#tpu.dimension_semantics<parallel>], iteration_bounds = array<i64: 2>, scalar_prefetch = 0 : i64, scratch_operands = 0 : i64, tpu.core_type = #tpu.core_type<tc>, window_params = [{transform_indices = @transform_0, window_bounds = array<i64: 256, 128>}, {transform_indices = @transform_1, window_bounds = array<i64: 256, 128>}, {pipeline_mode = #tpu.pipeline_mode<synchronous>, transform_indices = @transform_2, window_bounds = array<i64: 128, 128>}, {pipeline_mode = #tpu.pipeline_mode<synchronous>, transform_indices = @transform_3, window_bounds = array<i64: 1, 128>}, {pipeline_mode = #tpu.pipeline_mode<synchronous>, transform_indices = @transform_4, window_bounds = array<i64: 128, 384>}, {pipeline_mode = #tpu.pipeline_mode<synchronous>, transform_indices = @transform_5, window_bounds = array<i64: 1, 384>}, {pipeline_mode = #tpu.pipeline_mode<synchronous>, transform_indices = @transform_6, window_bounds = array<i64: 128, 384>}, {pipeline_mode = #tpu.pipeline_mode<synchronous>, transform_indices = @transform_7, window_bounds = array<i64: 1, 384>}, {pipeline_mode = #tpu.pipeline_mode<synchronous>, transform_indices = @transform_8, window_bounds = array<i64: 128, 128>}, {pipeline_mode = #tpu.pipeline_mode<synchronous>, transform_indices = @transform_9, window_bounds = array<i64: 1, 128>}, {transform_indices = @transform_10, window_bounds = array<i64: 256, 128>}, {transform_indices = @transform_11, window_bounds = array<i64: 256, 128>}]} {
    %c0 = arith.constant 0 : index
    %c0_0 = arith.constant 0 : index
    %0 = vector.load %arg1[%c0, %c0_0] : memref<256x128xbf16, #tpu.memory_space<vmem>>, vector<256x128xbf16>
    %c0_1 = arith.constant 0 : index
    %c0_2 = arith.constant 0 : index
    %1 = vector.load %arg2[%c0_1, %c0_2] : memref<256x128xf32, #tpu.memory_space<vmem>>, vector<256x128xf32>
    %c0_3 = arith.constant 0 : index
    %c0_4 = arith.constant 0 : index
    %2 = vector.load %arg3[%c0_3, %c0_4] : memref<128x128xbf16, #tpu.memory_space<vmem>>, vector<128x128xbf16>
    %cst = arith.constant dense<0.000000e+00> : vector<256x128xf32>
    %3 = tpu.matmul %0, %2, %cst {dimension_numbers = #tpu.dot_dimension_numbers<[1], [0], [0], [1], [0, 0, 1, 1], [], []>} : vector<256x128xbf16>, vector<128x128xbf16>, vector<256x128xf32> -> vector<256x128xf32>
    %c0_5 = arith.constant 0 : index
    %c0_6 = arith.constant 0 : index
    %4 = vector.load %arg4[%c0_5, %c0_6] : memref<1x128xf32, #tpu.memory_space<vmem>>, vector<1x128xf32>
    %5 = vector.broadcast %4 : vector<1x128xf32> to vector<256x128xf32>
    %6 = arith.addf %3, %5 : vector<256x128xf32>
    %cst_7 = arith.constant 0.000000e+00 : f32
    %7 = vector.broadcast %cst_7 : f32 to vector<256x128xf32>
    %8 = arith.maximumf %6, %7 : vector<256x128xf32>
    %9 = arith.truncf %8 : vector<256x128xf32> to vector<256x128xbf16>
    %c0_8 = arith.constant 0 : index
    %c0_9 = arith.constant 0 : index
    %10 = vector.load %arg5[%c0_8, %c0_9] : memref<128x384xbf16, #tpu.memory_space<vmem>>, vector<128x384xbf16>
    %cst_10 = arith.constant dense<0.000000e+00> : vector<256x384xf32>
    %11 = tpu.matmul %9, %10, %cst_10 {dimension_numbers = #tpu.dot_dimension_numbers<[1], [0], [0], [1], [0, 0, 1, 1], [], []>} : vector<256x128xbf16>, vector<128x384xbf16>, vector<256x384xf32> -> vector<256x384xf32>
    %c0_11 = arith.constant 0 : index
    %c0_12 = arith.constant 0 : index
    %12 = vector.load %arg6[%c0_11, %c0_12] : memref<1x384xf32, #tpu.memory_space<vmem>>, vector<1x384xf32>
    %13 = vector.broadcast %12 : vector<1x384xf32> to vector<256x384xf32>
    %14 = arith.addf %11, %13 : vector<256x384xf32>
    %15 = arith.truncf %1 : vector<256x128xf32> to vector<256x128xbf16>
    %c0_13 = arith.constant 0 : index
    %c0_14 = arith.constant 0 : index
    %16 = vector.load %arg7[%c0_13, %c0_14] : memref<128x384xbf16, #tpu.memory_space<vmem>>, vector<128x384xbf16>
    %cst_15 = arith.constant dense<0.000000e+00> : vector<256x384xf32>
    %17 = tpu.matmul %15, %16, %cst_15 {dimension_numbers = #tpu.dot_dimension_numbers<[1], [0], [0], [1], [0, 0, 1, 1], [], []>} : vector<256x128xbf16>, vector<128x384xbf16>, vector<256x384xf32> -> vector<256x384xf32>
    %c0_16 = arith.constant 0 : index
    %c0_17 = arith.constant 0 : index
    %18 = vector.load %arg8[%c0_16, %c0_17] : memref<1x384xf32, #tpu.memory_space<vmem>>, vector<1x384xf32>
    %19 = vector.broadcast %18 : vector<1x384xf32> to vector<256x384xf32>
    %20 = arith.addf %17, %19 : vector<256x384xf32>
    %21 = vector.extract_strided_slice %14 {offsets = [0, 0], sizes = [256, 128], strides = [1, 1]} : vector<256x384xf32> to vector<256x128xf32>
    %22 = vector.extract_strided_slice %20 {offsets = [0, 0], sizes = [256, 128], strides = [1, 1]} : vector<256x384xf32> to vector<256x128xf32>
    %23 = arith.addf %21, %22 : vector<256x128xf32>
    %24 = arith.negf %23 : vector<256x128xf32>
    %25 = math.exp %24 : vector<256x128xf32>
    %cst_18 = arith.constant 1.000000e+00 : f32
    %26 = vector.broadcast %cst_18 : f32 to vector<256x128xf32>
    %27 = arith.addf %26, %25 : vector<256x128xf32>
    %28 = arith.divf %26, %27 : vector<256x128xf32>
    %29 = vector.extract_strided_slice %14 {offsets = [0, 128], sizes = [256, 128], strides = [1, 1]} : vector<256x384xf32> to vector<256x128xf32>
    %30 = vector.extract_strided_slice %20 {offsets = [0, 128], sizes = [256, 128], strides = [1, 1]} : vector<256x384xf32> to vector<256x128xf32>
    %31 = arith.addf %29, %30 : vector<256x128xf32>
    %32 = arith.negf %31 : vector<256x128xf32>
    %33 = math.exp %32 : vector<256x128xf32>
    %cst_19 = arith.constant 1.000000e+00 : f32
    %34 = vector.broadcast %cst_19 : f32 to vector<256x128xf32>
    %35 = arith.addf %34, %33 : vector<256x128xf32>
    %36 = arith.divf %34, %35 : vector<256x128xf32>
    %37 = vector.extract_strided_slice %14 {offsets = [0, 256], sizes = [256, 128], strides = [1, 1]} : vector<256x384xf32> to vector<256x128xf32>
    %38 = vector.extract_strided_slice %20 {offsets = [0, 256], sizes = [256, 128], strides = [1, 1]} : vector<256x384xf32> to vector<256x128xf32>
    %39 = arith.mulf %28, %38 : vector<256x128xf32>
    %40 = arith.addf %37, %39 : vector<256x128xf32>
    %41 = math.tanh %40 : vector<256x128xf32>
    %cst_20 = arith.constant 1.000000e+00 : f32
    %42 = vector.broadcast %cst_20 : f32 to vector<256x128xf32>
    %43 = arith.subf %42, %36 : vector<256x128xf32>
    %44 = arith.mulf %43, %41 : vector<256x128xf32>
    %45 = arith.mulf %36, %1 : vector<256x128xf32>
    %46 = arith.addf %44, %45 : vector<256x128xf32>
    %47 = arith.truncf %46 : vector<256x128xf32> to vector<256x128xbf16>
    %c0_21 = arith.constant 0 : index
    %c0_22 = arith.constant 0 : index
    %48 = vector.load %arg9[%c0_21, %c0_22] : memref<128x128xbf16, #tpu.memory_space<vmem>>, vector<128x128xbf16>
    %cst_23 = arith.constant dense<0.000000e+00> : vector<256x128xf32>
    %49 = tpu.matmul %47, %48, %cst_23 {dimension_numbers = #tpu.dot_dimension_numbers<[1], [0], [0], [1], [0, 0, 1, 1], [], []>} : vector<256x128xbf16>, vector<128x128xbf16>, vector<256x128xf32> -> vector<256x128xf32>
    %c0_24 = arith.constant 0 : index
    %c0_25 = arith.constant 0 : index
    %50 = vector.load %arg10[%c0_24, %c0_25] : memref<1x128xf32, #tpu.memory_space<vmem>>, vector<1x128xf32>
    %51 = vector.broadcast %50 : vector<1x128xf32> to vector<256x128xf32>
    %52 = arith.addf %49, %51 : vector<256x128xf32>
    %c0_26 = arith.constant 0 : index
    %c0_27 = arith.constant 0 : index
    %53 = vector.load %arg11[%c0_26, %c0_27] : memref<256x128xf32, #tpu.memory_space<vmem>>, vector<256x128xf32>
    tpu.vector_store %arg11[%c0_26, %c0_27], %52 {strides = array<i32>} : memref<256x128xf32, #tpu.memory_space<vmem>>, vector<256x128xf32>,
    %c0_28 = arith.constant 0 : index
    %c0_29 = arith.constant 0 : index
    %54 = vector.load %arg12[%c0_28, %c0_29] : memref<256x128xf32, #tpu.memory_space<vmem>>, vector<256x128xf32>
    tpu.vector_store %arg12[%c0_28, %c0_29], %46 {strides = array<i32>} : memref<256x128xf32, #tpu.memory_space<vmem>>, vector<256x128xf32>,
    return
  }
  func.func @transform_0(%arg0: i32) -> (i32, i32) {
    %c0_i32 = arith.constant 0 : i32
    %c0_i32_0 = arith.constant 0 : i32
    return %arg0, %c0_i32 : i32, i32
  }
  func.func @transform_1(%arg0: i32) -> (i32, i32) {
    %c0_i32 = arith.constant 0 : i32
    %c0_i32_0 = arith.constant 0 : i32
    return %arg0, %c0_i32 : i32, i32
  }
  func.func @transform_2(%arg0: i32) -> (i32, i32) {
    %c0_i32 = arith.constant 0 : i32
    %c0_i32_0 = arith.constant 0 : i32
    %c0_i32_1 = arith.constant 0 : i32
    return %c0_i32, %c0_i32_0 : i32, i32
  }
  func.func @transform_3(%arg0: i32) -> (i32, i32) {
    %c0_i32 = arith.constant 0 : i32
    %c0_i32_0 = arith.constant 0 : i32
    %c0_i32_1 = arith.constant 0 : i32
    return %c0_i32, %c0_i32_0 : i32, i32
  }
  func.func @transform_4(%arg0: i32) -> (i32, i32) {
    %c0_i32 = arith.constant 0 : i32
    %c0_i32_0 = arith.constant 0 : i32
    %c0_i32_1 = arith.constant 0 : i32
    return %c0_i32, %c0_i32_0 : i32, i32
  }
  func.func @transform_5(%arg0: i32) -> (i32, i32) {
    %c0_i32 = arith.constant 0 : i32
    %c0_i32_0 = arith.constant 0 : i32
    %c0_i32_1 = arith.constant 0 : i32
    return %c0_i32, %c0_i32_0 : i32, i32
  }
  func.func @transform_6(%arg0: i32) -> (i32, i32) {
    %c0_i32 = arith.constant 0 : i32
    %c0_i32_0 = arith.constant 0 : i32
    %c0_i32_1 = arith.constant 0 : i32
    return %c0_i32, %c0_i32_0 : i32, i32
  }
  func.func @transform_7(%arg0: i32) -> (i32, i32) {
    %c0_i32 = arith.constant 0 : i32
    %c0_i32_0 = arith.constant 0 : i32
    %c0_i32_1 = arith.constant 0 : i32
    return %c0_i32, %c0_i32_0 : i32, i32
  }
  func.func @transform_8(%arg0: i32) -> (i32, i32) {
    %c0_i32 = arith.constant 0 : i32
    %c0_i32_0 = arith.constant 0 : i32
    %c0_i32_1 = arith.constant 0 : i32
    return %c0_i32, %c0_i32_0 : i32, i32
  }
  func.func @transform_9(%arg0: i32) -> (i32, i32) {
    %c0_i32 = arith.constant 0 : i32
    %c0_i32_0 = arith.constant 0 : i32
    %c0_i32_1 = arith.constant 0 : i32
    return %c0_i32, %c0_i32_0 : i32, i32
  }
  func.func @transform_10(%arg0: i32) -> (i32, i32) {
    %c0_i32 = arith.constant 0 : i32
    %c0_i32_0 = arith.constant 0 : i32
    return %arg0, %c0_i32 : i32, i32
  }
  func.func @transform_11(%arg0: i32) -> (i32, i32) {
    %c0_i32 = arith.constant 0 : i32
    %c0_i32_0 = arith.constant 0 : i32
    return %arg0, %c0_i32 : i32, i32
  }
}

</mosaic_0001>

<bundles_post_ra>
// kernel: hetero_qmix_forward.1
= control target key start
LH: loop header
LB: loop body
LE: loop exit
PB: predicated region body
PF: predicated region fallthrough
CT: control target
= control target key end

     0   :  { %s4400_s17 = smov 0   ;;  %s7750_s0 = inlined_call_operand.vmem [shape: bf16[512,128], index: 0, kind: input, shape index: {}]   ;;  %s7751_s1 = inlined_call_operand.vmem [shape: f32[512,128], index: 1, kind: input, shape index: {}, may-alias: {1,11}]   ;;  %s7752_s2 = inlined_call_operand.vmem [shape: bf16[128,128], index: 2, kind: input, shape index: {}]   ;;  %s7753_s3 = inlined_call_operand.vmem [shape: f32[1,128], index: 3, kind: input, shape index: {}]   ;;  %s7754_s4 = inlined_call_operand.vmem [shape: bf16[128,384], index: 4, kind: input, shape index: {}]   ;;  %s7755_s5 = inlined_call_operand.vmem [shape: f32[1,384], index: 5, kind: input, shape index: {}]   ;;  %s7756_s6 = inlined_call_operand.vmem [shape: bf16[128,384], index: 6, kind: input, shape index: {}]   ;;  %s7757_s7 = inlined_call_operand.vmem [shape: f32[1,384], index: 7, kind: input, shape index: {}]   ;;  %s7758_s8 = inlined_call_operand.vmem [shape: bf16[128,128], index: 8, kind: input, shape index: {}]   ;;  %s7759_s9 = inlined_call_operand.vmem [shape: f32[1,128], index: 9, kind: input, shape index: {}]   ;;  %s7760_s10 = inlined_call_operand.vmem [shape: f32[512,128], index: 10, kind: output, shape index: {0}]   ;;  %s7761_s11 = inlined_call_operand.vmem [shape: f32[512,128], index: 11, kind: output, shape index: {1}, may-alias: {1,11}]  }
   0x1 LB: > { %s3520_s18 = sadd.s32 4294967295, %s4338_s17   ;;  %p3524_p0 = scmp.ge.s32.totalorder %s4338_s17, 1  ;;  %s4338_s17 = sphi %s4400_s17, %s22_s17  }
   0x2   : > { %p352_p1 = scmp.lt.s32.totalorder %s4338_s17, 3 }
   0x4   : > { %p353_p2 = pnand %p3524_p0, %p352_p1 }
   0x6   : > { %356 = sbr.rel (%p353_p2) target bundleno = 1031 (0x407), region = 60 }
   0xb   : > { %v3942_v0 = vld [vmem:[%s7752_s2 + $0x38] sm:$0xff]  ;;  %v3941_v1 = vld [vmem:[%s7752_s2 + $0x30] sm:$0xff]  ;;  %v3940_v2 = vld [vmem:[%s7752_s2 + $0x28] sm:$0xff]  ;;  %s3525_s27 = sshll.u32 %s3520_s18, 5 }
   0xc   : > { %654 = vmatpush.bf16.msra.mxu0 %v3942_v0  ;;  %v3939_v3 = vld [vmem:[%s7752_s2 + $0x20] sm:$0xff]  ;;  %v3938_v4 = vld [vmem:[%s7752_s2 + $0x18] sm:$0xff]  ;;  %p403_p3 = scmp.lt.s32.totalorder %s3525_s27, 63  ;;  %v3937_v5 = vld [vmem:[%s7752_s2 + $0x10] sm:$0xff] }
   0xd   : > { %v3936_v6 = vld [vmem:[%s7752_s2 + $0x8] sm:$0xff]  ;;  %v3935_v7 = vld [vmem:[%s7752_s2] sm:$0xff]  ;;  %v3965_v14 = vld [vmem:[%s7754_s4 + $0xb0] sm:$0xf0] }
   0xe   : > { %s8241_s27 = smov (!%p403_p3, %s3525_s27), 63  ;;  %v3715_v13 = vld [vmem:[%s7754_s4 + $0xa8] sm:$0xf]  ;;  %v3964_v15 = vld [vmem:[%s7754_s4 + $0xac] sm:$0xf] }
   0xf   : > { %s3526_s15 = sshll.u32 %s8241_s27, 2  ;;  %v3716_v16 = vor.u32 %v3965_v14, %v3715_v13  ;;  %v3717_v17 = vld [vmem:[%s7754_s4 + $0xb4] sm:$0xf0]  ;;  %v3723_v18 = vld [vmem:[%s7754_s4 + $0xb0] sm:$0xf]  ;;  %s4722_s29 = sshll.u32 %s8241_s27, 3 }
  0x10   : > { %655 = vmatpush.bf16.msra.mxu0 %v3941_v1  ;;  %s4438_s21 = scalar_lea.vmem %s7750_s0, %s3526_s15  ;;  %v3966_v19 = vld [vmem:[%s7754_s4 + $0xb8] sm:$0xf0]  ;;  %v3720_v20 = vor.u32 %v3964_v15, %v3717_v17  ;;  %v3703_v23 = vld [vmem:[%s7754_s4 + $0x90] sm:$0xf]  ;;  %v3961_v25 = vld [vmem:[%s7754_s4 + $0x94] sm:$0xf]  ;;  %s4729_s12 = scalar_lea.vmem %s7751_s1, %s4722_s29 }
  0x11   : > { %v3919_v8 = vld [vmem:[%s4438_s21] sm:$0xff]  ;;  %v3920_v9 = vld [vmem:[%s4438_s21 + $0x8] sm:$0xff]  ;;  %v3921_v10 = vld [vmem:[%s4438_s21 + $0x10] sm:$0xff]  ;;  %v3724_v21 = vor.u32 %v3966_v19, %v3723_v18  ;;  %959 = vmatpush.bf16.msra.mxu1 %v3716_v16  ;;  %s6294_s16 = scalar_lea.vmem %s7761_s11, %s4722_s29  ;;  %s7126_s22 = scalar_lea.vmem %s7760_s10, %s4722_s29 }
  0x12   : > { %v3922_v11 = vld [vmem:[%s4438_s21 + $0x18] sm:$0xff]  ;;  %v3923_v12 = vld [vmem:[%s4438_s21 + $0x20] sm:$0xff]  ;;  %1048 = vmatpush.bf16.msra.mxu2 %v3720_v20  ;;  %v3924_v22 = vld [vmem:[%s4438_s21 + $0x28] sm:$0xff] }
  0x13   : > { %1137 = vmatpush.bf16.msra.mxu3 %v3724_v21  ;;  %v3962_v24 = vld [vmem:[%s7754_s4 + $0x98] sm:$0xf0]  ;;  %v3705_v27 = vld [vmem:[%s7754_s4 + $0x9c] sm:$0xf0]  ;;  %v3711_v28 = vld [vmem:[%s7754_s4 + $0x98] sm:$0xf] }
  0x14   : > { %656 = vmatpush.bf16.msra.mxu0 %v3940_v2  ;;  %v3704_v26 = vor.u32 %v3962_v24, %v3703_v23  ;;  %v3963_v29 = vld [vmem:[%s7754_s4 + $0xa0] sm:$0xf0]  ;;  %v3708_v30 = vor.u32 %v3961_v25, %v3705_v27  ;;  %v3691_v32 = vld [vmem:[%s7754_s4 + $0x78] sm:$0xf]  ;;  %v3958_v34 = vld [vmem:[%s7754_s4 + $0x7c] sm:$0xf] }
  0x15   : > { %v3712_v31 = vor.u32 %v3963_v29, %v3711_v28  ;;  %v3959_v33 = vld [vmem:[%s7754_s4 + $0x80] sm:$0xf0]  ;;  %v3693_v36 = vld [vmem:[%s7754_s4 + $0x84] sm:$0xf0]  ;;  %v3699_v37 = vld [vmem:[%s7754_s4 + $0x80] sm:$0xf] }
  0x16   : > { %960 = vmatpush.bf16.msra.mxu1 %v3704_v26  ;;  %v3692_v35 = vor.u32 %v3959_v33, %v3691_v32  ;;  %v3960_v38 = vld [vmem:[%s7754_s4 + $0x88] sm:$0xf0]  ;;  %1049 = vmatpush.bf16.msra.mxu2 %v3708_v30  ;;  %v3696_v39 = vor.u32 %v3958_v34, %v3693_v36  ;;  %v3679_v41 = vld [vmem:[%s7754_s4 + $0x60] sm:$0xf]  ;;  %v3955_v43 = vld [vmem:[%s7754_s4 + $0x64] sm:$0xf] }
  0x17   : > { %1138 = vmatpush.bf16.msra.mxu3 %v3712_v31  ;;  %v3700_v40 = vor.u32 %v3960_v38, %v3699_v37  ;;  %v3956_v42 = vld [vmem:[%s7754_s4 + $0x68] sm:$0xf0]  ;;  %v3681_v44 = vld [vmem:[%s7754_s4 + $0x6c] sm:$0xf0]  ;;  %v3687_v45 = vld [vmem:[%s7754_s4 + $0x68] sm:$0xf] }
  0x18   : > { %657 = vmatpush.bf16.msra.mxu0 %v3939_v3  ;;  %v3957_v46 = vld [vmem:[%s7754_s4 + $0x70] sm:$0xf0]  ;;  %v3680_v47 = vor.u32 %v3956_v42, %v3679_v41  ;;  %v3684_v48 = vor.u32 %v3955_v43, %v3681_v44  ;;  %v3667_v50 = vld [vmem:[%s7754_s4 + $0x48] sm:$0xf]  ;;  %v3952_v52 = vld [vmem:[%s7754_s4 + $0x4c] sm:$0xf] }
  0x19   : > { %v3688_v49 = vor.u32 %v3957_v46, %v3687_v45  ;;  %v3953_v51 = vld [vmem:[%s7754_s4 + $0x50] sm:$0xf0]  ;;  %v3669_v54 = vld [vmem:[%s7754_s4 + $0x54] sm:$0xf0]  ;;  %v3675_v55 = vld [vmem:[%s7754_s4 + $0x50] sm:$0xf] }
  0x1a   : > { %961 = vmatpush.bf16.msra.mxu1 %v3692_v35  ;;  %1050 = vmatpush.bf16.msra.mxu2 %v3696_v39  ;;  %v3668_v53 = vor.u32 %v3953_v51, %v3667_v50  ;;  %v3954_v56 = vld [vmem:[%s7754_s4 + $0x58] sm:$0xf0]  ;;  %v3925_v57 = vld [vmem:[%s4438_s21 + $0x30] sm:$0xff]  ;;  %v3672_v58 = vor.u32 %v3952_v52, %v3669_v54  ;;  %v3657_v0 = vld [vmem:[%s7754_s4 + $0x3c] sm:$0xf0] }
  0x1b   : > { %1139 = vmatpush.bf16.msra.mxu3 %v3700_v40  ;;  %v3676_v59 = vor.u32 %v3954_v56, %v3675_v55  ;;  %v3655_v60 = vld [vmem:[%s7754_s4 + $0x30] sm:$0xf]  ;;  %v3950_v61 = vld [vmem:[%s7754_s4 + $0x38] sm:$0xf0]  ;;  %v3949_v63 = vld [vmem:[%s7754_s4 + $0x34] sm:$0xf] }
  0x1c   : > { %658 = vmatpush.bf16.msra.mxu0 %v3938_v4  ;;  %v3656_v62 = vor.u32 %v3950_v61, %v3655_v60  ;;  %v3663_v1 = vld [vmem:[%s7754_s4 + $0x38] sm:$0xf]  ;;  %v3660_v2 = vor.u32 %v3949_v63, %v3657_v0  ;;  %v3951_v3 = vld [vmem:[%s7754_s4 + $0x40] sm:$0xf0]  ;;  %v3811_v4 = vld [vmem:[%s7756_s6 + $0xa8] sm:$0xf] }
  0x1d   : > { %v3651_v13 = vld [vmem:[%s7754_s4 + $0x20] sm:$0xf]  ;;  %v3948_v14 = vld [vmem:[%s7754_s4 + $0x28] sm:$0xf0]  ;;  %v3943_v19 = vld [vmem:[%s7754_s4 + $0x4] sm:$0xf] }
  0x1e   : > { %962 = vmatpush.bf16.msra.mxu1 %v3680_v47  ;;  %1051 = vmatpush.bf16.msra.mxu2 %v3684_v48  ;;  %v3652_v16 = vor.u32 %v3948_v14, %v3651_v13  ;;  %v3631_v17 = vld [vmem:[%s7754_s4] sm:$0xf]  ;;  %v3944_v18 = vld [vmem:[%s7754_s4 + $0x8] sm:$0xf0]  ;;  %v3633_v21 = vld [vmem:[%s7754_s4 + $0xc] sm:$0xf0] }
  0x1f   : > { %1140 = vmatpush.bf16.msra.mxu3 %v3688_v49  ;;  %v3632_v20 = vor.u32 %v3944_v18, %v3631_v17  ;;  %v3945_v23 = vld [vmem:[%s7754_s4 + $0x10] sm:$0xf0]  ;;  %v3636_v24 = vor.u32 %v3943_v19, %v3633_v21  ;;  %v3926_v26 = vld [vmem:[%s4438_s21 + $0x38] sm:$0xff]  ;;  %v3988_v27 = vld [vmem:[%s7756_s6 + $0xac] sm:$0xf] }
  0x20   : > { %659 = vmatpush.bf16.msra.mxu0 %v3937_v5  ;;  %v3989_v5 = vld [vmem:[%s7756_s6 + $0xb0] sm:$0xf0]  ;;  %v3813_v28 = vld [vmem:[%s7756_s6 + $0xb4] sm:$0xf0]  ;;  %v3819_v30 = vld [vmem:[%s7756_s6 + $0xb0] sm:$0xf] }
  0x21   : > { %v3816_v29 = vor.u32 %v3988_v27, %v3813_v28  ;;  %v3990_v31 = vld [vmem:[%s7756_s6 + $0xb8] sm:$0xf0]  ;;  %v3927_v33 = vld [vmem:[%s4438_s21 + $0x40] sm:$0xff]  ;;  %v3799_v36 = vld [vmem:[%s7756_s6 + $0x90] sm:$0xf] }
  0x22   : > { %963 = vmatpush.bf16.msra.mxu1 %v3668_v53  ;;  %1052 = vmatpush.bf16.msra.mxu2 %v3672_v58  ;;  %v3820_v32 = vor.u32 %v3990_v31, %v3819_v30  ;;  %v4614_v35 = vld [vmem:[%s7753_s3] ss:$0 sm:$0xff]  ;;  %v3986_v37 = vld [vmem:[%s7756_s6 + $0x98] sm:$0xf0]  ;;  %v3928_v45 = vld [vmem:[%s4438_s21 + $0x48] sm:$0xff] }
  0x23   : > { %1141 = vmatpush.bf16.msra.mxu3 %v3676_v59  ;;  %v3800_v38 = vor.u32 %v3986_v37, %v3799_v36  ;;  %v3985_v47 = vld [vmem:[%s7756_s6 + $0x94] sm:$0xf]  ;;  %v3801_v48 = vld [vmem:[%s7756_s6 + $0x9c] sm:$0xf0]  ;;  %v3807_v55 = vld [vmem:[%s7756_s6 + $0x98] sm:$0xf] }
  0x24   : > { %660 = vmatpush.bf16.msra.mxu0 %v3936_v6  ;;  %v3664_v6 = vor.u32 %v3951_v3, %v3663_v1  ;;  %v3804_v49 = vor.u32 %v3985_v47, %v3801_v48  ;;  %v3987_v56 = vld [vmem:[%s7756_s6 + $0xa0] sm:$0xf0]  ;;  %v3929_v59 = vld [vmem:[%s4438_s21 + $0x50] sm:$0xff]  ;;  %v3787_v61 = vld [vmem:[%s7756_s6 + $0x78] sm:$0xf] }
  0x25   : > { %v3984_v17 = vld [vmem:[%s7756_s6 + $0x88] sm:$0xf0]  ;;  %v3763_v37 = vld [vmem:[%s7756_s6 + $0x48] sm:$0xf]  ;;  %v3971_v47 = vld [vmem:[%s7756_s6 + $0x20] sm:$0xf0] }
  0x26   : > { %964 = vmatpush.bf16.msra.mxu1 %v3656_v62  ;;  %1053 = vmatpush.bf16.msra.mxu2 %v3660_v2  ;;  %v3983_v62 = vld [vmem:[%s7756_s6 + $0x80] sm:$0xf0]  ;;  %v3932_v31 = vld [vmem:[%s4438_s21 + $0x68] sm:$0xff] }
  0x27   : > { %1142 = vmatpush.bf16.msra.mxu3 %v3664_v6  ;;  %v3788_v63 = vor.u32 %v3983_v62, %v3787_v61  ;;  %v3930_v6 = vld [vmem:[%s4438_s21 + $0x58] sm:$0xff] }
  0x28   : > { %661 = vmatpush.bf16.msra.mxu0 %v3935_v7  ;;  %v3812_v7 = vor.u32 %v3989_v5, %v3811_v4 }
  0x2b   : > { %662 = vmatmul.bf16.vlgmr.msra.gmra.mxu0 %v3919_v8  ;;  %v3643_v8 = vld [vmem:[%s7754_s4 + $0x18] sm:$0xf]  ;;  %1143 = vmatpush.bf16.msra.mxu3 %v3652_v16  ;;  %v3795_v16 = vld [vmem:[%s7756_s6 + $0x80] sm:$0xf] }
  0x2c   : > { %1410 = vmatpush.bf16.msrb.mxu0 %v3812_v7  ;;  %v3796_v18 = vor.u32 %v3984_v17, %v3795_v16  ;;  %v3978_v16 = vld [vmem:[%s7756_s6 + $0x58] sm:$0xf0] }
  0x30   : > { %1411 = vmatpush.bf16.msrb.mxu0 %v3800_v38  ;;  %v3977_v38 = vld [vmem:[%s7756_s6 + $0x50] sm:$0xf0] }
  0x34   : > { %1412 = vmatpush.bf16.msrb.mxu0 %v3788_v63 }
  0x3b   : > { %667 = vmatmul.bf16.gmra.mxu0 %v3920_v9  ;;  %v3947_v9 = vld [vmem:[%s7754_s4 + $0x20] sm:$0xf0] }
  0x4b   : > { %672 = vmatmul.bf16.gmra.mxu0 %v3921_v10  ;;  %v3946_v10 = vld [vmem:[%s7754_s4 + $0x1c] sm:$0xf] }
  0x5b   : > { %677 = vmatmul.bf16.gmra.mxu0 %v3922_v11  ;;  %v3644_v11 = vor.u32 %v3947_v9, %v3643_v8  ;;  %v3982_v8 = vld [vmem:[%s7756_s6 + $0x7c] sm:$0xf]  ;;  %v3789_v9 = vld [vmem:[%s7756_s6 + $0x84] sm:$0xf0] }
  0x5d   : > { %965 = vmatpush.bf16.msra.mxu1 %v3644_v11 }
  0x61   : > { %966 = vmatpush.bf16.msra.mxu1 %v3632_v20  ;;  %v3931_v20 = vld [vmem:[%s4438_s21 + $0x60] sm:$0xff] }
  0x65   : > { %1499 = vmatpush.bf16.msrb.mxu1 %v3816_v29 }
  0x69   : > { %1500 = vmatpush.bf16.msrb.mxu1 %v3804_v49 }
  0x6b   : > { %682 = vmatmul.bf16.gmra.mxu0 %v3923_v12  ;;  %v3645_v12 = vld [vmem:[%s7754_s4 + $0x24] sm:$0xf0] }
  0x6c   : > { %v3648_v15 = vor.u32 %v3946_v10, %v3645_v12  ;;  %v3792_v10 = vor.u32 %v3982_v8, %v3789_v9 }
  0x6e   : > { %1054 = vmatpush.bf16.msra.mxu2 %v3648_v15  ;;  %1501 = vmatpush.bf16.msrb.mxu1 %v3792_v10 }
  0x72   : > { %1055 = vmatpush.bf16.msra.mxu2 %v3636_v24 }
  0x76   : > { %1588 = vmatpush.bf16.msrb.mxu2 %v3820_v32 }
  0x7b   : > { %687 = vmatmul.bf16.gmra.mxu0 %v3924_v22  ;;  %v3639_v22 = vld [vmem:[%s7754_s4 + $0x8] sm:$0xf] }
  0x7c   : > { %v3640_v25 = vor.u32 %v3945_v23, %v3639_v22  ;;  %v3775_v22 = vld [vmem:[%s7756_s6 + $0x60] sm:$0xf]  ;;  %v3980_v23 = vld [vmem:[%s7756_s6 + $0x68] sm:$0xf0] }
  0x7d   : > { %v3776_v24 = vor.u32 %v3980_v23, %v3775_v22 }
  0x7e   : > { %1144 = vmatpush.bf16.msra.mxu3 %v3640_v25 }
  0x7f   : > { %1413 = vmatpush.bf16.msrb.mxu0 %v3776_v24 }
  0x8b   : > { %692 = vmatmul.bf16.gmra.mxu0 %v3925_v57  ;;  %v3808_v57 = vor.u32 %v3987_v56, %v3807_v55  ;;  %v3727_v55 = vld [vmem:[%s7756_s6] sm:$0xf]  ;;  %v3968_v56 = vld [vmem:[%s7756_s6 + $0x8] sm:$0xf0] }
  0x8d   : > { %1589 = vmatpush.bf16.msrb.mxu2 %v3808_v57  ;;  %v3933_v57 = vld [vmem:[%s4438_s21 + $0x70] sm:$0xff] }
  0x91   : > { %1590 = vmatpush.bf16.msrb.mxu2 %v3796_v18 }
  0x9b   : > { %697 = vmatmul.bf16.gmra.mxu0 %v3926_v26 }
  0xa8   : > { %v663_v34 = vpop.f32.mrf.mxu0 }
  0xa9   : > { %v664_v39 = vadd.f32 %v4614_v35, %v663_v34  ;;  %v3777_v34 = vld [vmem:[%s7756_s6 + $0x6c] sm:$0xf0] }
  0xab   : > { %702 = vmatmul.bf16.gmra.mxu0 %v3927_v33  ;;  %v743_v42 = vmax.f32 %v664_v39, 0.0  ;;  %v3979_v33 = vld [vmem:[%s7756_s6 + $0x64] sm:$0xf]  ;;  %v3764_v39 = vor.u32 %v3977_v38, %v3763_v37 }
  0xac   : > { %v3780_v36 = vor.u32 %v3979_v33, %v3777_v34 }
  0xad   : > { %1414 = vmatpush.bf16.msrb.mxu0 %v3764_v39 }
  0xae   : > { %1502 = vmatpush.bf16.msrb.mxu1 %v3780_v36 }
  0xb0   : > { %v665_v40 = vpop.f32.mrf.mxu0 }
  0xb1   : > { %v666_v41 = vadd.f32 %v4614_v35, %v665_v40  ;;  %v3751_v40 = vld [vmem:[%s7756_s6 + $0x30] sm:$0xf] }
  0xb3   : > { %v744_v43 = vmax.f32 %v666_v41, 0.0  ;;  %v3974_v41 = vld [vmem:[%s7756_s6 + $0x38] sm:$0xf0] }
  0xb5   : > { %v775_v44 = vpack.c.bf16 %v744_v43, %v743_v42  ;;  %v3752_v43 = vor.u32 %v3974_v41, %v3751_v40 }
  0xb7   : > { %967 = vmatmul.bf16.vlgmr.msra.gmra.mxu1 %v775_v44  ;;  %1056 = vmatmul.bf16.vlgmr.msra.gmra.mxu2 %v775_v44 }
  0xb8   : > { %1145 = vmatmul.bf16.vlgmr.msra.gmra.mxu3 %v775_v44  ;;  %v668_v46 = vpop.f32.mrf.mxu0  ;;  %1415 = vmatpush.bf16.msrb.mxu0 %v3752_v43 }
  0xb9   : > { %v669_v50 = vadd.f32 %v4614_v35, %v668_v46  ;;  %v3739_v46 = vld [vmem:[%s7756_s6 + $0x18] sm:$0xf] }
  0xbb   : > { %707 = vmatmul.bf16.gmra.mxu0 %v3928_v45  ;;  %v745_v53 = vmax.f32 %v669_v50, 0.0  ;;  %v3740_v50 = vor.u32 %v3971_v47, %v3739_v46  ;;  %v4782_v46 = vld [vmem:[%s4729_s12 + $0x20] sm:$0xff]  ;;  %v4785_v47 = vld [vmem:[%s4729_s12 + $0x28] sm:$0xff] }
  0xbc   : > { %7825 = vst [vmem:[#allocation5_spill] sm:$0xff] %v4782_v46 }
  0xbd   : > { %1416 = vmatpush.bf16.msrb.mxu0 %v3740_v50  ;;  %7826 = vst [vmem:[#allocation6_spill] sm:$0xff] %v4785_v47  ;;  %v3759_v50 = vld [vmem:[%s7756_s6 + $0x38] sm:$0xf] }
  0xc0   : > { %v670_v51 = vpop.f32.mrf.mxu0 }
  0xc1   : > { %v671_v52 = vadd.f32 %v4614_v35, %v670_v51  ;;  %v3783_v51 = vld [vmem:[%s7756_s6 + $0x68] sm:$0xf] }
  0xc3   : > { %v746_v54 = vmax.f32 %v671_v52, 0.0  ;;  %v3981_v52 = vld [vmem:[%s7756_s6 + $0x70] sm:$0xf0] }
  0xc5   : > { %v776_v58 = vpack.c.bf16 %v746_v54, %v745_v53  ;;  %v3784_v53 = vor.u32 %v3981_v52, %v3783_v51  ;;  %v3975_v51 = vld [vmem:[%s7756_s6 + $0x40] sm:$0xf0] }
  0xc6   : > { %v3760_v52 = vor.u32 %v3975_v51, %v3759_v50 }
  0xc7   : > { %972 = vmatmul.bf16.gmra.mxu1 %v776_v58  ;;  %1061 = vmatmul.bf16.gmra.mxu2 %v776_v58 }
  0xc8   : > { %1150 = vmatmul.bf16.gmra.mxu3 %v776_v58  ;;  %v673_v60 = vpop.f32.mrf.mxu0  ;;  %1591 = vmatpush.bf16.msrb.mxu2 %v3784_v53  ;;  %v3728_v58 = vor.u32 %v3968_v56, %v3727_v55  ;;  %v4798_v53 = vpack.c.bf16 %v4785_v47, %v4782_v46  ;;  %v4981_v47 = vld [vmem:[%s4729_s12 + $0x80] sm:$0xff] }
  0xc9   : > { %v674_v0 = vadd.f32 %v4614_v35, %v673_v60  ;;  %7842 = vst [vmem:[#allocation22_spill] sm:$0xff] %v4981_v47 }
  0xca   : > { %1417 = vmatpush.bf16.msrb.mxu0 %v3728_v58 }
  0xcb   : > { %712 = vmatmul.bf16.gmra.mxu0 %v3929_v59  ;;  %v747_v3 = vmax.f32 %v674_v0, 0.0 }
  0xd0   : > { %v675_v1 = vpop.f32.mrf.mxu0 }
  0xd1   : > { %v676_v2 = vadd.f32 %v4614_v35, %v675_v1 }
  0xd3   : > { %v748_v4 = vmax.f32 %v676_v2, 0.0  ;;  %v3934_v2 = vld [vmem:[%s4438_s21 + $0x78] sm:$0xff] }
  0xd5   : > { %v777_v5 = vpack.c.bf16 %v748_v4, %v747_v3  ;;  %v3976_v4 = vld [vmem:[%s7756_s6 + $0x4c] sm:$0xf] }
  0xd7   : > { %977 = vmatmul.bf16.gmra.mxu1 %v777_v5  ;;  %1066 = vmatmul.bf16.gmra.mxu2 %v777_v5 }
  0xd8   : > { %1155 = vmatmul.bf16.gmra.mxu3 %v777_v5  ;;  %v678_v7 = vpop.f32.mrf.mxu0  ;;  %v3765_v5 = vld [vmem:[%s7756_s6 + $0x54] sm:$0xf0] }
  0xd9   : > { %v679_v11 = vadd.f32 %v4614_v35, %v678_v7 }
  0xdb   : > { %717 = vmatmul.bf16.gmra.mxu0 %v3930_v6  ;;  %v749_v14 = vmax.f32 %v679_v11, 0.0  ;;  %v3768_v6 = vor.u32 %v3976_v4, %v3765_v5 }
  0xdd   : > { %1503 = vmatpush.bf16.msrb.mxu1 %v3768_v6 }
  0xe0   : > { %v680_v12 = vpop.f32.mrf.mxu0 }
  0xe1   : > { %v681_v13 = vadd.f32 %v4614_v35, %v680_v12  ;;  %v458_v12 = vld [vmem:[%s4729_s12] sm:$0xff] }
  0xe3   : > { %v750_v15 = vmax.f32 %v681_v13, 0.0  ;;  %v4734_v13 = vld [vmem:[%s4729_s12 + $0x8] sm:$0xff] }
  0xe4   : > { %7822 = vst [vmem:[#allocation2_spill] sm:$0xff] %v4734_v13  ;;  %v4743_v18 = vpack.c.bf16 %v4734_v13, %v458_v12 }
  0xe5   : > { %v778_v19 = vpack.c.bf16 %v750_v15, %v749_v14  ;;  %v3771_v15 = vld [vmem:[%s7756_s6 + $0x50] sm:$0xf] }
  0xe6   : > { %v3772_v17 = vor.u32 %v3978_v16, %v3771_v15 }
  0xe7   : > { %982 = vmatmul.bf16.gmra.mxu1 %v778_v19  ;;  %1071 = vmatmul.bf16.gmra.mxu2 %v778_v19 }
  0xe8   : > { %1160 = vmatmul.bf16.gmra.mxu3 %v778_v19  ;;  %v683_v21 = vpop.f32.mrf.mxu0  ;;  %1592 = vmatpush.bf16.msrb.mxu2 %v3772_v17 }
  0xe9   : > { %v684_v25 = vadd.f32 %v4614_v35, %v683_v21 }
  0xeb   : > { %722 = vmatmul.bf16.gmra.mxu0 %v3931_v20  ;;  %v751_v28 = vmax.f32 %v684_v25, 0.0 }
  0xec   : > { %1593 = vmatpush.bf16.msrb.mxu2 %v3760_v52 }
  0xf0   : > { %v685_v26 = vpop.f32.mrf.mxu0 }
  0xf1   : > { %v686_v27 = vadd.f32 %v4614_v35, %v685_v26  ;;  %v4751_v26 = vld [vmem:[%s4729_s12 + $0x10] sm:$0xff] }
  0xf2   : > { %7823 = vst [vmem:[#allocation3_spill] sm:$0xff] %v4751_v26 }
  0xf3   : > { %v752_v29 = vmax.f32 %v686_v27, 0.0  ;;  %v4754_v27 = vld [vmem:[%s4729_s12 + $0x18] sm:$0xff] }
  0xf4   : > { %7824 = vst [vmem:[#allocation4_spill] sm:$0xff] %v4754_v27 }
  0xf5   : > { %v779_v30 = vpack.c.bf16 %v752_v29, %v751_v28  ;;  %v4758_v29 = vpack.c.bf16 %v4754_v27, %v4751_v26 }
  0xf7   : > { %987 = vmatmul.bf16.gmra.mxu1 %v779_v30  ;;  %1076 = vmatmul.bf16.gmra.mxu2 %v779_v30 }
  0xf8   : > { %1165 = vmatmul.bf16.gmra.mxu3 %v779_v30  ;;  %v688_v32 = vpop.f32.mrf.mxu0 }
  0xf9   : > { %v689_v42 = vadd.f32 %v4614_v35, %v688_v32  ;;  %v3753_v32 = vld [vmem:[%s7756_s6 + $0x3c] sm:$0xf0] }
  0xfb   : > { %727 = vmatmul.bf16.gmra.mxu0 %v3932_v31  ;;  %v753_v48 = vmax.f32 %v689_v42, 0.0  ;;  %v3973_v31 = vld [vmem:[%s7756_s6 + $0x34] sm:$0xf] }
  0xfc   : > { %v3756_v33 = vor.u32 %v3973_v31, %v3753_v32  ;;  %v3747_v31 = vld [vmem:[%s7756_s6 + $0x20] sm:$0xf]  ;;  %v3972_v32 = vld [vmem:[%s7756_s6 + $0x28] sm:$0xf0] }
  0xfe   : > { %1504 = vmatpush.bf16.msrb.mxu1 %v3756_v33  ;;  %v3748_v33 = vor.u32 %v3972_v32, %v3747_v31 }
 0x100   : > { %v690_v44 = vpop.f32.mrf.mxu0  ;;  %1594 = vmatpush.bf16.msrb.mxu2 %v3748_v33 }
 0x101   : > { %v691_v45 = vadd.f32 %v4614_v35, %v690_v44 }
 0x103   : > { %v754_v49 = vmax.f32 %v691_v45, 0.0 }
 0x105   : > { %v780_v54 = vpack.c.bf16 %v754_v49, %v753_v48  ;;  %v3998_v49 = vld [vmem:[%s7758_s8 + $0x38] sm:$0xff] }
 0x106   : > { %3265 = vmatpush.bf16.msrb.mxu3 %v3998_v49 }
 0x107   : > { %992 = vmatmul.bf16.gmra.mxu1 %v780_v54  ;;  %1081 = vmatmul.bf16.gmra.mxu2 %v780_v54 }
 0x108   : > { %1170 = vmatmul.bf16.gmra.mxu3 %v780_v54  ;;  %v693_v59 = vpop.f32.mrf.mxu0 }
 0x109   : > { %v694_v60 = vadd.f32 %v4614_v35, %v693_v59 }
 0x10b   : > { %732 = vmatmul.bf16.gmra.mxu0 %v3933_v57  ;;  %v755_v63 = vmax.f32 %v694_v60, 0.0 }
 0x110   : > { %v695_v61 = vpop.f32.mrf.mxu0 }
 0x111   : > { %v696_v62 = vadd.f32 %v4614_v35, %v695_v61 }
 0x113   : > { %v756_v0 = vmax.f32 %v696_v62, 0.0 }
 0x115   : > { %v781_v1 = vpack.c.bf16 %v756_v0, %v755_v63 }
 0x117   : > { %997 = vmatmul.bf16.gmra.mxu1 %v781_v1  ;;  %1086 = vmatmul.bf16.gmra.mxu2 %v781_v1 }
 0x118   : > { %1175 = vmatmul.bf16.gmra.mxu3 %v781_v1  ;;  %v698_v3 = vpop.f32.mrf.mxu0 }
 0x119   : > { %v699_v7 = vadd.f32 %v4614_v35, %v698_v3  ;;  %v4819_v3 = vld [vmem:[%s4729_s12 + $0x38] sm:$0xff] }
 0x11a   : > { %7828 = vst [vmem:[#allocation8_spill] sm:$0xff] %v4819_v3 }
 0x11b   : > { %737 = vmatmul.bf16.gmra.mxu0 %v3934_v2  ;;  %v757_v10 = vmax.f32 %v699_v7, 0.0  ;;  %v4816_v2 = vld [vmem:[%s4729_s12 + $0x30] sm:$0xff]  ;;  %v3970_v7 = vld [vmem:[%s7756_s6 + $0x1c] sm:$0xf] }
 0x11c   : > { %7827 = vst [vmem:[#allocation7_spill] sm:$0xff] %v4816_v2  ;;  %v4823_v5 = vpack.c.bf16 %v4819_v3, %v4816_v2 }
 0x120   : > { %v700_v8 = vpop.f32.mrf.mxu0 }
 0x121   : > { %v701_v9 = vadd.f32 %v4614_v35, %v700_v8  ;;  %v3741_v8 = vld [vmem:[%s7756_s6 + $0x24] sm:$0xf0] }
 0x123   : > { %v758_v11 = vmax.f32 %v701_v9, 0.0  ;;  %v3744_v9 = vor.u32 %v3970_v7, %v3741_v8  ;;  %v3967_v7 = vld [vmem:[%s7756_s6 + $0x4] sm:$0xf]  ;;  %v3729_v8 = vld [vmem:[%s7756_s6 + $0xc] sm:$0xf0] }
 0x125   : > { %v782_v14 = vpack.c.bf16 %v758_v11, %v757_v10  ;;  %1505 = vmatpush.bf16.msrb.mxu1 %v3744_v9  ;;  %v3732_v9 = vor.u32 %v3967_v7, %v3729_v8 }
 0x127   : > { %1002 = vmatmul.bf16.gmra.mxu1 %v782_v14  ;;  %1091 = vmatmul.bf16.gmra.mxu2 %v782_v14 }
 0x128   : > { %1180 = vmatmul.bf16.gmra.mxu3 %v782_v14  ;;  %v703_v19 = vpop.f32.mrf.mxu0 }
 0x129   : > { %v704_v20 = vadd.f32 %v4614_v35, %v703_v19  ;;  %1506 = vmatpush.bf16.msrb.mxu1 %v3732_v9 }
 0x12b   : > { %1418 = vmatmul.bf16.vlgmr.msrb.gmra.mxu0 %v4743_v18  ;;  %v759_v23 = vmax.f32 %v704_v20, 0.0 }
 0x130   : > { %v705_v21 = vpop.f32.mrf.mxu0 }
 0x131   : > { %v706_v22 = vadd.f32 %v4614_v35, %v705_v21 }
 0x133   : > { %v760_v24 = vmax.f32 %v706_v22, 0.0 }
 0x134   : > { %v4748_v25 = vpop.f32.mrf.mxu1 }
 0x135   : > { %v783_v28 = vpack.c.bf16 %v760_v24, %v759_v23  ;;  %v4847_v23 = vld [vmem:[%s4729_s12 + $0x40] sm:$0xff]  ;;  %v4850_v24 = vld [vmem:[%s4729_s12 + $0x48] sm:$0xff] }
 0x136   : > { %7829 = vst [vmem:[#allocation9_spill] sm:$0xff] %v4847_v23 }
 0x137   : > { %1007 = vmatmul.bf16.gmra.mxu1 %v783_v28  ;;  %1096 = vmatmul.bf16.gmra.mxu2 %v783_v28  ;;  %7830 = vst [vmem:[#allocation10_spill] sm:$0xff] %v4850_v24 }
 0x138   : > { %1185 = vmatmul.bf16.gmra.mxu3 %v783_v28  ;;  %v708_v30 = vpop.f32.mrf.mxu0 }
 0x139   : > { %v709_v38 = vadd.f32 %v4614_v35, %v708_v30  ;;  %v3997_v30 = vld [vmem:[%s7758_s8 + $0x30] sm:$0xff] }
 0x13a   : > { %v4766_v34 = vpop.f32.mrf.mxu2  ;;  %3266 = vmatpush.bf16.msrb.mxu3 %v3997_v30 }
 0x13b   : > { %v4768_v36 = vpop.f32.mrf.mxu3  ;;  %1423 = vmatmul.bf16.gmra.mxu0 %v4758_v29  ;;  %v761_v42 = vmax.f32 %v709_v38, 0.0  ;;  %v4863_v38 = vpack.c.bf16 %v4850_v24, %v4847_v23 }
 0x13c   : > { %v4771_v37 = vpop.f32.mrf.mxu1 }
 0x13d   : > { %7831 = vst [vmem:[#allocation11_spill] sm:$0xff] %v4863_v38 }
 0x140   : > { %v710_v39 = vpop.f32.mrf.mxu0 }
 0x141   : > { %v711_v40 = vadd.f32 %v4614_v35, %v710_v39 }
 0x142   : > { %v4775_v41 = vpop.f32.mrf.mxu2 }
 0x143   : > { %v762_v43 = vmax.f32 %v711_v40, 0.0  ;;  %v4777_v44 = vpop.f32.mrf.mxu3 }
 0x144   : > { %v4779_v45 = vpop.f32.mrf.mxu1 }
 0x145   : > { %v784_v48 = vpack.c.bf16 %v762_v43, %v761_v42 }
 0x147   : > { %1012 = vmatmul.bf16.gmra.mxu1 %v784_v48  ;;  %1101 = vmatmul.bf16.gmra.mxu2 %v784_v48 }
 0x148   : > { %1190 = vmatmul.bf16.gmra.mxu3 %v784_v48  ;;  %v713_v54 = vpop.f32.mrf.mxu0 }
 0x149   : > { %v714_v58 = vadd.f32 %v4614_v35, %v713_v54 }
 0x14a   : > { %v4800_v55 = vpop.f32.mrf.mxu2 }
 0x14b   : > { %v4802_v56 = vpop.f32.mrf.mxu3  ;;  %1428 = vmatmul.bf16.gmra.mxu0 %v4798_v53  ;;  %v763_v62 = vmax.f32 %v714_v58, 0.0 }
 0x14c   : > { %v4805_v57 = vpop.f32.mrf.mxu1 }
 0x150   : > { %v715_v59 = vpop.f32.mrf.mxu0 }
 0x151   : > { %v716_v60 = vadd.f32 %v4614_v35, %v715_v59 }
 0x152   : > { %v4809_v61 = vpop.f32.mrf.mxu2 }
 0x153   : > { %v764_v63 = vmax.f32 %v716_v60, 0.0  ;;  %v4811_v0 = vpop.f32.mrf.mxu3  ;;  %v4881_v60 = vld [vmem:[%s4729_s12 + $0x50] sm:$0xff] }
 0x154   : > { %v4813_v1 = vpop.f32.mrf.mxu1  ;;  %7832 = vst [vmem:[#allocation12_spill] sm:$0xff] %v4881_v60 }
 0x155   : > { %v785_v4 = vpack.c.bf16 %v764_v63, %v763_v62  ;;  %v4884_v62 = vld [vmem:[%s4729_s12 + $0x58] sm:$0xff] }
 0x156   : > { %7833 = vst [vmem:[#allocation13_spill] sm:$0xff] %v4884_v62 }
 0x157   : > { %1017 = vmatmul.bf16.gmra.mxu1 %v785_v4  ;;  %1106 = vmatmul.bf16.gmra.mxu2 %v785_v4 }
 0x158   : > { %1195 = vmatmul.bf16.gmra.mxu3 %v785_v4  ;;  %v718_v6 = vpop.f32.mrf.mxu0  ;;  %v4888_v4 = vpack.c.bf16 %v4884_v62, %v4881_v60 }
 0x159   : > { %v719_v14 = vadd.f32 %v4614_v35, %v718_v6 }
 0x15a   : > { %v4831_v10 = vpop.f32.mrf.mxu2  ;;  %7834 = vst [vmem:[#allocation14_spill] sm:$0xff] %v4888_v4 }
 0x15b   : > { %v4833_v11 = vpop.f32.mrf.mxu3  ;;  %1433 = vmatmul.bf16.gmra.mxu0 %v4823_v5  ;;  %v765_v19 = vmax.f32 %v719_v14, 0.0 }
 0x15c   : > { %v4836_v12 = vpop.f32.mrf.mxu1 }
 0x160   : > { %v720_v15 = vpop.f32.mrf.mxu0 }
 0x161   : > { %v721_v16 = vadd.f32 %v4614_v35, %v720_v15 }
 0x162   : > { %v4840_v17 = vpop.f32.mrf.mxu2 }
 0x163   : > { %v766_v20 = vmax.f32 %v721_v16, 0.0  ;;  %v4842_v21 = vpop.f32.mrf.mxu3 }
 0x164   : > { %v4844_v22 = vpop.f32.mrf.mxu1 }
 0x165   : > { %v786_v28 = vpack.c.bf16 %v766_v20, %v765_v19 }
 0x167   : > { %1022 = vmatmul.bf16.gmra.mxu1 %v786_v28  ;;  %1111 = vmatmul.bf16.gmra.mxu2 %v786_v28 }
 0x168   : > { %1200 = vmatmul.bf16.gmra.mxu3 %v786_v28  ;;  %v723_v39 = vpop.f32.mrf.mxu0 }
 0x169   : > { %v724_v48 = vadd.f32 %v4614_v35, %v723_v39 }
 0x16a   : > { %v4865_v40 = vpop.f32.mrf.mxu2 }
 0x16b   : > { %v4867_v42 = vpop.f32.mrf.mxu3  ;;  %1438 = vmatmul.bf16.gmra.mxu0 %v4863_v38  ;;  %v767_v52 = vmax.f32 %v724_v48, 0.0  ;;  %v4912_v48 = vld [vmem:[%s4729_s12 + $0x60] sm:$0xff] }
 0x16c   : > { %v4870_v43 = vpop.f32.mrf.mxu1  ;;  %7835 = vst [vmem:[#allocation15_spill] sm:$0xff] %v4912_v48 }
 0x170   : > { %v725_v49 = vpop.f32.mrf.mxu0 }
 0x171   : > { %v726_v50 = vadd.f32 %v4614_v35, %v725_v49  ;;  %v4915_v49 = vld [vmem:[%s4729_s12 + $0x68] sm:$0xff] }
 0x172   : > { %v4874_v51 = vpop.f32.mrf.mxu2  ;;  %7836 = vst [vmem:[#allocation16_spill] sm:$0xff] %v4915_v49  ;;  %v4928_v7 = vpack.c.bf16 %v4915_v49, %v4912_v48  ;;  %v4949_v48 = vld [vmem:[%s4729_s12 + $0x78] sm:$0xff] }
 0x173   : > { %v768_v54 = vmax.f32 %v726_v50, 0.0  ;;  %v4876_v58 = vpop.f32.mrf.mxu3  ;;  %7839 = vst [vmem:[#allocation19_spill] sm:$0xff] %v4949_v48 }
 0x174   : > { %v4878_v59 = vpop.f32.mrf.mxu1  ;;  %7837 = vst [vmem:[#allocation17_spill] sm:$0xff] %v4928_v7 }
 0x175   : > { %v787_v63 = vpack.c.bf16 %v768_v54, %v767_v52  ;;  %v3996_v52 = vld [vmem:[%s7758_s8 + $0x28] sm:$0xff] }
 0x176   : > { %v3735_v54 = vld [vmem:[%s7756_s6 + $0x8] sm:$0xf]  ;;  %3267 = vmatpush.bf16.msrb.mxu3 %v3996_v52 }
 0x177   : > { %1027 = vmatmul.bf16.gmra.mxu1 %v787_v63  ;;  %1116 = vmatmul.bf16.gmra.mxu2 %v787_v63 }
 0x178   : > { %1205 = vmatmul.bf16.gmra.mxu3 %v787_v63  ;;  %v728_v6 = vpop.f32.mrf.mxu0  ;;  %v3969_v63 = vld [vmem:[%s7756_s6 + $0x10] sm:$0xf0] }
 0x179   : > { %v729_v19 = vadd.f32 %v4614_v35, %v728_v6  ;;  %v3736_v6 = vor.u32 %v3969_v63, %v3735_v54 }
 0x17a   : > { %v4896_v14 = vpop.f32.mrf.mxu2 }
 0x17b   : > { %v4898_v15 = vpop.f32.mrf.mxu3  ;;  %1443 = vmatmul.bf16.gmra.mxu0 %v4888_v4  ;;  %v769_v31 = vmax.f32 %v729_v19, 0.0  ;;  %1595 = vmatpush.bf16.msrb.mxu2 %v3736_v6  ;;  %v4946_v6 = vld [vmem:[%s4729_s12 + $0x70] sm:$0xff]  ;;  %v5022_v4 = vld [vmem:[%s4729_s12 + $0x98] sm:$0xff] }
 0x17c   : > { %v4901_v16 = vpop.f32.mrf.mxu1  ;;  %7838 = vst [vmem:[#allocation18_spill] sm:$0xff] %v4946_v6 }
 0x17d   : > { %7850 = vst [vmem:[#allocation30_spill] sm:$0xff] %v5022_v4 }
 0x180   : > { %v730_v20 = vpop.f32.mrf.mxu0 }
 0x181   : > { %v731_v28 = vadd.f32 %v4614_v35, %v730_v20 }
 0x182   : > { %v4905_v30 = vpop.f32.mrf.mxu2 }
 0x183   : > { %v770_v32 = vmax.f32 %v731_v28, 0.0  ;;  %v4907_v33 = vpop.f32.mrf.mxu3 }
 0x184   : > { %v4909_v39 = vpop.f32.mrf.mxu1 }
 0x185   : > { %v788_v50 = vpack.c.bf16 %v770_v32, %v769_v31 }
 0x187   : > { %1032 = vmatmul.bf16.gmra.mxu1 %v788_v50  ;;  %1121 = vmatmul.bf16.gmra.mxu2 %v788_v50 }
 0x188   : > { %1210 = vmatmul.bf16.gmra.mxu3 %v788_v50  ;;  %v733_v8 = vpop.f32.mrf.mxu0 }
 0x189   : > { %v734_v28 = vadd.f32 %v4614_v35, %v733_v8  ;;  %v4953_v8 = vpack.c.bf16 %v4949_v48, %v4946_v6  ;;  %v4974_v6 = vld [vmem:[%s7757_s7] sm:$0x7] }
 0x18a   : > { %v4930_v9 = vpop.f32.mrf.mxu2  ;;  %7841 = vst [vmem:[#allocation21_spill] sm:$0xff] %v4974_v6  ;;  %v4990_v27 = vperm.slane %v4974_v6, 0 }
 0x18b   : > { %v4932_v19 = vpop.f32.mrf.mxu3  ;;  %1448 = vmatmul.bf16.gmra.mxu0 %v4928_v7  ;;  %v771_v50 = vmax.f32 %v734_v28, 0.0  ;;  %7840 = vst [vmem:[#allocation20_spill] sm:$0xff] %v4953_v8 }
 0x18c   : > { %v4935_v20 = vpop.f32.mrf.mxu1 }
 0x190   : > { %v735_v31 = vpop.f32.mrf.mxu0 }
 0x191   : > { %v736_v32 = vadd.f32 %v4614_v35, %v735_v31 }
 0x192   : > { %v4939_v54 = vpop.f32.mrf.mxu2 }
 0x193   : > { %v772_v63 = vmax.f32 %v736_v32, 0.0  ;;  %v4941_v49 = vpop.f32.mrf.mxu3 }
 0x194   : > { %v4943_v52 = vpop.f32.mrf.mxu1 }
 0x195   : > { %v789_v62 = vpack.c.bf16 %v772_v63, %v771_v50 }
 0x197   : > { %1037 = vmatmul.bf16.gmra.mxu1 %v789_v62  ;;  %1126 = vmatmul.bf16.gmra.mxu2 %v789_v62 }
 0x198   : > { %1215 = vmatmul.bf16.gmra.mxu3 %v789_v62  ;;  %v738_v31 = vpop.f32.mrf.mxu0  ;;  %v4967_v62 = vld [vmem:[%s7755_s5] sm:$0x7] }
 0x199   : > { %v739_v50 = vadd.f32 %v4614_v35, %v738_v31 }
 0x19a   : > { %v4955_v28 = vpop.f32.mrf.mxu2 }
 0x19b   : > { %v4957_v32 = vpop.f32.mrf.mxu3  ;;  %1453 = vmatmul.bf16.gmra.mxu0 %v4953_v8  ;;  %v773_v23 = vmax.f32 %v739_v50, 0.0 }
 0x19c   : > { %v4960_v60 = vpop.f32.mrf.mxu1 }
 0x1a0   : > { %v740_v63 = vpop.f32.mrf.mxu0 }
 0x1a1   : > { %v741_v24 = vadd.f32 %v4614_v35, %v740_v63  ;;  %v4984_v35 = vld [vmem:[%s4729_s12 + $0x88] sm:$0xff]  ;;  %v4987_v63 = vperm.slane %v4967_v62, 0 }
 0x1a2   : > { %v4969_v48 = vpop.f32.mrf.mxu2  ;;  %7843 = vst [vmem:[#allocation23_spill] sm:$0xff] %v4984_v35 }
 0x1a3   : > { %v774_v3 = vmax.f32 %v741_v24, 0.0  ;;  %v4976_v2 = vpop.f32.mrf.mxu3  ;;  %v4994_v24 = vpack.c.bf16 %v4984_v35, %v4981_v47  ;;  %v969_v26 = vadd.f32 %v4748_v25, %v4987_v63  ;;  %v971_v25 = vadd.f32 %v4771_v37, %v4987_v63 }
 0x1a4   : > { %v4978_v31 = vpop.f32.mrf.mxu1 }
 0x1a5   : > { %v790_v46 = vpack.c.bf16 %v774_v3, %v773_v23  ;;  %7844 = vst [vmem:[#allocation24_spill] sm:$0xff] %v4994_v24 }
 0x1a7   : > { %1042 = vmatmul.bf16.gmra.mxu1 %v790_v46  ;;  %1131 = vmatmul.bf16.gmra.mxu2 %v790_v46 }
 0x1a8   : > { %1220 = vmatmul.bf16.gmra.mxu3 %v790_v46  ;;  %v1419_v50 = vpop.f32.mrf.mxu0  ;;  %v3995_v46 = vld [vmem:[%s7758_s8 + $0x20] sm:$0xff] }
 0x1a9   : > { %v1420_v13 = vadd.f32 %v1419_v50, %v4990_v27  ;;  %3268 = vmatpush.bf16.msrb.mxu3 %v3995_v46  ;;  %v974_v46 = vadd.f32 %v4779_v45, %v4987_v63 }
 0x1aa   : > { %v4999_v8 = vpop.f32.mrf.mxu2 }
 0x1ab   : > { %v1677_v3 = vadd.f32 %v1420_v13, %v969_v26  ;;  %v5001_v23 = vpop.f32.mrf.mxu3  ;;  %1458 = vmatmul.bf16.gmra.mxu0 %v4994_v24  ;;  %v5019_v24 = vld [vmem:[%s4729_s12 + $0x90] sm:$0xff] }
 0x1ac   : > { %v5004_v6 = vpop.f32.mrf.mxu1  ;;  %7849 = vst [vmem:[#allocation29_spill] sm:$0xff] %v5019_v24  ;;  %v5028_v37 = vpack.c.bf16 %v5022_v4, %v5019_v24  ;;  %v976_v4 = vadd.f32 %v4805_v57, %v4987_v63 }
 0x1ad   : > { %7845 = vst [vmem:[#allocation25_spill] sm:$0xff] %v5004_v6 }
 0x1ae   : > { %7851 = vst [vmem:[#allocation31_spill] sm:$0xff] %v5028_v37 }
 0x1b0   : > { %v1421_v35 = vpop.f32.mrf.mxu0 }
 0x1b1   : > { %v1422_v50 = vadd.f32 %v1421_v35, %v4990_v27 }
 0x1b2   : > { %v5012_v47 = vpop.f32.mrf.mxu2 }
 0x1b3   : > { %7846 = vst [vmem:[#allocation26_spill] sm:$0xff] %v5012_v47  ;;  %v1678_v13 = vadd.f32 %v1422_v50, %v971_v25  ;;  %v5014_v26 = vpop.f32.mrf.mxu3 }
 0x1b4   : > { %7847 = vst [vmem:[#allocation27_spill] sm:$0xff] %v5014_v26  ;;  %v5016_v7 = vpop.f32.mrf.mxu1 }
 0x1b5   : > { %7848 = vst [vmem:[#allocation28_spill] sm:$0xff] %v5016_v7 }
 0x1b7   : > { %1507 = vmatmul.bf16.vlgmr.msrb.gmra.mxu1 %v4743_v18  ;;  %1596 = vmatmul.bf16.vlgmr.msrb.gmra.mxu2 %v4743_v18 }
 0x1b8   : > { %v1424_v35 = vpop.f32.mrf.mxu0 }
 0x1b9   : > { %v1425_v25 = vadd.f32 %v1424_v35, %v4990_v27 }
 0x1ba   : > { %v5033_v50 = vpop.f32.mrf.mxu2 }
 0x1bb   : > { %v1679_v38 = vadd.f32 %v1425_v25, %v974_v46  ;;  %v5035_v7 = vpop.f32.mrf.mxu3  ;;  %1463 = vmatmul.bf16.gmra.mxu0 %v5028_v37  ;;  %v5050_v46 = vld [vmem:[%s4729_s12 + $0xa0] sm:$0xff]  ;;  %v5053_v25 = vld [vmem:[%s4729_s12 + $0xa8] sm:$0xff] }
 0x1bc   : > { %v5038_v18 = vpop.f32.mrf.mxu1  ;;  %7856 = vst [vmem:[#allocation36_spill] sm:$0xff] %v5050_v46  ;;  %v5059_v57 = vpack.c.bf16 %v5053_v25, %v5050_v46 }
 0x1bd   : > { %7852 = vst [vmem:[#allocation32_spill] sm:$0xff] %v5038_v18  ;;  %v3822_v18 = vmul.f32 -1.442695, %v1678_v13 }
 0x1be   : > { %7857 = vst [vmem:[#allocation37_spill] sm:$0xff] %v5053_v25  ;;  %v3994_v25 = vld [vmem:[%s7758_s8 + $0x18] sm:$0xff] }
 0x1bf   : > { %7858 = vst [vmem:[#allocation38_spill] sm:$0xff] %v5059_v57  ;;  %3269 = vmatpush.bf16.msrb.mxu3 %v3994_v25 }
 0x1c0   : > { %v1426_v26 = vpop.f32.mrf.mxu0 }
 0x1c1   : > { %v1427_v24 = vadd.f32 %v1426_v26, %v4990_v27 }
 0x1c2   : > { %v5043_v47 = vpop.f32.mrf.mxu2 }
 0x1c3   : > { %7853 = vst [vmem:[#allocation33_spill] sm:$0xff] %v5043_v47  ;;  %v1680_v45 = vadd.f32 %v1427_v24, %v976_v4  ;;  %v5045_v6 = vpop.f32.mrf.mxu3  ;;  %v979_v4 = vadd.f32 %v4813_v1, %v4987_v63  ;;  %v981_v1 = vadd.f32 %v4836_v12, %v4987_v63 }
 0x1c4   : > { %7854 = vst [vmem:[#allocation34_spill] sm:$0xff] %v5045_v6  ;;  %v5047_v35 = vpop.f32.mrf.mxu1 }
 0x1c5   : > { %7855 = vst [vmem:[#allocation35_spill] sm:$0xff] %v5047_v35 }
 0x1c7   : > { %1512 = vmatmul.bf16.gmra.mxu1 %v4758_v29  ;;  %1601 = vmatmul.bf16.gmra.mxu2 %v4758_v29 }
 0x1c8   : > { %v1429_v26 = vpop.f32.mrf.mxu0 }
 0x1c9   : > { %v1430_v24 = vadd.f32 %v1429_v26, %v4990_v27  ;;  %v3821_v26 = vmul.f32 -1.442695, %v1677_v3  ;;  %v984_v3 = vadd.f32 %v4844_v22, %v4987_v63 }
 0x1ca   : > { %v5064_v37 = vpop.f32.mrf.mxu2 }
 0x1cb   : > { %7859 = vst [vmem:[#allocation39_spill] sm:$0xff] %v5064_v37  ;;  %v1681_v35 = vadd.f32 %v1430_v24, %v979_v4  ;;  %v5066_v6 = vpop.f32.mrf.mxu3  ;;  %1468 = vmatmul.bf16.gmra.mxu0 %v5059_v57  ;;  %4009 = vpow2.f32 %v3821_v26  ;;  %v3823_v26 = vmul.f32 -1.442695, %v1679_v38  ;;  %v986_v38 = vadd.f32 %v4870_v43, %v4987_v63  ;;  %v5135_v43 = vld [vmem:[%s4729_s12 + $0xc8] sm:$0xff] }
 0x1cc   : > { %7860 = vst [vmem:[#allocation40_spill] sm:$0xff] %v5066_v6  ;;  %v5069_v29 = vpop.f32.mrf.mxu1  ;;  %v5089_v6 = vld [vmem:[%s4729_s12 + $0xb8] sm:$0xff]  ;;  %4011 = vpow2.f32 %v3822_v18 }
 0x1cd   : > { %7861 = vst [vmem:[#allocation41_spill] sm:$0xff] %v5069_v29  ;;  %v5086_v29 = vld [vmem:[%s4729_s12 + $0xb0] sm:$0xff]  ;;  %4013 = vpow2.f32 %v3823_v26 }
 0x1ce   : > { %7863 = vst [vmem:[#allocation43_spill] sm:$0xff] %v5086_v29 }
 0x1cf   : > { %7864 = vst [vmem:[#allocation44_spill] sm:$0xff] %v5089_v6 }
 0x1d0   : > { %v1431_v47 = vpop.f32.mrf.mxu0  ;;  %7870 = vst [vmem:[#allocation50_spill] sm:$0xff] %v5135_v43 }
 0x1d1   : > { %v1432_v46 = vadd.f32 %v1431_v47, %v4990_v27  ;;  %v5095_v47 = vpack.c.bf16 %v5089_v6, %v5086_v29  ;;  %v5112_v29 = vperm.slane %v4967_v62, 1 }
 0x1d2   : > { %v5077_v37 = vpop.f32.mrf.mxu2 }
 0x1d3   : > { %v5079_v4 = vadd.f32 %v1432_v46, %v981_v1  ;;  %v5081_v24 = vpop.f32.mrf.mxu3  ;;  %7865 = vst [vmem:[#allocation45_spill] sm:$0xff] %v5095_v47  ;;  %v4010_v1 = vpop.eup %4009 }
 0x1d4   : > { %v5083_v57 = vpop.f32.mrf.mxu1  ;;  %v5109_v6 = vadd.f32 1.0, %v4010_v1  ;;  %v4012_v22 = vpop.eup %4011 }
 0x1d5   : > { %7862 = vst [vmem:[#allocation42_spill] sm:$0xff] %v5083_v57  ;;  %v5123_v26 = vadd.f32 1.0, %v4012_v22 }
 0x1d6   : > { %4015 = vrcp.f32 %v5109_v6  ;;  %vm1842_vm0 = vweird.f32 %v5109_v6 }
 0x1d7   : > { %1517 = vmatmul.bf16.gmra.mxu1 %v4798_v53  ;;  %1606 = vmatmul.bf16.gmra.mxu2 %v4798_v53  ;;  %vm1857_vm4 = vweird.f32 %v5123_v26 }
 0x1d8   : > { %v1434_v12 = vpop.f32.mrf.mxu0 }
 0x1d9   : > { %v1435_v46 = vadd.f32 %v1434_v12, %v4990_v27  ;;  %v3824_v12 = vmul.f32 -1.442695, %v1680_v45 }
 0x1da   : > { %v5100_v25 = vpop.f32.mrf.mxu2 }
 0x1db   : > { %7866 = vst [vmem:[#allocation46_spill] sm:$0xff] %v5100_v25  ;;  %v5102_v13 = vadd.f32 %v1435_v46, %v984_v3  ;;  %v5104_v57 = vpop.f32.mrf.mxu3  ;;  %1473 = vmatmul.bf16.gmra.mxu0 %v5095_v47  ;;  %v5118_v46 = vperm.slane %v4967_v62, 2  ;;  %4017 = vpow2.f32 %v3824_v12  ;;  %v5139_v62 = vadd.f32 %v4766_v34, %v5112_v29 }
 0x1dc   : > { %7867 = vst [vmem:[#allocation47_spill] sm:$0xff] %v5104_v57  ;;  %v5107_v53 = vpop.f32.mrf.mxu1  ;;  %v5132_v57 = vld [vmem:[%s4729_s12 + $0xc0] sm:$0xff]  ;;  %v3825_v25 = vmul.f32 -1.442695, %v1681_v35  ;;  %4019 = vrcp.f32 %v5123_v26 }
 0x1dd   : > { %7868 = vst [vmem:[#allocation48_spill] sm:$0xff] %v5107_v53  ;;  %v5143_v22 = vadd.f32 %v4768_v36, %v5118_v46  ;;  %v5151_v12 = vadd.f32 %v4777_v44, %v5118_v46  ;;  %v5159_v34 = vadd.f32 %v4802_v56, %v5118_v46  ;;  %v5163_v36 = vadd.f32 %v4809_v61, %v5112_v29 }
 0x1de   : > { %7869 = vst [vmem:[#allocation49_spill] sm:$0xff] %v5132_v57  ;;  %v5180_v56 = vadd.f32 %v4831_v10, %v5112_v29  ;;  %v5184_v61 = vadd.f32 %v4833_v11, %v5118_v46  ;;  %4021 = vpow2.f32 %v3825_v25  ;;  %v5202_v11 = vadd.f32 %v4867_v42, %v5118_v46 }
 0x1df   : > { %7872 = vst [vmem:[#allocation52_spill] sm:$0xff] %v5151_v12  ;;  %v5219_v25 = vadd.f32 %v4896_v14, %v5112_v29  ;;  %v5223_v42 = vadd.f32 %v4898_v15, %v5118_v46  ;;  %v5240_v14 = vadd.f32 %v4907_v33, %v5118_v46  ;;  %v7932_v12 = vld [vmem:[#allocation41_spill] sm:$0xff] }
 0x1e0   : > { %v1436_v18 = vpop.f32.mrf.mxu0  ;;  %7874 = vst [vmem:[#allocation54_spill] sm:$0xff] %v5159_v34 }
 0x1e1   : > { %v1437_v3 = vadd.f32 %v1436_v18, %v4990_v27  ;;  %v4014_v18 = vpop.eup %4013  ;;  %7875 = vst [vmem:[#allocation55_spill] sm:$0xff] %v5163_v36 }
 0x1e2   : > { %v5121_v1 = vpop.f32.mrf.mxu2  ;;  %v5172_v44 = vpop.eup %4015  ;;  %7878 = vst [vmem:[#allocation58_spill] sm:$0xff] %v5180_v56  ;;  %v5186_v35 = vadd.f32 1.0, %v4014_v18  ;;  %v5206_v18 = vadd.f32 %v4874_v51, %v5112_v29  ;;  %v7914_v56 = vld [vmem:[#allocation32_spill] sm:$0xff] }
 0x1e3   : > { %v5125_v47 = vadd.f32 %v1437_v3, %v986_v38  ;;  %v5127_v45 = vpop.f32.mrf.mxu3  ;;  %v5147_v38 = vadd.f32 %v4775_v41, %v5112_v29  ;;  %v5155_v3 = vadd.f32 %v4800_v55, %v5112_v29  ;;  %v5170_v41 = vpack.c.bf16 %v5135_v43, %v5132_v57  ;;  %7879 = vst [vmem:[#allocation59_spill] sm:$0xff] %v5184_v61  ;;  %v4018_v10 = vpop.eup %4017 }
 0x1e4   : > { %v5129_v53 = vpop.f32.mrf.mxu1  ;;  %v5176_v55 = vadd.f32 %v4811_v0, %v5118_v46  ;;  %v5190_v43 = vadd.f32 %v4840_v17, %v5112_v29  ;;  %v5194_v57 = vadd.f32 %v4842_v21, %v5118_v46  ;;  %v5198_v0 = vadd.f32 %v4865_v40, %v5112_v29  ;;  %7883 = vst [vmem:[#allocation63_spill] sm:$0xff] %v5202_v11 }
 0x1e5   : > { %7871 = vst [vmem:[#allocation51_spill] sm:$0xff] %v5147_v38  ;;  %v5210_v17 = vadd.f32 %v4876_v58, %v5118_v46  ;;  %v3826_v21 = vmul.f32 -1.442695, %v5079_v4  ;;  %v989_v40 = vadd.f32 %v4878_v59, %v4987_v63  ;;  %v1838_v58 = vmul.f32 %v5172_v44, %v5109_v6 }
 0x1e6   : > { %7873 = vst [vmem:[#allocation53_spill] sm:$0xff] %v5155_v3  ;;  %v5232_v4 = vadd.f32 %v4901_v16, %v4987_v63  ;;  %v5236_v59 = vadd.f32 %v4905_v30, %v5112_v29  ;;  %4023 = vrcp.f32 %v5186_v35  ;;  %v5253_v16 = vadd.f32 %v4930_v9, %v5112_v29 }
 0x1e7   : > { %1522 = vmatmul.bf16.gmra.mxu1 %v4823_v5  ;;  %1611 = vmatmul.bf16.gmra.mxu2 %v4823_v5  ;;  %7876 = vst [vmem:[#allocation56_spill] sm:$0xff] %v5170_v41  ;;  %v5257_v30 = vadd.f32 %v4932_v19, %v5118_v46  ;;  %v5259_v33 = vadd.f32 1.0, %v4018_v10  ;;  %4025 = vpow2.f32 %v3826_v21  ;;  %v5275_v19 = vadd.f32 %v4943_v52, %v4987_v63 }
 0x1e8   : > { %7877 = vst [vmem:[#allocation57_spill] sm:$0xff] %v5176_v55  ;;  %v1439_v5 = vpop.f32.mrf.mxu0  ;;  %v5279_v10 = vadd.f32 %v4955_v28, %v5112_v29  ;;  %v5292_v21 = vadd.f32 %v4969_v48, %v5112_v29  ;;  %v3993_v28 = vld [vmem:[%s7758_s8 + $0x10] sm:$0xff]  ;;  %vm1843_vm1 = vweird.f32 %v5172_v44  ;;  %v1878_v55 = vand.u32 2147483648, %v5186_v35 }
 0x1e9   : > { %7880 = vst [vmem:[#allocation60_spill] sm:$0xff] %v5190_v43  ;;  %4027 = vrcp.f32 %v5259_v33  ;;  %v1440_v48 = vadd.f32 %v1439_v5, %v4990_v27  ;;  %3270 = vmatpush.bf16.msrb.mxu3 %v3993_v28  ;;  %v7901_v5 = vld [vmem:[#allocation26_spill] sm:$0xff]  ;;  %v5345_v28 = vld [vmem:[%s4729_s12 + $0xd0] sm:$0xff]  ;;  %vm5396_vm3 = vmor %vm1842_vm0, %vm1843_vm1  ;;  %vm1872_vm8 = vweird.f32 %v5186_v35  ;;  %v5483_v38 = vadd.f32 %v7932_v12, %v4987_v63 }
 0x1ea   : > { %7881 = vst [vmem:[#allocation61_spill] sm:$0xff] %v5194_v57  ;;  %v5213_v57 = vpop.f32.mrf.mxu2  ;;  %vm1887_vm12 = vweird.f32 %v5259_v33 }
 0x1eb   : > { %7882 = vst [vmem:[#allocation62_spill] sm:$0xff] %v5198_v0  ;;  %v5225_v51 = vpop.f32.mrf.mxu3  ;;  %1478 = vmatmul.bf16.gmra.mxu0 %v5170_v41  ;;  %v5249_v41 = vadd.f32 %v4909_v39, %v4987_v63  ;;  %v5271_v39 = vadd.f32 %v4941_v49, %v5118_v46  ;;  %v5288_v49 = vadd.f32 %v4960_v60, %v4987_v63 }
 0x1ec   : > { %7884 = vst [vmem:[#allocation64_spill] sm:$0xff] %v5206_v18  ;;  %v5243_v15 = vpop.f32.mrf.mxu1  ;;  %v5305_v60 = vadd.f32 %v4978_v31, %v4987_v63 }
 0x1ed   : > { %7885 = vst [vmem:[#allocation65_spill] sm:$0xff] %v5210_v17  ;;  %v1861_v17 = vand.u32 2147483647, %v5123_v26 }
 0x1ee   : > { %7886 = vst [vmem:[#allocation66_spill] sm:$0xff] %v5219_v25  ;;  %v1685_v25 = vadd.f32 %v1440_v48, %v989_v40  ;;  %v5374_v48 = vadd.f32 %v5033_v50, %v5112_v29  ;;  %v5387_v50 = vadd.f32 %v7914_v56, %v4987_v63 }
 0x1ef   : > { %7887 = vst [vmem:[#allocation67_spill] sm:$0xff] %v5223_v42  ;;  %v5245_v42 = vpop.eup %4019  ;;  %vm5411_vm5 = vcmp.eq.f32.partialorder %v1861_v17, 8.507059e+37  ;;  %v7921_v17 = vld [vmem:[#allocation34_spill] sm:$0xff] }
 0x1f0   : > { %7888 = vst [vmem:[#allocation68_spill] sm:$0xff] %v5236_v59  ;;  %v5267_v59 = vadd.f32 %v4939_v54, %v5112_v29  ;;  %v4022_v9 = vpop.eup %4021  ;;  %v5284_v54 = vadd.f32 %v4957_v32, %v5118_v46  ;;  %v1441_v52 = vpop.f32.mrf.mxu0  ;;  %v5301_v32 = vadd.f32 %v4976_v2, %v5118_v46  ;;  %v5317_v2 = vadd.f32 %v5001_v23, %v5118_v46 }
 0x1f1   : > { %7889 = vst [vmem:[#allocation69_spill] sm:$0xff] %v5240_v14  ;;  %v5263_v14 = vadd.f32 %v4935_v20, %v4987_v63  ;;  %v3827_v20 = vmul.f32 -1.442695, %v5102_v13  ;;  %v1853_v13 = vmul.f32 %v5245_v42, %v5123_v26  ;;  %vm1858_vm6 = vweird.f32 %v5245_v42 }
 0x1f2   : > { %7890 = vst [vmem:[#allocation70_spill] sm:$0xff] %v5253_v16  ;;  %vm5445_vm7 = vmor %vm1857_vm4, %vm1858_vm6 }
 0x1f3   : > { %7891 = vst [vmem:[#allocation71_spill] sm:$0xff] %v5257_v30  ;;  %v1839_v30 = vsub.f32 1.0, %v1838_v58  ;;  %v5309_v58 = vpop.eup %4023  ;;  %4029 = vpow2.f32 %v3827_v20  ;;  %v5335_v23 = vpop.f32.mrf.mxu3  ;;  %v1854_v20 = vsub.f32 1.0, %v1853_v13  ;;  %v7908_v13 = vld [vmem:[#allocation11_spill] sm:$0xff] }
 0x1f4   : > { %7892 = vst [vmem:[#allocation72_spill] sm:$0xff] %v5267_v59  ;;  %v5342_v16 = vpop.f32.mrf.mxu1  ;;  %vm1873_vm9 = vweird.f32 %v5309_v58 }
 0x1f5   : > { %7893 = vst [vmem:[#allocation73_spill] sm:$0xff] %v5271_v39  ;;  %v5325_v39 = vpop.f32.mrf.mxu2  ;;  %vm5501_vm11 = vmor %vm1872_vm8, %vm1873_vm9 }
 0x1f6   : > { %7894 = vst [vmem:[#allocation74_spill] sm:$0xff] %v5279_v10  ;;  %v5329_v10 = vadd.f32 %v7901_v5, %v5112_v29  ;;  %v5348_v5 = vld [vmem:[%s4729_s12 + $0xd8] sm:$0xff] }
 0x1f7   : > { %7895 = vst [vmem:[#allocation75_spill] sm:$0xff] %v5284_v54  ;;  %v5323_v54 = vadd.f32 1.0, %v4022_v9  ;;  %v7905_v9 = vld [vmem:[#allocation28_spill] sm:$0xff]  ;;  %1527 = vmatmul.bf16.gmra.mxu1 %v7908_v13  ;;  %1616 = vmatmul.bf16.gmra.mxu2 %v7908_v13  ;;  %v1855_v13 = vmul.f32 %v5245_v42, %v1854_v20 }
 0x1f8   : > { %7896 = vst [vmem:[#allocation76_spill] sm:$0xff] %v5292_v21  ;;  %v5313_v21 = vadd.f32 %v4999_v8, %v5112_v29  ;;  %v7903_v8 = vld [vmem:[#allocation27_spill] sm:$0xff]  ;;  %v5340_v59 = vadd.f32 %v7905_v9, %v4987_v63  ;;  %v1442_v9 = vadd.f32 %v1441_v52, %v4990_v27  ;;  %v1863_v52 = vand.u32 2147483648, %v5123_v26  ;;  %v1444_v0 = vpop.f32.mrf.mxu0 }
 0x1f9   : > { %7897 = vst [vmem:[#allocation77_spill] sm:$0xff] %v5301_v32  ;;  %v7900_v32 = vld [vmem:[#allocation25_spill] sm:$0xff]  ;;  %4031 = vrcp.f32 %v5323_v54  ;;  %v1445_v56 = vadd.f32 %v1444_v0, %v4990_v27  ;;  %v1856_v0 = vadd.f32 %v5245_v42, %v1855_v13  ;;  %vm1902_vm0 = vweird.f32 %v5323_v54 }
 0x1fa   : > { %7898 = vst [vmem:[#allocation78_spill] sm:$0xff] %v5313_v21  ;;  %v5321_v31 = vadd.f32 %v7900_v32, %v4987_v63  ;;  %v5333_v21 = vadd.f32 %v7903_v8, %v5118_v46  ;;  %v4026_v32 = vpop.eup %4025  ;;  %v1848_v8 = vand.u32 2147483648, %v5109_v6 }
 0x1fb   : > { %7899 = vst [vmem:[#allocation79_spill] sm:$0xff] %v5317_v2  ;;  %v1840_v2 = vmul.f32 %v5172_v44, %v1839_v30  ;;  %v1868_v30 = vmul.f32 %v5309_v58, %v5186_v35  ;;  %v5360_v18 = vpop.eup %4027  ;;  %v5362_v11 = vadd.f32 1.0, %v4026_v32  ;;  %v1687_v3 = vadd.f32 %v1445_v56, %v5249_v41 }
 0x1fc   : > { %7902 = vst [vmem:[#allocation25_spill] sm:$0xff] %v5329_v10  ;;  %v1846_v10 = vand.u32 2147483647, %v5109_v6  ;;  %v1849_v43 = vor.u32 1.1754944e-38, %v1848_v8  ;;  %v4030_v61 = vpop.eup %4029  ;;  %v7919_v8 = vld [vmem:[#allocation33_spill] sm:$0xff]  ;;  %v1860_v26 = vsel %vm5445_vm7, %v5245_v42, %v1856_v0  ;;  %vm1888_vm14 = vweird.f32 %v5360_v18 }
 0x1fd   : > { %7904 = vst [vmem:[#allocation26_spill] sm:$0xff] %v5333_v21  ;;  %v3828_v21 = vmul.f32 -1.442695, %v5125_v47  ;;  %v5368_v47 = vpack.c.bf16 %v5348_v5, %v5345_v28  ;;  %v1841_v40 = vadd.f32 %v5172_v44, %v1840_v2  ;;  %v3829_v2 = vmul.f32 -1.442695, %v1685_v25  ;;  %v5405_v25 = vpop.f32.mrf.mxu3  ;;  %vm5554_vm15 = vmor %vm1887_vm12, %vm1888_vm14 }
 0x1fe   : > { %7906 = vst [vmem:[#allocation27_spill] sm:$0xff] %v5345_v28  ;;  %vm5376_vm2 = vcmp.eq.f32.partialorder %v1846_v10, 8.507059e+37  ;;  %v1869_v28 = vsub.f32 1.0, %v1868_v30  ;;  %v1686_v10 = vadd.f32 %v1442_v9, %v5232_v4  ;;  %v5417_v30 = vadd.f32 1.0, %v4030_v61  ;;  %v5419_v9 = vpop.f32.mrf.mxu1 }
 0x1ff   : > { %7907 = vst [vmem:[#allocation28_spill] sm:$0xff] %v5348_v5  ;;  %v5383_v5 = vadd.f32 %v5035_v7, %v5118_v46  ;;  %4033 = vpow2.f32 %v3828_v21  ;;  %v1883_v7 = vmul.f32 %v5360_v18, %v5259_v33  ;;  %1483 = vmatmul.bf16.gmra.mxu0 %v5368_v47  ;;  %v1845_v6 = vsel %vm5396_vm3, %v5172_v44, %v1841_v40  ;;  %v5415_v20 = vpop.eup %4031 }
 0x200   : > { %7909 = vst [vmem:[#allocation11_spill] sm:$0xff] %v5368_v47  ;;  %4035 = vrcp.f32 %v5362_v11  ;;  %v1864_v21 = vor.u32 1.1754944e-38, %v1863_v52  ;;  %v5426_v44 = vadd.f32 %v7919_v8, %v5112_v29  ;;  %v5430_v40 = vadd.f32 %v7921_v17, %v5118_v46  ;;  %v7923_v52 = vld [vmem:[#allocation35_spill] sm:$0xff]  ;;  %v1446_v41 = vpop.f32.mrf.mxu0 }
 0x201   : > { %7910 = vst [vmem:[#allocation80_spill] sm:$0xff] %v5374_v48  ;;  %v5390_v48 = vpop.f32.mrf.mxu2  ;;  %4037 = vpow2.f32 %v3829_v2  ;;  %v1870_v61 = vmul.f32 %v5309_v58, %v1869_v28  ;;  %v5435_v47 = vadd.f32 %v7923_v52, %v4987_v63  ;;  %v3830_v13 = vmul.f32 -1.442695, %v1686_v10  ;;  %v7926_v10 = vld [vmem:[#allocation39_spill] sm:$0xff] }
 0x202   : > { %7913 = vst [vmem:[#allocation81_spill] sm:$0xff] %v5383_v5  ;;  %v1876_v5 = vand.u32 2147483647, %v5186_v35  ;;  %v1884_v36 = vsub.f32 1.0, %v1883_v7  ;;  %v5441_v8 = vsel %vm5376_vm2, %v1849_v43, %v1845_v6  ;;  %v1898_v28 = vmul.f32 %v5415_v20, %v5323_v54 }
 0x203   : > { %7920 = vst [vmem:[#allocation32_spill] sm:$0xff] %v5426_v44  ;;  %v5454_v7 = vadd.f32 %v7926_v10, %v5112_v29  ;;  %4039 = vrcp.f32 %v5417_v30  ;;  %v1447_v56 = vadd.f32 %v1446_v41, %v4990_v27  ;;  %v1871_v6 = vadd.f32 %v5309_v58, %v1870_v61 }
 0x204   : > { %7922 = vst [vmem:[#allocation33_spill] sm:$0xff] %v5430_v40  ;;  %vm5461_vm10 = vcmp.eq.f32.partialorder %v1876_v5, 8.507059e+37  ;;  %v1891_v17 = vand.u32 2147483647, %v5259_v33  ;;  %v1893_v52 = vand.u32 2147483648, %v5259_v33  ;;  %4041 = vpow2.f32 %v3830_v13  ;;  %v5488_v13 = vld [vmem:[%s4729_s12 + $0xe0] sm:$0xff] }
 0x205   : > { %v4034_v34 = vpop.eup %4033  ;;  %7927 = vst [vmem:[#allocation34_spill] sm:$0xff] %v5454_v7  ;;  %v1879_v5 = vor.u32 1.1754944e-38, %v1878_v55  ;;  %v1885_v0 = vmul.f32 %v5360_v18, %v1884_v36  ;;  %v7930_v7 = vld [vmem:[#allocation40_spill] sm:$0xff]  ;;  %v3831_v40 = vmul.f32 -1.442695, %v1687_v3  ;;  %v1688_v61 = vadd.f32 %v1447_v56, %v5263_v14  ;;  %v5491_v55 = vld [vmem:[%s4729_s12 + $0xe8] sm:$0xff] }
 0x206   : > { %v5465_v32 = vpop.eup %4035  ;;  %v5471_v2 = vadd.f32 1.0, %v4034_v34  ;;  %v5478_v41 = vadd.f32 %v7930_v7, %v5118_v46  ;;  %v1899_v44 = vsub.f32 1.0, %v1898_v28  ;;  %v5485_v34 = vpop.f32.mrf.mxu1  ;;  %7933 = vst [vmem:[#allocation39_spill] sm:$0xff] %v5488_v13  ;;  %v5495_v36 = vsel %vm5411_vm5, %v1864_v21, %v1860_v26 }
 0x207   : > { %v4038_v10 = vpop.eup %4037  ;;  %7934 = vst [vmem:[#allocation40_spill] sm:$0xff] %v5491_v55  ;;  %v1913_v12 = vmul.f32 %v5465_v32, %v5362_v11  ;;  %v5510_v14 = vadd.f32 %v5077_v37, %v5112_v29  ;;  %v5514_v4 = vadd.f32 %v5081_v24, %v5118_v46  ;;  %v5516_v21 = vpop.f32.mrf.mxu3  ;;  %v1875_v35 = vsel %vm5501_vm11, %v5309_v58, %v1871_v6 }
 0x208   : > { %7931 = vst [vmem:[#allocation35_spill] sm:$0xff] %v5478_v41  ;;  %vm5521_vm13 = vcmp.eq.f32.partialorder %v1891_v17, 8.507059e+37  ;;  %v1894_v7 = vor.u32 1.1754944e-38, %v1893_v52  ;;  %4043 = vrcp.f32 %v5471_v2  ;;  %v5528_v37 = vadd.f32 1.0, %v4038_v10  ;;  %v7943_v52 = vld [vmem:[#allocation42_spill] sm:$0xff] }
 0x209   : > { %v5473_v42 = vpop.f32.mrf.mxu2  ;;  %7937 = vst [vmem:[#allocation41_spill] sm:$0xff] %v5510_v14  ;;  %v5525_v26 = vpop.eup %4039  ;;  %v1886_v24 = vadd.f32 %v5360_v18, %v1885_v0  ;;  %4045 = vpow2.f32 %v3831_v40  ;;  %v3832_v56 = vmul.f32 -1.442695, %v1688_v61  ;;  %v5536_v58 = vpack.c.bf16 %v5491_v55, %v5488_v13  ;;  %v7947_v13 = vld [vmem:[#allocation46_spill] sm:$0xff] }
 0x20a   : > { %7938 = vst [vmem:[#allocation82_spill] sm:$0xff] %v5514_v4  ;;  %v7941_v4 = vld [vmem:[#allocation14_spill] sm:$0xff]  ;;  %v1900_v6 = vmul.f32 %v5415_v20, %v1899_v44  ;;  %v4042_v17 = vpop.eup %4041  ;;  %v5541_v10 = vadd.f32 %v7943_v52, %v4987_v63  ;;  %v1449_v0 = vpop.f32.mrf.mxu0  ;;  %v1906_v3 = vand.u32 2147483647, %v5323_v54  ;;  %v1908_v40 = vand.u32 2147483648, %v5323_v54 }
 0x20b   : > { %1532 = vmatmul.bf16.gmra.mxu1 %v7941_v4  ;;  %1621 = vmatmul.bf16.gmra.mxu2 %v7941_v4  ;;  %7942 = vst [vmem:[#allocation14_spill] sm:$0xff] %v5536_v58  ;;  %v1914_v61 = vsub.f32 1.0, %v1913_v12  ;;  %v1450_v14 = vadd.f32 %v1449_v0, %v4990_v27  ;;  %v5548_v4 = vsel %vm5461_vm10, %v1879_v5, %v1875_v35  ;;  %4047 = vrcp.f32 %v5528_v37 }
 0x20c   : > { %7944 = vst [vmem:[#allocation42_spill] sm:$0xff] %v5548_v4  ;;  %v1928_v52 = vmul.f32 %v5525_v26, %v5417_v30  ;;  %v1890_v43 = vsel %vm5554_vm15, %v5360_v18, %v1886_v24  ;;  %vm1903_vm1 = vweird.f32 %v5415_v20  ;;  %v1921_v33 = vand.u32 2147483647, %v5362_v11 }
 0x20d   : > { %v5569_v5 = vadd.f32 1.0, %v4042_v17  ;;  %4049 = vpow2.f32 %v3832_v56  ;;  %v1689_v35 = vadd.f32 %v1450_v14, %v5275_v19  ;;  %v1901_v0 = vadd.f32 %v5415_v20, %v1900_v6  ;;  %v7951_v14 = vld [vmem:[#allocation47_spill] sm:$0xff]  ;;  %vm5608_vm3 = vmor %vm1902_vm0, %vm1903_vm1 }
 0x20e   : > { %v5574_v55 = vpop.eup %4043  ;;  %v5578_v41 = vadd.f32 %v7947_v13, %v5112_v29  ;;  %v5580_v18 = vpop.f32.mrf.mxu1  ;;  %vm5582_vm2 = vcmp.eq.f32.partialorder %v1906_v3, 8.507059e+37  ;;  %v1909_v17 = vor.u32 1.1754944e-38, %v1908_v40  ;;  %v1915_v56 = vmul.f32 %v5465_v32, %v1914_v61  ;;  %v7953_v13 = vld [vmem:[#allocation48_spill] sm:$0xff] }
 0x20f   : > { %1488 = vmatmul.bf16.gmra.mxu0 %v5536_v58  ;;  %v4046_v19 = vpop.eup %4045  ;;  %v5589_v44 = vadd.f32 %v7951_v14, %v5118_v46  ;;  %v3833_v6 = vmul.f32 -1.442695, %v1689_v35  ;;  %v1923_v58 = vand.u32 2147483648, %v5362_v11  ;;  %v1929_v4 = vsub.f32 1.0, %v1928_v52  ;;  %v5614_v52 = vpop.f32.mrf.mxu3 }
 0x210   : > { %7948 = vst [vmem:[#allocation46_spill] sm:$0xff] %v5578_v41  ;;  %v5594_v41 = vadd.f32 %v7953_v13, %v4987_v63  ;;  %v5598_v3 = vadd.f32 %v5121_v1, %v5112_v29  ;;  %v5602_v40 = vsel %vm5521_vm13, %v1894_v7, %v1890_v43  ;;  %vm1917_vm4 = vweird.f32 %v5362_v11  ;;  %v3992_v13 = vld [vmem:[%s7758_s8 + $0x8] sm:$0xff] }
 0x211   : > { %v5562_v12 = vpop.f32.mrf.mxu2  ;;  %7952 = vst [vmem:[#allocation47_spill] sm:$0xff] %v5589_v44  ;;  %4051 = vrcp.f32 %v5569_v5  ;;  %v1905_v1 = vsel %vm5608_vm3, %v5415_v20, %v1901_v0  ;;  %vm5619_vm5 = vcmp.eq.f32.partialorder %v1921_v33, 8.507059e+37  ;;  %v1936_v54 = vand.u32 2147483647, %v5417_v30  ;;  %v5626_v43 = vpop.eup %4047  ;;  %3271 = vmatpush.bf16.msrb.mxu3 %v3992_v13 }
 0x212   : > { %7954 = vst [vmem:[#allocation48_spill] sm:$0xff] %v5598_v3  ;;  %v1943_v7 = vmul.f32 %v5574_v55, %v5471_v2  ;;  %v5628_v35 = vadd.f32 1.0, %v4046_v19  ;;  %4053 = vpow2.f32 %v3833_v6  ;;  %v1451_v14 = vpop.f32.mrf.mxu0  ;;  %v1916_v20 = vadd.f32 %v5465_v32, %v1915_v56 }
 0x213   : > { %vm1918_vm6 = vweird.f32 %v5465_v32  ;;  %v4050_v33 = vpop.eup %4049  ;;  %v5637_v0 = vadd.f32 %v5127_v45, %v5118_v46  ;;  %v1452_v61 = vadd.f32 %v1451_v14, %v4990_v27  ;;  %v1924_v3 = vor.u32 1.1754944e-38, %v1923_v58 }
 0x214   : > { %v1930_v19 = vmul.f32 %v5525_v26, %v1929_v4  ;;  %v5643_v6 = vadd.f32 %v5129_v53, %v4987_v63  ;;  %v5649_v56 = vsel %vm5582_vm2, %v1909_v17, %v1905_v1  ;;  %vm1932_vm7 = vweird.f32 %v5417_v30  ;;  %vm5656_vm8 = vmor %vm1917_vm4, %vm1918_vm6  ;;  %v5676_v1 = vld [vmem:[%s4729_s12 + $0xf0] sm:$0xff] }
 0x215   : > { %7959 = vst [vmem:[#allocation83_spill] sm:$0xff] %v5637_v0  ;;  %v1938_v45 = vand.u32 2147483648, %v5417_v30  ;;  %v1690_v58 = vadd.f32 %v1452_v61, %v5288_v49  ;;  %vm5660_vm9 = vcmp.eq.f32.partialorder %v1936_v54, 8.507059e+37  ;;  %v1944_v14 = vsub.f32 1.0, %v1943_v7  ;;  %v5679_v54 = vld [vmem:[%s4729_s12 + $0xf8] sm:$0xff] }
 0x216   : > { %7960 = vst [vmem:[#allocation84_spill] sm:$0xff] %v5649_v56  ;;  %v1958_v24 = vmul.f32 %v5626_v43, %v5528_v37  ;;  %v5668_v17 = vadd.f32 %v5213_v57, %v5112_v29  ;;  %4055 = vrcp.f32 %v5628_v35  ;;  %v5671_v49 = vadd.f32 1.0, %v4050_v33  ;;  %v5673_v11 = vpop.f32.mrf.mxu1 }
 0x217   : > { %7966 = vst [vmem:[#allocation86_spill] sm:$0xff] %v5676_v1  ;;  %v1920_v7 = vsel %vm5656_vm8, %v5465_v32, %v1916_v20  ;;  %v5684_v13 = vpop.eup %4051  ;;  %v3834_v61 = vmul.f32 -1.442695, %v1690_v58  ;;  %v1931_v57 = vadd.f32 %v5525_v26, %v1930_v19  ;;  %vm1933_vm10 = vweird.f32 %v5525_v26  ;;  %v7969_v20 = vld [vmem:[#allocation17_spill] sm:$0xff] }
 0x218   : > { %7965 = vst [vmem:[#allocation85_spill] sm:$0xff] %v5668_v17  ;;  %v1951_v33 = vand.u32 2147483647, %v5471_v2  ;;  %v4054_v17 = vpop.eup %4053  ;;  %v5691_v0 = vadd.f32 %v5225_v51, %v5118_v46  ;;  %v5695_v56 = vadd.f32 %v5243_v15, %v4987_v63  ;;  %v1939_v4 = vor.u32 1.1754944e-38, %v1938_v45  ;;  %vm5714_vm11 = vmor %vm1932_vm7, %vm1933_vm10 }
 0x219   : > { %v5645_v44 = vpop.f32.mrf.mxu2  ;;  %7967 = vst [vmem:[#allocation87_spill] sm:$0xff] %v5679_v54  ;;  %v1953_v32 = vand.u32 2147483648, %v5471_v2  ;;  %4057 = vpow2.f32 %v3834_v61  ;;  %v5702_v19 = vpack.c.bf16 %v5679_v54, %v5676_v1  ;;  %v1945_v58 = vmul.f32 %v5574_v55, %v1944_v14  ;;  %v5723_v61 = vpop.f32.mrf.mxu3 }
 0x21a   : > { %7968 = vst [vmem:[#allocation88_spill] sm:$0xff] %v5691_v0  ;;  %v1959_v51 = vsub.f32 1.0, %v1958_v24  ;;  %4059 = vrcp.f32 %v5671_v49  ;;  %v1454_v0 = vpop.f32.mrf.mxu0  ;;  %v5708_v15 = vsel %vm5619_vm5, %v1924_v3, %v1920_v7  ;;  %vm1947_vm12 = vweird.f32 %v5471_v2 }
 0x21b   : > { %1537 = vmatmul.bf16.gmra.mxu1 %v7969_v20  ;;  %1626 = vmatmul.bf16.gmra.mxu2 %v7969_v20  ;;  %7970 = vst [vmem:[#allocation17_spill] sm:$0xff] %v5702_v19  ;;  %v1973_v14 = vmul.f32 %v5684_v13, %v5569_v5  ;;  %v5721_v24 = vadd.f32 1.0, %v4054_v17  ;;  %v1455_v3 = vadd.f32 %v1454_v0, %v4990_v27  ;;  %vm5729_vm13 = vcmp.eq.f32.partialorder %v1951_v33, 8.507059e+37 }
 0x21c   : > { %v1935_v28 = vsel %vm5714_vm11, %v5525_v26, %v1931_v57  ;;  %v5733_v7 = vpop.eup %4055  ;;  %v5737_v20 = vadd.f32 %v5325_v39, %v5112_v29  ;;  %v5741_v17 = vadd.f32 %v5335_v23, %v5118_v46  ;;  %v1954_v0 = vor.u32 1.1754944e-38, %v1953_v32 }
 0x21d   : > { %v1966_v45 = vand.u32 2147483647, %v5528_v37  ;;  %v1691_v26 = vadd.f32 %v1455_v3, %v5305_v60  ;;  %v1946_v57 = vadd.f32 %v5574_v55, %v1945_v58  ;;  %vm1948_vm14 = vweird.f32 %v5574_v55 }
 0x21e   : > { %7975 = vst [vmem:[#allocation89_spill] sm:$0xff] %v5737_v20  ;;  %v1960_v39 = vmul.f32 %v5626_v43, %v1959_v51  ;;  %v5753_v33 = vadd.f32 %v5342_v16, %v4987_v63  ;;  %v5755_v23 = vpop.f32.mrf.mxu1  ;;  %v5759_v32 = vsel %vm5660_vm9, %v1939_v4, %v1935_v28  ;;  %v1968_v60 = vand.u32 2147483648, %v5528_v37  ;;  %vm5778_vm0 = vmor %vm1947_vm12, %vm1948_vm14 }
 0x21f   : > { %7976 = vst [vmem:[#allocation90_spill] sm:$0xff] %v5741_v17  ;;  %1493 = vmatmul.bf16.gmra.mxu0 %v5702_v19  ;;  %v1974_v3 = vsub.f32 1.0, %v1973_v14  ;;  %v4058_v1 = vpop.eup %4057  ;;  %4061 = vrcp.f32 %v5721_v24  ;;  %v3835_v58 = vmul.f32 -1.442695, %v1691_v26  ;;  %vm1962_vm15 = vweird.f32 %v5528_v37 }
 0x220   : > { %v1988_v51 = vmul.f32 %v5733_v7, %v5628_v35  ;;  %v5766_v16 = vpop.eup %4059  ;;  %v5770_v17 = vadd.f32 %v5390_v48, %v5112_v29  ;;  %v5772_v53 = vadd.f32 1.0, %v4058_v1  ;;  %vm5782_vm1 = vcmp.eq.f32.partialorder %v1966_v45, 8.507059e+37 }
 0x221   : > { %v5743_v54 = vpop.f32.mrf.mxu2  ;;  %v1981_v28 = vand.u32 2147483647, %v5569_v5  ;;  %4063 = vpow2.f32 %v3835_v58  ;;  %v1950_v48 = vsel %vm5778_vm0, %v5574_v55, %v1946_v57  ;;  %v1961_v1 = vadd.f32 %v5626_v43, %v1960_v39  ;;  %v5829_v30 = vpop.f32.mrf.mxu3 }
 0x222   : > { %7977 = vst [vmem:[#allocation91_spill] sm:$0xff] %v5770_v17  ;;  %vm1963_vm2 = vweird.f32 %v5626_v43  ;;  %v5794_v2 = vadd.f32 %v5405_v25, %v5118_v46  ;;  %v1456_v26 = vpop.f32.mrf.mxu0  ;;  %v1969_v45 = vor.u32 1.1754944e-38, %v1968_v60  ;;  %v1975_v17 = vmul.f32 %v5684_v13, %v1974_v3 }
 0x223   : > { %v1983_v20 = vand.u32 2147483648, %v5569_v5  ;;  %v5800_v58 = vadd.f32 %v5419_v9, %v4987_v63  ;;  %v1457_v55 = vadd.f32 %v1456_v26, %v4990_v27  ;;  %v1989_v57 = vsub.f32 1.0, %v1988_v51  ;;  %vm5814_vm3 = vmor %vm1962_vm15, %vm1963_vm2 }
 0x224   : > { %7982 = vst [vmem:[#allocation92_spill] sm:$0xff] %v5794_v2  ;;  %v2003_v39 = vmul.f32 %v5766_v16, %v5671_v49  ;;  %4065 = vrcp.f32 %v5772_v53  ;;  %v5810_v60 = vsel %vm5729_vm13, %v1954_v0, %v1950_v48  ;;  %vm1977_vm4 = vweird.f32 %v5569_v5 }
 0x225   : > { %vm5819_vm5 = vcmp.eq.f32.partialorder %v1981_v28, 8.507059e+37  ;;  %v5823_v51 = vpop.eup %4061  ;;  %v5827_v4 = vadd.f32 %v5473_v42, %v5112_v29  ;;  %v1692_v37 = vadd.f32 %v1457_v55, %v5321_v31  ;;  %v1965_v0 = vsel %vm5814_vm3, %v5626_v43, %v1961_v1 }
 0x226   : > { %v1996_v48 = vand.u32 2147483647, %v5628_v35  ;;  %v5838_v28 = vadd.f32 %v5516_v21, %v5118_v46  ;;  %v5840_v26 = vpop.f32.mrf.mxu1  ;;  %v1976_v2 = vadd.f32 %v5684_v13, %v1975_v17  ;;  %vm1978_vm6 = vweird.f32 %v5684_v13 }
 0x227   : > { %7987 = vst [vmem:[#allocation93_spill] sm:$0xff] %v5827_v4  ;;  %v1984_v42 = vor.u32 1.1754944e-38, %v1983_v20  ;;  %v4064_v4 = vpop.eup %4063  ;;  %v5846_v31 = vadd.f32 %v5485_v34, %v4987_v63  ;;  %v3836_v55 = vmul.f32 -1.442695, %v1692_v37  ;;  %v1990_v43 = vmul.f32 %v5733_v7, %v1989_v57  ;;  %v7990_v34 = vld [vmem:[#allocation20_spill] sm:$0xff]  ;;  %vm5868_vm7 = vmor %vm1977_vm4, %vm1978_vm6 }
 0x228   : > { %7988 = vst [vmem:[#allocation94_spill] sm:$0xff] %v5838_v28  ;;  %v2004_v1 = vsub.f32 1.0, %v2003_v39  ;;  %v5849_v3 = vadd.f32 1.0, %v4064_v4  ;;  %v5853_v21 = vsel %vm5782_vm1, %v1969_v45, %v1965_v0  ;;  %v1998_v17 = vand.u32 2147483648, %v5628_v35 }
 0x229   : > { %v5806_v25 = vpop.f32.mrf.mxu2  ;;  %v2018_v20 = vmul.f32 %v5823_v51, %v5721_v24  ;;  %v5860_v28 = vadd.f32 %v5562_v12, %v5112_v29  ;;  %4067 = vpow2.f32 %v3836_v55  ;;  %vm1992_vm8 = vweird.f32 %v5628_v35 }
 0x22a   : > { %vm5873_vm9 = vcmp.eq.f32.partialorder %v1996_v48, 8.507059e+37  ;;  %v5877_v12 = vpop.eup %4065  ;;  %v1459_v57 = vpop.f32.mrf.mxu0  ;;  %v1980_v39 = vsel %vm5868_vm7, %v5684_v13, %v1976_v2  ;;  %vm1993_vm10 = vweird.f32 %v5733_v7  ;;  %v2011_v5 = vand.u32 2147483647, %v5671_v49 }
 0x22b   : > { %7989 = vst [vmem:[#allocation95_spill] sm:$0xff] %v5860_v28  ;;  %1542 = vmatmul.bf16.gmra.mxu1 %v7990_v34  ;;  %1631 = vmatmul.bf16.gmra.mxu2 %v7990_v34  ;;  %v2013_v4 = vand.u32 2147483648, %v5671_v49  ;;  %4069 = vrcp.f32 %v5849_v3  ;;  %v1460_v37 = vadd.f32 %v1459_v57, %v4990_v27  ;;  %v1991_v0 = vadd.f32 %v5733_v7, %v1990_v43  ;;  %vm5921_vm12 = vmor %vm1992_vm8, %vm1993_vm10 }
 0x22c   : > { %v2005_v48 = vmul.f32 %v5766_v16, %v2004_v1  ;;  %v5891_v55 = vadd.f32 %v5614_v52, %v5118_v46  ;;  %v5895_v13 = vadd.f32 %v5580_v18, %v4987_v63  ;;  %v1999_v34 = vor.u32 1.1754944e-38, %v1998_v17  ;;  %v1218_v17 = vpop.f32.mrf.mxu3 }
 0x22d   : > { %v2019_v14 = vsub.f32 1.0, %v2018_v20  ;;  %v1693_v28 = vadd.f32 %v1460_v37, %v5340_v59  ;;  %v5902_v57 = vsel %vm5819_vm5, %v1984_v42, %v1980_v39  ;;  %vm2007_vm11 = vweird.f32 %v5671_v49  ;;  %v8002_v37 = vld [vmem:[#allocation21_spill] sm:$0xff]  ;;  %v4329_v59 = vld [vmem:[%s7757_s7] sm:$0x7] }
 0x22e   : > { %7995 = vst [vmem:[#allocation20_spill] sm:$0xff] %v5891_v55  ;;  %v2033_v52 = vmul.f32 %v5877_v12, %v5772_v53  ;;  %v5909_v43 = vadd.f32 %v5645_v44, %v5112_v29  ;;  %v5913_v18 = vadd.f32 %v5723_v61, %v5118_v46  ;;  %v5915_v1 = vpop.f32.mrf.mxu1  ;;  %vm5925_vm13 = vcmp.eq.f32.partialorder %v2011_v5, 8.507059e+37 }
 0x22f   : > { %v2014_v44 = vor.u32 1.1754944e-38, %v2013_v4  ;;  %v4068_v42 = vpop.eup %4067  ;;  %v3837_v20 = vmul.f32 -1.442695, %v1693_v28  ;;  %v1995_v61 = vsel %vm5921_vm12, %v5733_v7, %v1991_v0  ;;  %v2006_v39 = vadd.f32 %v5766_v16, %v2005_v48 }
 0x230   : > { %7996 = vst [vmem:[#allocation96_spill] sm:$0xff] %v5909_v43  ;;  %vm2008_vm14 = vweird.f32 %v5766_v16  ;;  %v5934_v35 = vadd.f32 1.0, %v4068_v42  ;;  %v2020_v5 = vmul.f32 %v5823_v51, %v2019_v14  ;;  %v2026_v4 = vand.u32 2147483647, %v5721_v24 }
 0x231   : > { %v5897_v2 = vpop.f32.mrf.mxu2  ;;  %7997 = vst [vmem:[#allocation97_spill] sm:$0xff] %v5913_v18  ;;  %v5937_v18 = vperm.slane %v8002_v37, 1  ;;  %v5941_v55 = vpop.eup %4069  ;;  %v5945_v28 = vadd.f32 %v5673_v11, %v4987_v63  ;;  %4071 = vpow2.f32 %v3837_v20  ;;  %v2028_v7 = vand.u32 2147483648, %v5721_v24  ;;  %vm5962_vm15 = vmor %vm2007_vm11, %vm2008_vm14 }
 0x232   : > { %v2034_v0 = vsub.f32 1.0, %v2033_v52  ;;  %4073 = vrcp.f32 %v5934_v35  ;;  %v1461_v48 = vpop.f32.mrf.mxu0  ;;  %v5952_v14 = vperm.slane %v4329_v59, 2  ;;  %v5956_v42 = vsel %vm5873_vm9, %v1999_v34, %v1995_v61 }
 0x233   : > { %vm2022_vm0 = vweird.f32 %v5721_v24  ;;  %v1462_v52 = vadd.f32 %v1461_v48, %v4990_v27  ;;  %v2010_v20 = vsel %vm5962_vm15, %v5766_v16, %v2006_v39  ;;  %v2041_v45 = vand.u32 2147483647, %v5772_v53 }
 0x234   : > { %v2043_v34 = vand.u32 2147483648, %v5772_v53  ;;  %v2021_v49 = vadd.f32 %v5823_v51, %v2020_v5  ;;  %vm2023_vm1 = vweird.f32 %v5823_v51  ;;  %vm5977_vm2 = vcmp.eq.f32.partialorder %v2026_v4, 8.507059e+37 }
 0x235   : > { %v2048_v48 = vmul.f32 %v5941_v55, %v5849_v3  ;;  %v5985_v16 = vadd.f32 %v5743_v54, %v5112_v29  ;;  %v1694_v39 = vadd.f32 %v1462_v52, %v5387_v50  ;;  %v2029_v59 = vor.u32 1.1754944e-38, %v2028_v7  ;;  %vm6011_vm4 = vmor %vm2022_vm0, %vm2023_vm1  ;;  %v1221_v52 = vpop.f32.mrf.mxu3 }
 0x236   : > { %v2035_v11 = vmul.f32 %v5877_v12, %v2034_v0  ;;  %v5991_v5 = vadd.f32 %v5829_v30, %v5118_v46  ;;  %v5995_v4 = vadd.f32 %v5755_v23, %v4987_v63  ;;  %v1508_v43 = vpop.f32.mrf.mxu1  ;;  %v5999_v19 = vsel %vm5925_vm13, %v2014_v44, %v2010_v20 }
 0x237   : > { %8007 = vst [vmem:[#allocation21_spill] sm:$0xff] %v5985_v16  ;;  %vm2037_vm3 = vweird.f32 %v5772_v53  ;;  %v4072_v54 = vpop.eup %4071  ;;  %v6004_v50 = vadd.f32 %v5806_v25, %v5112_v29  ;;  %v3838_v7 = vmul.f32 -1.442695, %v1694_v39  ;;  %v1509_v30 = vadd.f32 %v1508_v43, %v5937_v18 }
 0x238   : > { %8008 = vst [vmem:[#allocation98_spill] sm:$0xff] %v5991_v5  ;;  %vm6015_vm5 = vcmp.eq.f32.partialorder %v2041_v45, 8.507059e+37  ;;  %v2044_v44 = vor.u32 1.1754944e-38, %v2043_v34  ;;  %v6019_v0 = vpop.eup %4073  ;;  %v6021_v25 = vadd.f32 1.0, %v4072_v54  ;;  %v2025_v43 = vsel %vm6011_vm4, %v5823_v51, %v2021_v49  ;;  %v8014_v45 = vld [vmem:[#allocation24_spill] sm:$0xff] }
 0x239   : > { %v5973_v61 = vpop.f32.mrf.mxu2  ;;  %8009 = vst [vmem:[#allocation99_spill] sm:$0xff] %v6004_v50  ;;  %vm2038_vm6 = vweird.f32 %v5877_v12  ;;  %v2049_v24 = vsub.f32 1.0, %v2048_v48  ;;  %4075 = vpow2.f32 %v3838_v7  ;;  %v2317_v20 = vadd.f32 %v1509_v30, %v5139_v62 }
 0x23a   : > { %v2036_v34 = vadd.f32 %v5877_v12, %v2035_v11  ;;  %v2063_v39 = vmul.f32 %v6019_v0, %v5934_v35  ;;  %v6034_v54 = vadd.f32 %v1218_v17, %v5118_v46  ;;  %v6038_v51 = vadd.f32 %v5840_v26, %v4987_v63  ;;  %v1464_v49 = vpop.f32.mrf.mxu0  ;;  %vm6056_vm7 = vmor %vm2037_vm3, %vm2038_vm6 }
 0x23b   : > { %1547 = vmatmul.bf16.gmra.mxu1 %v8014_v45  ;;  %1636 = vmatmul.bf16.gmra.mxu2 %v8014_v45  ;;  %4077 = vrcp.f32 %v6021_v25  ;;  %v2058_v62 = vand.u32 2147483648, %v5849_v3  ;;  %v3853_v48 = vmul.f32 -1.442695, %v2317_v20  ;;  %v1465_v7 = vadd.f32 %v1464_v49, %v4990_v27 }
 0x23c   : > { %8015 = vst [vmem:[#allocation24_spill] sm:$0xff] %v6034_v54  ;;  %v2056_v11 = vand.u32 2147483647, %v5849_v3  ;;  %v2064_v30 = vsub.f32 1.0, %v2063_v39  ;;  %v6046_v23 = vadd.f32 %v5897_v2, %v5112_v29  ;;  %v6050_v26 = vsel %vm5977_vm2, %v2029_v59, %v2025_v43 }
 0x23d   : > { %v2050_v45 = vmul.f32 %v5941_v55, %v2049_v24  ;;  %vm2052_vm8 = vweird.f32 %v5849_v3  ;;  %4079 = vpow2.f32 %v3853_v48  ;;  %v1695_v2 = vadd.f32 %v1465_v7, %v5435_v47 }
 0x23e   : > { %8016 = vst [vmem:[#allocation100_spill] sm:$0xff] %v6046_v23  ;;  %v2040_v37 = vsel %vm6056_vm7, %v5877_v12, %v2036_v34  ;;  %v6068_v59 = vadd.f32 %v1221_v52, %v5118_v46  ;;  %v6072_v53 = vadd.f32 %v5915_v1, %v4987_v63  ;;  %v1510_v43 = vpop.f32.mrf.mxu1  ;;  %v2059_v24 = vor.u32 1.1754944e-38, %v2058_v62  ;;  %v3991_v12 = vld [vmem:[%s7758_s8] sm:$0xff] }
 0x23f   : > { %v2065_v49 = vmul.f32 %v6019_v0, %v2064_v30  ;;  %v4076_v48 = vpop.eup %4075  ;;  %v3839_v54 = vmul.f32 -1.442695, %v1695_v2  ;;  %v1511_v7 = vadd.f32 %v1510_v43, %v5937_v18  ;;  %vm6080_vm9 = vcmp.eq.f32.partialorder %v2056_v11, 8.507059e+37  ;;  %v8022_v30 = vld [vmem:[#allocation51_spill] sm:$0xff]  ;;  %3272 = vmatpush.bf16.msrb.mxu3 %v3991_v12 }
 0x240   : > { %8019 = vst [vmem:[#allocation101_spill] sm:$0xff] %v6068_v59  ;;  %v2071_v63 = vand.u32 2147483647, %v5934_v35  ;;  %v6087_v34 = vadd.f32 1.0, %v4076_v48  ;;  %v6091_v62 = vsel %vm6015_vm5, %v2044_v44, %v2040_v37  ;;  %vm2053_vm10 = vweird.f32 %v5941_v55  ;;  %v8033_v37 = vld [vmem:[#allocation31_spill] sm:$0xff]  ;;  %v4330_v59 = vld [vmem:[%s4729_s12] sm:$0xff] }
 0x241   : > { %v1597_v17 = vpop.f32.mrf.mxu2  ;;  %v6085_v1 = vpop.eup %4077  ;;  %4081 = vpow2.f32 %v3839_v54  ;;  %v2073_v20 = vand.u32 2147483648, %v5934_v35  ;;  %vm2068_vm11 = vweird.f32 %v6019_v0  ;;  %vm6108_vm12 = vmor %vm2052_vm8, %vm2053_vm10  ;;  %vm2067_vm13 = vweird.f32 %v5934_v35 }
 0x242   : > { %v1598_v39 = vadd.f32 %v1597_v17, %v5952_v14  ;;  %v2318_v17 = vadd.f32 %v1511_v7, %v8022_v30  ;;  %4083 = vrcp.f32 %v6087_v34  ;;  %v1466_v2 = vpop.f32.mrf.mxu0  ;;  %v2078_v9 = vmul.f32 %v6085_v1, %v6021_v25  ;;  %vm6130_vm15 = vmor %vm2067_vm13, %vm2068_vm11 }
 0x243   : > { %v4080_v44 = vpop.eup %4079  ;;  %vm6113_vm14 = vcmp.eq.f32.partialorder %v2071_v63, 8.507059e+37  ;;  %vm2082_vm0 = vweird.f32 %v6021_v25  ;;  %vm2083_vm1 = vweird.f32 %v6085_v1  ;;  %vm2097_vm6 = vweird.f32 %v6087_v34 }
 0x244   : > { %v2957_v47 = vmul.f32 %v5441_v8, %v1598_v39  ;;  %v2051_v8 = vadd.f32 %v5941_v55, %v2050_v45  ;;  %v2066_v39 = vadd.f32 %v6019_v0, %v2065_v49  ;;  %v1223_v45 = vpop.f32.mrf.mxu3  ;;  %v3854_v54 = vmul.f32 -1.442695, %v2318_v17  ;;  %vm6199_vm5 = vmor %vm2082_vm0, %vm2083_vm1 }
 0x245   : > { %v6119_v49 = vadd.f32 %v5973_v61, %v5112_v29  ;;  %v6121_v48 = vadd.f32 1.0, %v4080_v44  ;;  %v2079_v7 = vsub.f32 1.0, %v2078_v9  ;;  %v2088_v29 = vand.u32 2147483648, %v6021_v25 }
 0x246   : > { %v2989_v11 = vadd.f32 %v2957_v47, %v5143_v22  ;;  %v1467_v22 = vadd.f32 %v1466_v2, %v4990_v27  ;;  %v2055_v3 = vsel %vm6108_vm12, %v5941_v55, %v2051_v8  ;;  %4085 = vpow2.f32 %v3854_v54  ;;  %v1513_v55 = vpop.f32.mrf.mxu1 }
 0x247   : > { %8027 = vst [vmem:[#allocation51_spill] sm:$0xff] %v6119_v49  ;;  %v6136_v61 = vadd.f32 %v1223_v45, %v5118_v46  ;;  %4087 = vrcp.f32 %v6121_v48  ;;  %v2074_v8 = vor.u32 1.1754944e-38, %v2073_v20  ;;  %v4082_v30 = vpop.eup %4081  ;;  %v1514_v9 = vadd.f32 %v1513_v55, %v5937_v18 }
 0x248   : > { %v1696_v12 = vadd.f32 %v1467_v22, %v5483_v38  ;;  %v2070_v38 = vsel %vm6130_vm15, %v6019_v0, %v2066_v39  ;;  %v2086_v44 = vand.u32 2147483647, %v6021_v25  ;;  %v6145_v54 = vpop.eup %4083  ;;  %v6147_v46 = vadd.f32 1.0, %v4082_v30  ;;  %v8031_v0 = vld [vmem:[#allocation52_spill] sm:$0xff]  ;;  %v8032_v39 = vld [vmem:[#allocation53_spill] sm:$0xff] }
 0x249   : > { %v1599_v47 = vpop.f32.mrf.mxu2  ;;  %8030 = vst [vmem:[#allocation102_spill] sm:$0xff] %v6136_v61  ;;  %v6151_v45 = vsel %vm6080_vm9, %v2059_v24, %v2055_v3  ;;  %v2080_v22 = vmul.f32 %v6085_v1, %v2079_v7  ;;  %4089 = vtanh.f32 %v2989_v11  ;;  %v2093_v52 = vmul.f32 %v6145_v54, %v6087_v34 }
 0x24a   : > { %v1600_v35 = vadd.f32 %v1599_v47, %v5952_v14  ;;  %v3840_v17 = vmul.f32 -1.442695, %v1696_v12  ;;  %v6161_v47 = vsel %vm6113_vm14, %v2074_v8, %v2070_v38  ;;  %v2089_v12 = vor.u32 1.1754944e-38, %v2088_v29  ;;  %v1469_v24 = vpop.f32.mrf.mxu0 }
 0x24b   : > { %1552 = vmatmul.bf16.gmra.mxu1 %v8033_v37  ;;  %1641 = vmatmul.bf16.gmra.mxu2 %v8033_v37  ;;  %v1470_v63 = vadd.f32 %v1469_v24, %v4990_v27  ;;  %v2486_v55 = vand.u32 2147483647, %v6121_v48  ;;  %vm6169_vm2 = vcmp.eq.f32.partialorder %v2086_v44, 8.507059e+37  ;;  %v2488_v8 = vand.u32 2147483648, %v6121_v48  ;;  %v8036_v24 = vld [vmem:[#allocation42_spill] sm:$0xff] }
 0x24c   : > { %v2958_v2 = vmul.f32 %v5495_v36, %v1600_v35  ;;  %v2319_v36 = vadd.f32 %v1514_v9, %v8032_v39  ;;  %v4086_v7 = vpop.eup %4085  ;;  %4091 = vpow2.f32 %v3840_v17  ;;  %v2081_v30 = vadd.f32 %v6085_v1, %v2080_v22 }
 0x24d   : > { %v6173_v11 = vpop.eup %4087  ;;  %4093 = vrcp.f32 %v6147_v46  ;;  %v6176_v29 = vadd.f32 1.0, %v4086_v7  ;;  %vm2482_vm3 = vweird.f32 %v6121_v48  ;;  %v2103_v39 = vand.u32 2147483648, %v6087_v34 }
 0x24e   : > { %v2990_v20 = vadd.f32 %v2958_v2, %v8031_v0  ;;  %v3855_v35 = vmul.f32 -1.442695, %v2319_v36  ;;  %v2478_v17 = vmul.f32 %v6173_v11, %v6121_v48  ;;  %v1697_v2 = vadd.f32 %v1470_v63, %v5541_v10  ;;  %v1515_v44 = vpop.f32.mrf.mxu1 }
 0x24f   : > { %v2094_v0 = vsub.f32 1.0, %v2093_v52  ;;  %v1516_v7 = vadd.f32 %v1515_v44, %v5937_v18  ;;  %v6189_v3 = vpop.eup %4089  ;;  %vm6191_vm4 = vcmp.eq.f32.partialorder %v2486_v55, 8.507059e+37  ;;  %vm2098_vm7 = vweird.f32 %v6145_v54  ;;  %v8041_v55 = vld [vmem:[#allocation54_spill] sm:$0xff] }
 0x250   : > { %4095 = vpow2.f32 %v3855_v35  ;;  %v2479_v36 = vsub.f32 1.0, %v2478_v17  ;;  %v3841_v37 = vmul.f32 -1.442695, %v1697_v2  ;;  %v2489_v35 = vor.u32 1.1754944e-38, %v2488_v8  ;;  %v8042_v17 = vld [vmem:[#allocation55_spill] sm:$0xff]  ;;  %vm6269_vm12 = vmor %vm2097_vm6, %vm2098_vm7 }
 0x251   : > { %v1602_v38 = vpop.f32.mrf.mxu2  ;;  %4097 = vrcp.f32 %v6176_v29  ;;  %v2320_v2 = vadd.f32 %v1516_v7, %v8042_v17  ;;  %v2085_v8 = vsel %vm6199_vm5, %v6085_v1, %v2081_v30  ;;  %vm2483_vm8 = vweird.f32 %v6173_v11 }
 0x252   : > { %v1603_v9 = vadd.f32 %v1602_v38, %v5952_v14  ;;  %4099 = vtanh.f32 %v2990_v20  ;;  %v4092_v63 = vpop.eup %4091  ;;  %v2480_v20 = vmul.f32 %v6173_v11, %v2479_v36  ;;  %v2095_v44 = vmul.f32 %v6145_v54, %v2094_v0  ;;  %vm2484_vm9 = vmor %vm2482_vm3, %vm2483_vm8 }
 0x253   : > { %v6211_v25 = vpop.eup %4093  ;;  %4101 = vpow2.f32 %v3841_v37  ;;  %v3856_v36 = vmul.f32 -1.442695, %v2320_v2  ;;  %v6222_v1 = vadd.f32 1.0, %v4092_v63  ;;  %v2503_v17 = vand.u32 2147483648, %v6176_v29 }
 0x254   : > { %v2959_v22 = vmul.f32 %v8036_v24, %v1603_v9  ;;  %v1471_v9 = vpop.f32.mrf.mxu0  ;;  %v6215_v24 = vor.u32 1.1754944e-38, %v2103_v39  ;;  %v2481_v7 = vadd.f32 %v6173_v11, %v2480_v20  ;;  %v6229_v0 = vsel %vm6169_vm2, %v2089_v12, %v2085_v8 }
 0x255   : > { %4103 = vpow2.f32 %v3856_v36  ;;  %vm2497_vm10 = vweird.f32 %v6176_v29  ;;  %v6245_v63 = vadd.f32 %v6145_v54, %v2095_v44  ;;  %v6258_v44 = vmul.f32 %v6211_v25, %v6147_v46 }
 0x256   : > { %v2991_v38 = vadd.f32 %v2959_v22, %v8041_v55  ;;  %v4096_v61 = vpop.eup %4095  ;;  %v1472_v22 = vadd.f32 %v1471_v9, %v4990_v27  ;;  %v2501_v55 = vand.u32 2147483647, %v6176_v29  ;;  %v1518_v43 = vpop.f32.mrf.mxu1  ;;  %v2485_v12 = vsel %vm2484_vm9, %v6173_v11, %v2481_v7 }
 0x257   : > { %v6220_v52 = vpop.eup %4097  ;;  %v6224_v30 = vadd.f32 1.0, %v4096_v61  ;;  %v1519_v36 = vadd.f32 %v1518_v43, %v5937_v18  ;;  %v2490_v11 = vsel %vm6191_vm4, %v2489_v35, %v2485_v12  ;;  %v2504_v7 = vor.u32 1.1754944e-38, %v2503_v17 }
 0x258   : > { %v2493_v39 = vmul.f32 %v6220_v52, %v6176_v29  ;;  %v1698_v20 = vadd.f32 %v1472_v22, %v5594_v41  ;;  %v6239_v61 = vpop.eup %4099  ;;  %vm6249_vm11 = vcmp.eq.f32.partialorder %v2501_v55, 8.507059e+37  ;;  %v8047_v55 = vld [vmem:[#allocation38_spill] sm:$0xff]  ;;  %vm2498_vm13 = vweird.f32 %v6220_v52 }
 0x259   : > { %v1604_v37 = vpop.f32.mrf.mxu2  ;;  %4105 = vrcp.f32 %v6224_v30  ;;  %v4102_v22 = vpop.eup %4101  ;;  %v3053_v17 = vsub.f32 1.0, %v2490_v11  ;;  %v3117_v49 = vmul.f32 %v4330_v59, %v2490_v11  ;;  %vm2512_vm14 = vweird.f32 %v6224_v30  ;;  %vm6304_vm15 = vmor %vm2497_vm10, %vm2498_vm13 }
 0x25a   : > { %v1605_v2 = vadd.f32 %v1604_v37, %v5952_v14  ;;  %v2494_v41 = vsub.f32 1.0, %v2493_v39  ;;  %v3842_v8 = vmul.f32 -1.442695, %v1698_v20  ;;  %4107 = vrcp.f32 %v6222_v1  ;;  %v8045_v37 = vld [vmem:[#allocation57_spill] sm:$0xff]  ;;  %v8046_v39 = vld [vmem:[#allocation58_spill] sm:$0xff] }
 0x25b   : > { %v2321_v20 = vadd.f32 %v1519_v36, %v8046_v39  ;;  %1557 = vmatmul.bf16.gmra.mxu1 %v8047_v55  ;;  %1646 = vmatmul.bf16.gmra.mxu2 %v8047_v55  ;;  %v4104_v12 = vpop.eup %4103  ;;  %v3085_v55 = vmul.f32 %v6189_v3, %v3053_v17  ;;  %v2516_v43 = vand.u32 2147483647, %v6224_v30  ;;  %v2518_v17 = vand.u32 2147483648, %v6224_v30 }
 0x25c   : > { %v2960_v9 = vmul.f32 %v5602_v40, %v1605_v2  ;;  %4109 = vpow2.f32 %v3842_v8  ;;  %v2495_v2 = vmul.f32 %v6220_v52, %v2494_v41  ;;  %v1474_v35 = vpop.f32.mrf.mxu0  ;;  %v6278_v41 = vadd.f32 1.0, %v4102_v22 }
 0x25d   : > { %4111 = vtanh.f32 %v2991_v38  ;;  %v3857_v8 = vmul.f32 -1.442695, %v2321_v20  ;;  %v6284_v38 = vadd.f32 1.0, %v4104_v12  ;;  %vm6328_vm0 = vcmp.eq.f32.partialorder %v2516_v43, 8.507059e+37 }
 0x25e   : > { %v2992_v40 = vadd.f32 %v2960_v9, %v8045_v37  ;;  %v1475_v9 = vadd.f32 %v1474_v35, %v4990_v27  ;;  %v2496_v36 = vadd.f32 %v6220_v52, %v2495_v2  ;;  %v1520_v11 = vpop.f32.mrf.mxu1  ;;  %v6314_v35 = vadd.f32 %v3117_v49, %v3085_v55 }
 0x25f   : > { %v6282_v37 = vpop.eup %4105  ;;  %4113 = vpow2.f32 %v3857_v8  ;;  %v1521_v5 = vadd.f32 %v1520_v11, %v5937_v18  ;;  %v2519_v48 = vor.u32 1.1754944e-38, %v2518_v17  ;;  %vm2527_vm2 = vweird.f32 %v6284_v38 }
 0x260   : > { %v2508_v22 = vmul.f32 %v6282_v37, %v6224_v30  ;;  %v1699_v20 = vadd.f32 %v1475_v9, %v5643_v6  ;;  %v6308_v3 = vpop.eup %4107  ;;  %4115 = vrcp.f32 %v6284_v38  ;;  %v2500_v6 = vsel %vm6304_vm15, %v6220_v52, %v2496_v36  ;;  %v8052_v9 = vld [vmem:[#allocation84_spill] sm:$0xff]  ;;  %3386 = vst [vmem:[%s6294_s16] sm:$0xff] %v6314_v35  ;;  %v8055_v36 = vld [vmem:[#allocation59_spill] sm:$0xff] }
 0x261   : > { %v1607_v39 = vpop.f32.mrf.mxu2  ;;  %4117 = vrcp.f32 %v6278_v41  ;;  %v2505_v52 = vsel %vm6249_vm11, %v2504_v7, %v2500_v6  ;;  %vm2513_vm1 = vweird.f32 %v6282_v37 }
 0x262   : > { %v1608_v2 = vadd.f32 %v1607_v39, %v5952_v14  ;;  %v4110_v12 = vpop.eup %4109  ;;  %v2509_v29 = vsub.f32 1.0, %v2508_v22  ;;  %v3843_v8 = vmul.f32 -1.442695, %v1699_v20  ;;  %v8056_v22 = vld [vmem:[#allocation60_spill] sm:$0xff]  ;;  %vm6355_vm3 = vmor %vm2512_vm14, %vm2513_vm1 }
 0x263   : > { %v6319_v23 = vpop.eup %4111  ;;  %v6322_v50 = vadd.f32 1.0, %v4110_v12  ;;  %v2322_v20 = vadd.f32 %v1521_v5, %v8056_v22 }
 0x264   : > { %v2961_v39 = vmul.f32 %v8052_v9, %v1608_v2  ;;  %4119 = vpow2.f32 %v3843_v8  ;;  %v3054_v2 = vsub.f32 1.0, %v2505_v52  ;;  %v1476_v59 = vpop.f32.mrf.mxu0  ;;  %v2510_v11 = vmul.f32 %v6282_v37, %v2509_v29 }
 0x265   : > { %4121 = vtanh.f32 %v2992_v40  ;;  %v4114_v7 = vpop.eup %4113  ;;  %v3858_v6 = vmul.f32 -1.442695, %v2322_v20  ;;  %v1477_v43 = vadd.f32 %v1476_v59, %v4990_v27  ;;  %v2531_v8 = vand.u32 2147483647, %v6284_v38 }
 0x266   : > { %v2993_v55 = vadd.f32 %v2961_v39, %v8055_v36  ;;  %v3086_v12 = vmul.f32 %v6239_v61, %v3054_v2  ;;  %v6339_v9 = vpop.eup %4115  ;;  %4123 = vrcp.f32 %v6322_v50  ;;  %v6342_v5 = vadd.f32 1.0, %v4114_v7  ;;  %v8057_v39 = vld [vmem:[#allocation2_spill] sm:$0xff]  ;;  %v1523_v2 = vpop.f32.mrf.mxu1 }
 0x267   : > { %v3118_v29 = vmul.f32 %v2505_v52, %v8057_v39  ;;  %v2511_v36 = vadd.f32 %v6282_v37, %v2510_v11  ;;  %v2523_v17 = vmul.f32 %v6339_v9, %v6284_v38  ;;  %4125 = vpow2.f32 %v3858_v6  ;;  %v6359_v52 = vpop.eup %4117 }
 0x268   : > { %v1700_v61 = vadd.f32 %v1477_v43, %v5695_v56  ;;  %4127 = vrcp.f32 %v6342_v5  ;;  %v2533_v11 = vand.u32 2147483648, %v6284_v38  ;;  %vm6368_vm4 = vcmp.eq.f32.partialorder %v2531_v8, 8.507059e+37  ;;  %v8065_v8 = vld [vmem:[#allocation45_spill] sm:$0xff] }
 0x269   : > { %v1609_v40 = vpop.f32.mrf.mxu2  ;;  %v3150_v59 = vadd.f32 %v3118_v29, %v3086_v12  ;;  %v2515_v56 = vsel %vm6355_vm3, %v6282_v37, %v2511_v36  ;;  %v2524_v6 = vsub.f32 1.0, %v2523_v17  ;;  %4129 = vtanh.f32 %v2993_v55  ;;  %v8063_v36 = vld [vmem:[#allocation61_spill] sm:$0xff]  ;;  %v8064_v17 = vld [vmem:[#allocation62_spill] sm:$0xff] }
 0x26a   : > { %v1610_v22 = vadd.f32 %v1609_v40, %v5952_v14  ;;  %v4120_v7 = vpop.eup %4119  ;;  %v3844_v30 = vmul.f32 -1.442695, %v1700_v61  ;;  %v1524_v40 = vadd.f32 %v1523_v2, %v5937_v18  ;;  %v2520_v29 = vsel %vm6328_vm0, %v2519_v48, %v2515_v56 }
 0x26b   : > { %v6372_v16 = vpop.eup %4121  ;;  %v6374_v12 = vadd.f32 1.0, %v4120_v7  ;;  %v3181_v37 = vpack.c.bf16 %v3150_v59, %v6314_v35  ;;  %3387 = vst [vmem:[%s6294_s16 + $0x8] sm:$0xff] %v3150_v59  ;;  %1562 = vmatmul.bf16.gmra.mxu1 %v8065_v8  ;;  %1651 = vmatmul.bf16.gmra.mxu2 %v8065_v8  ;;  %vm2528_vm5 = vweird.f32 %v6339_v9  ;;  %v2534_v49 = vor.u32 1.1754944e-38, %v2533_v11  ;;  %v8066_v7 = vld [vmem:[#allocation3_spill] sm:$0xff] }
 0x26c   : > { %v2962_v43 = vmul.f32 %v5708_v15, %v1610_v22  ;;  %4131 = vpow2.f32 %v3844_v30  ;;  %v2323_v61 = vadd.f32 %v1524_v40, %v8064_v17  ;;  %v2525_v22 = vmul.f32 %v6339_v9, %v2524_v6  ;;  %v6385_v20 = vpop.eup %4123  ;;  %v1479_v35 = vpop.f32.mrf.mxu0  ;;  %vm6407_vm7 = vmor %vm2527_vm2, %vm2528_vm5 }
 0x26d   : > { %8062 = vst [vmem:[#allocation52_spill] sm:$0xff] %v6374_v12  ;;  %4133 = vrcp.f32 %v6374_v12  ;;  %3273 = vmatmul.bf16.vlgmr.msrb.gmra.mxu3 %v3181_v37  ;;  %v3055_v55 = vsub.f32 1.0, %v2520_v29  ;;  %v4126_v48 = vpop.eup %4125  ;;  %v1480_v59 = vadd.f32 %v1479_v35, %v4990_v27  ;;  %v3119_v30 = vmul.f32 %v2520_v29, %v8066_v7 }
 0x26e   : > { %v2994_v15 = vadd.f32 %v2962_v43, %v8063_v36  ;;  %v3859_v2 = vmul.f32 -1.442695, %v2323_v61  ;;  %v2526_v56 = vadd.f32 %v6339_v9, %v2525_v22  ;;  %v6392_v43 = vpop.eup %4127  ;;  %v6394_v6 = vadd.f32 1.0, %v4126_v48  ;;  %v1525_v8 = vpop.f32.mrf.mxu1 }
 0x26f   : > { %v3087_v37 = vmul.f32 %v6319_v23, %v3055_v55  ;;  %vm2542_vm6 = vweird.f32 %v6342_v5  ;;  %v2546_v11 = vand.u32 2147483647, %v6342_v5  ;;  %v2538_v36 = vmul.f32 %v6392_v43, %v6342_v5  ;;  %v6411_v23 = vpop.eup %4129 }
 0x270   : > { %4135 = vpow2.f32 %v3859_v2  ;;  %v1701_v17 = vadd.f32 %v1480_v59, %v5753_v33  ;;  %v2530_v33 = vsel %vm6407_vm7, %v6339_v9, %v2526_v56  ;;  %v2548_v35 = vand.u32 2147483648, %v6342_v5  ;;  %v8070_v9 = vld [vmem:[#allocation63_spill] sm:$0xff] }
 0x271   : > { %v1612_v40 = vpop.f32.mrf.mxu2  ;;  %4137 = vrcp.f32 %v6394_v6  ;;  %v3151_v22 = vadd.f32 %v3119_v30, %v3087_v37  ;;  %v2539_v48 = vsub.f32 1.0, %v2538_v36  ;;  %v1526_v59 = vadd.f32 %v1525_v8, %v5937_v18  ;;  %v8071_v30 = vld [vmem:[#allocation64_spill] sm:$0xff] }
 0x272   : > { %v1613_v61 = vadd.f32 %v1612_v40, %v5952_v14  ;;  %v4132_v55 = vpop.eup %4131  ;;  %v3845_v38 = vmul.f32 -1.442695, %v1701_v17  ;;  %4139 = vtanh.f32 %v2994_v15  ;;  %v2535_v12 = vsel %vm6368_vm4, %v2534_v49, %v2530_v33  ;;  %v8074_v33 = vld [vmem:[#allocation4_spill] sm:$0xff] }
 0x273   : > { %v6420_v7 = vpop.eup %4133  ;;  %v6422_v40 = vadd.f32 1.0, %v4132_v55  ;;  %3388 = vst [vmem:[%s6294_s16 + $0x10] sm:$0xff] %v3151_v22  ;;  %vm2543_vm8 = vweird.f32 %v6392_v43  ;;  %v2324_v37 = vadd.f32 %v1526_v59, %v8071_v30  ;;  %v3056_v36 = vsub.f32 1.0, %v2535_v12 }
 0x274   : > { %v2963_v2 = vmul.f32 %v5759_v32, %v1613_v61  ;;  %4141 = vpow2.f32 %v3845_v38  ;;  %v1481_v32 = vpop.f32.mrf.mxu0  ;;  %v2540_v17 = vmul.f32 %v6392_v43, %v2539_v48  ;;  %vm6432_vm9 = vcmp.eq.f32.partialorder %v2546_v11, 8.507059e+37  ;;  %vm6454_vm11 = vmor %vm2542_vm6, %vm2543_vm8 }
 0x275   : > { %8069 = vst [vmem:[#allocation53_spill] sm:$0xff] %v6422_v40  ;;  %4143 = vrcp.f32 %v6422_v40  ;;  %v2549_v39 = vor.u32 1.1754944e-38, %v2548_v35  ;;  %v3860_v49 = vmul.f32 -1.442695, %v2324_v37  ;;  %v1482_v29 = vadd.f32 %v1481_v32, %v4990_v27 }
 0x276   : > { %v2995_v56 = vadd.f32 %v2963_v2, %v8070_v9  ;;  %v4136_v15 = vpop.eup %4135  ;;  %v3088_v8 = vmul.f32 %v6372_v16, %v3056_v36  ;;  %v3120_v55 = vmul.f32 %v2535_v12, %v8074_v33  ;;  %v2541_v48 = vadd.f32 %v6392_v43, %v2540_v17  ;;  %v1528_v37 = vpop.f32.mrf.mxu1 }
 0x277   : > { %v6439_v38 = vpop.eup %4137  ;;  %v6441_v2 = vadd.f32 1.0, %v4136_v15  ;;  %vm2557_vm10 = vweird.f32 %v6394_v6  ;;  %v2561_v11 = vand.u32 2147483647, %v6394_v6  ;;  %4145 = vpow2.f32 %v3860_v49 }
 0x278   : > { %v2553_v35 = vmul.f32 %v6439_v38, %v6394_v6  ;;  %v1702_v9 = vadd.f32 %v1482_v29, %v5800_v58  ;;  %v6458_v30 = vpop.eup %4139  ;;  %v3152_v36 = vadd.f32 %v3120_v55, %v3088_v8  ;;  %v2545_v58 = vsel %vm6454_vm11, %v6392_v43, %v2541_v48  ;;  %v8077_v43 = vld [vmem:[#allocation65_spill] sm:$0xff]  ;;  %v8078_v48 = vld [vmem:[#allocation66_spill] sm:$0xff] }
 0x279   : > { %v1614_v59 = vpop.f32.mrf.mxu2  ;;  %4147 = vrcp.f32 %v6441_v2  ;;  %v2563_v32 = vand.u32 2147483648, %v6394_v6  ;;  %v1529_v29 = vadd.f32 %v1528_v37, %v5937_v18  ;;  %v2550_v8 = vsel %vm6432_vm9, %v2549_v39, %v2545_v58 }
 0x27a   : > { %v1615_v16 = vadd.f32 %v1614_v59, %v5952_v14  ;;  %v4142_v17 = vpop.eup %4141  ;;  %v2554_v15 = vsub.f32 1.0, %v2553_v35  ;;  %v3846_v5 = vmul.f32 -1.442695, %v1702_v9  ;;  %4149 = vtanh.f32 %v2995_v56  ;;  %3389 = vst [vmem:[%s6294_s16 + $0x18] sm:$0xff] %v3152_v36  ;;  %v8079_v9 = vld [vmem:[#allocation56_spill] sm:$0xff] }
 0x27b   : > { %v6467_v33 = vpop.eup %4143  ;;  %v6469_v59 = vadd.f32 1.0, %v4142_v17  ;;  %v3182_v40 = vpack.c.bf16 %v3152_v36, %v3151_v22  ;;  %v2325_v35 = vadd.f32 %v1529_v29, %v8078_v48  ;;  %1567 = vmatmul.bf16.gmra.mxu1 %v8079_v9  ;;  %1656 = vmatmul.bf16.gmra.mxu2 %v8079_v9  ;;  %vm2558_vm13 = vweird.f32 %v6439_v38 }
 0x27c   : > { %v2964_v49 = vmul.f32 %v5810_v60, %v1615_v16  ;;  %4151 = vpow2.f32 %v3846_v5  ;;  %v2555_v60 = vmul.f32 %v6439_v38, %v2554_v15  ;;  %v1484_v56 = vpop.f32.mrf.mxu0  ;;  %vm6481_vm14 = vcmp.eq.f32.partialorder %v2561_v11, 8.507059e+37  ;;  %v8082_v11 = vld [vmem:[#allocation5_spill] sm:$0xff]  ;;  %vm2559_vm15 = vmor %vm2557_vm10, %vm2558_vm13 }
 0x27d   : > { %4153 = vrcp.f32 %v6469_v59  ;;  %3278 = vmatmul.bf16.gmra.mxu3 %v3182_v40  ;;  %v3057_v61 = vsub.f32 1.0, %v2550_v8  ;;  %v4146_v39 = vpop.eup %4145  ;;  %v3861_v16 = vmul.f32 -1.442695, %v2325_v35  ;;  %v1485_v12 = vadd.f32 %v1484_v56, %v4990_v27 }
 0x27e   : > { %v2996_v55 = vadd.f32 %v2964_v49, %v8077_v43  ;;  %v2556_v37 = vadd.f32 %v6439_v38, %v2555_v60  ;;  %v2564_v36 = vor.u32 1.1754944e-38, %v2563_v32  ;;  %v6489_v17 = vadd.f32 1.0, %v4146_v39 }
 0x27f   : > { %v6487_v58 = vpop.eup %4147  ;;  %v3089_v15 = vmul.f32 %v6411_v23, %v3057_v61  ;;  %v3121_v5 = vmul.f32 %v2550_v8, %v8082_v11  ;;  %v1703_v29 = vadd.f32 %v1485_v12, %v5846_v31  ;;  %v1530_v23 = vpop.f32.mrf.mxu1  ;;  %v2576_v48 = vand.u32 2147483647, %v6441_v2 }
 0x280   : > { %4155 = vtanh.f32 %v2996_v55  ;;  %v2568_v49 = vmul.f32 %v6487_v58, %v6441_v2  ;;  %v6501_v32 = vpop.eup %4149  ;;  %v2560_v8 = vsel %vm2559_vm15, %v6439_v38, %v2556_v37  ;;  %v1531_v56 = vadd.f32 %v1530_v23, %v5937_v18  ;;  %v8084_v37 = vld [vmem:[#allocation68_spill] sm:$0xff]  ;;  %v8087_v23 = vld [vmem:[#allocation6_spill] sm:$0xff] }
 0x281   : > { %v1617_v40 = vpop.f32.mrf.mxu2  ;;  %4157 = vpow2.f32 %v3861_v16  ;;  %v3153_v55 = vadd.f32 %v3121_v5, %v3089_v15  ;;  %v3847_v9 = vmul.f32 -1.442695, %v1703_v29  ;;  %v2565_v39 = vsel %vm6481_vm14, %v2564_v36, %v2560_v8  ;;  %v8083_v16 = vld [vmem:[#allocation67_spill] sm:$0xff] }
 0x282   : > { %v1618_v43 = vadd.f32 %v1617_v40, %v5952_v14  ;;  %4159 = vrcp.f32 %v6489_v17  ;;  %v4152_v35 = vpop.eup %4151  ;;  %v2569_v31 = vsub.f32 1.0, %v2568_v49  ;;  %vm2572_vm0 = vweird.f32 %v6441_v2 }
 0x283   : > { %v6508_v6 = vpop.eup %4153  ;;  %v6510_v61 = vadd.f32 1.0, %v4152_v35  ;;  %3390 = vst [vmem:[%s6294_s16 + $0x20] sm:$0xff] %v3153_v55  ;;  %v2578_v38 = vand.u32 2147483648, %v6441_v2  ;;  %4161 = vpow2.f32 %v3847_v9  ;;  %v2326_v40 = vadd.f32 %v1531_v56, %v8084_v37 }
 0x284   : > { %v2965_v60 = vmul.f32 %v5853_v21, %v1618_v43  ;;  %v3058_v21 = vsub.f32 1.0, %v2565_v39  ;;  %v1486_v11 = vpop.f32.mrf.mxu0  ;;  %v2570_v5 = vmul.f32 %v6487_v58, %v2569_v31  ;;  %vm2573_vm1 = vweird.f32 %v6487_v58 }
 0x285   : > { %4163 = vrcp.f32 %v6510_v61  ;;  %vm6524_vm2 = vcmp.eq.f32.partialorder %v2576_v48, 8.507059e+37  ;;  %v3862_v49 = vmul.f32 -1.442695, %v2326_v40  ;;  %v1487_v29 = vadd.f32 %v1486_v11, %v4990_v27  ;;  %vm6544_vm3 = vmor %vm2572_vm0, %vm2573_vm1 }
 0x286   : > { %v2997_v12 = vadd.f32 %v2965_v60, %v8083_v16  ;;  %v6519_v15 = vpop.eup %4155  ;;  %v3090_v43 = vmul.f32 %v6458_v30, %v3058_v21  ;;  %v3122_v8 = vmul.f32 %v2565_v39, %v8087_v23  ;;  %v2571_v60 = vadd.f32 %v6487_v58, %v2570_v5 }
 0x287   : > { %v4158_v36 = vpop.eup %4157  ;;  %v2579_v48 = vor.u32 1.1754944e-38, %v2578_v38  ;;  %v1704_v16 = vadd.f32 %v1487_v29, %v5895_v13  ;;  %v2591_v13 = vand.u32 2147483647, %v6489_v17  ;;  %vm2587_vm4 = vweird.f32 %v6489_v17 }
 0x288   : > { %v6531_v35 = vpop.eup %4159  ;;  %v6533_v9 = vadd.f32 1.0, %v4158_v36  ;;  %4165 = vtanh.f32 %v2997_v12  ;;  %v1533_v38 = vpop.f32.mrf.mxu1  ;;  %v3154_v12 = vadd.f32 %v3122_v8, %v3090_v43  ;;  %v2575_v37 = vsel %vm6544_vm3, %v6487_v58, %v2571_v60  ;;  %v8090_v58 = vld [vmem:[#allocation69_spill] sm:$0xff]  ;;  %v8091_v8 = vld [vmem:[#allocation70_spill] sm:$0xff]  ;;  %v8092_v60 = vld [vmem:[#allocation11_spill] sm:$0xff] }
 0x289   : > { %v1619_v31 = vpop.f32.mrf.mxu2  ;;  %v2583_v56 = vmul.f32 %v6531_v35, %v6489_v17  ;;  %4167 = vpow2.f32 %v3862_v49  ;;  %v4162_v40 = vpop.eup %4161  ;;  %v3848_v11 = vmul.f32 -1.442695, %v1704_v16  ;;  %v1534_v2 = vadd.f32 %v1533_v38, %v5937_v18 }
 0x28a   : > { %v1620_v30 = vadd.f32 %v1619_v31, %v5952_v14  ;;  %4169 = vrcp.f32 %v6533_v9  ;;  %v6557_v49 = vadd.f32 1.0, %v4162_v40  ;;  %v3183_v29 = vpack.c.bf16 %v3154_v12, %v3153_v55  ;;  %3391 = vst [vmem:[%s6294_s16 + $0x28] sm:$0xff] %v3154_v12 }
 0x28b   : > { %v2584_v21 = vsub.f32 1.0, %v2583_v56  ;;  %v6555_v36 = vpop.eup %4163  ;;  %v2580_v43 = vsel %vm6524_vm2, %v2579_v48, %v2575_v37  ;;  %4171 = vpow2.f32 %v3848_v11  ;;  %v2327_v31 = vadd.f32 %v1534_v2, %v8091_v8  ;;  %1572 = vmatmul.bf16.gmra.mxu1 %v8092_v60  ;;  %1661 = vmatmul.bf16.gmra.mxu2 %v8092_v60  ;;  %v8095_v11 = vld [vmem:[#allocation7_spill] sm:$0xff] }
 0x28c   : > { %v2966_v5 = vmul.f32 %v5902_v57, %v1620_v30  ;;  %v1489_v55 = vpop.f32.mrf.mxu0  ;;  %vm2588_vm5 = vweird.f32 %v6531_v35  ;;  %vm6571_vm6 = vcmp.eq.f32.partialorder %v2591_v13, 8.507059e+37  ;;  %v2593_v48 = vand.u32 2147483648, %v6489_v17 }
 0x28d   : > { %v2585_v57 = vmul.f32 %v6531_v35, %v2584_v21  ;;  %3283 = vmatmul.bf16.gmra.mxu3 %v3183_v29  ;;  %v3059_v16 = vsub.f32 1.0, %v2580_v43  ;;  %4173 = vrcp.f32 %v6557_v49  ;;  %v3863_v39 = vmul.f32 -1.442695, %v2327_v31  ;;  %vm2589_vm7 = vmor %vm2587_vm4, %vm2588_vm5 }
 0x28e   : > { %v2998_v23 = vadd.f32 %v2966_v5, %v8090_v58  ;;  %v6568_v56 = vpop.eup %4165  ;;  %v1490_v38 = vadd.f32 %v1489_v55, %v4990_v27  ;;  %v3123_v5 = vmul.f32 %v2580_v43, %v8095_v11  ;;  %v2594_v43 = vor.u32 1.1754944e-38, %v2593_v48  ;;  %v8096_v48 = vld [vmem:[#allocation71_spill] sm:$0xff] }
 0x28f   : > { %v4168_v30 = vpop.eup %4167  ;;  %v2586_v12 = vadd.f32 %v6531_v35, %v2585_v57  ;;  %v3091_v21 = vmul.f32 %v6501_v32, %v3059_v16  ;;  %vm2602_vm8 = vweird.f32 %v6533_v9  ;;  %v2608_v11 = vand.u32 2147483648, %v6533_v9 }
 0x290   : > { %v6579_v37 = vpop.eup %4169  ;;  %v6581_v40 = vadd.f32 1.0, %v4168_v30  ;;  %4175 = vtanh.f32 %v2998_v23  ;;  %v1705_v29 = vadd.f32 %v1490_v38, %v5945_v28  ;;  %v1535_v23 = vpop.f32.mrf.mxu1  ;;  %v2606_v30 = vand.u32 2147483647, %v6533_v9  ;;  %v8097_v38 = vld [vmem:[#allocation72_spill] sm:$0xff] }
 0x291   : > { %v1622_v13 = vpop.f32.mrf.mxu2  ;;  %v2598_v2 = vmul.f32 %v6579_v37, %v6533_v9  ;;  %4177 = vpow2.f32 %v3863_v39  ;;  %v2590_v32 = vsel %vm2589_vm7, %v6531_v35, %v2586_v12  ;;  %v3155_v8 = vadd.f32 %v3123_v5, %v3091_v21  ;;  %v4172_v31 = vpop.eup %4171 }
 0x292   : > { %v1623_v58 = vadd.f32 %v1622_v13, %v5952_v14  ;;  %4179 = vrcp.f32 %v6581_v40  ;;  %v3849_v57 = vmul.f32 -1.442695, %v1705_v29  ;;  %v1536_v28 = vadd.f32 %v1535_v23, %v5937_v18  ;;  %v8098_v23 = vld [vmem:[#allocation8_spill] sm:$0xff] }
 0x293   : > { %v2599_v60 = vsub.f32 1.0, %v2598_v2  ;;  %v6597_v16 = vadd.f32 1.0, %v4172_v31  ;;  %v2595_v17 = vsel %vm6571_vm6, %v2594_v43, %v2590_v32  ;;  %3392 = vst [vmem:[%s6294_s16 + $0x30] sm:$0xff] %v3155_v8  ;;  %v6604_v35 = vpop.eup %4173  ;;  %vm2603_vm9 = vweird.f32 %v6579_v37 }
 0x294   : > { %v2967_v55 = vmul.f32 %v5956_v42, %v1623_v58  ;;  %4181 = vpow2.f32 %v3849_v57  ;;  %v2328_v12 = vadd.f32 %v1536_v28, %v8097_v38  ;;  %v3060_v42 = vsub.f32 1.0, %v2595_v17  ;;  %v1491_v21 = vpop.f32.mrf.mxu0  ;;  %vm6634_vm11 = vmor %vm2602_vm8, %vm2603_vm9 }
 0x295   : > { %4183 = vrcp.f32 %v6597_v16  ;;  %v2600_v22 = vmul.f32 %v6579_v37, %v2599_v60  ;;  %v1492_v29 = vadd.f32 %v1491_v21, %v4990_v27  ;;  %v3124_v32 = vmul.f32 %v2595_v17, %v8098_v23 }
 0x296   : > { %v2999_v39 = vadd.f32 %v2967_v55, %v8096_v48  ;;  %v6608_v13 = vpop.eup %4175  ;;  %v3864_v2 = vmul.f32 -1.442695, %v2328_v12  ;;  %v3092_v58 = vmul.f32 %v6519_v15, %v3060_v42  ;;  %vm6622_vm10 = vcmp.eq.f32.partialorder %v2606_v30, 8.507059e+37 }
 0x297   : > { %v4178_v5 = vpop.eup %4177  ;;  %v2601_v60 = vadd.f32 %v6579_v37, %v2600_v22  ;;  %v1706_v15 = vadd.f32 %v1492_v29, %v5995_v4  ;;  %v2609_v4 = vor.u32 1.1754944e-38, %v2608_v11  ;;  %v2621_v23 = vand.u32 2147483647, %v6581_v40 }
 0x298   : > { %v6617_v43 = vpop.eup %4179  ;;  %v6619_v31 = vadd.f32 1.0, %v4178_v5  ;;  %4185 = vtanh.f32 %v2999_v39  ;;  %v1538_v30 = vpop.f32.mrf.mxu1  ;;  %v3156_v39 = vadd.f32 %v3124_v32, %v3092_v58  ;;  %v8104_v32 = vld [vmem:[#allocation14_spill] sm:$0xff]  ;;  %vm2617_vm13 = vweird.f32 %v6581_v40 }
 0x299   : > { %v1624_v57 = vpop.f32.mrf.mxu2  ;;  %v2613_v28 = vmul.f32 %v6617_v43, %v6581_v40  ;;  %4187 = vpow2.f32 %v3864_v2  ;;  %v2605_v38 = vsel %vm6634_vm11, %v6579_v37, %v2601_v60  ;;  %v3850_v21 = vmul.f32 -1.442695, %v1706_v15  ;;  %v8103_v37 = vld [vmem:[#allocation74_spill] sm:$0xff] }
 0x29a   : > { %v1625_v17 = vadd.f32 %v1624_v57, %v5952_v14  ;;  %4189 = vrcp.f32 %v6619_v31  ;;  %v4182_v12 = vpop.eup %4181  ;;  %v1539_v9 = vadd.f32 %v1538_v30, %v5937_v18  ;;  %v3184_v29 = vpack.c.bf16 %v3156_v39, %v3155_v8  ;;  %3393 = vst [vmem:[%s6294_s16 + $0x38] sm:$0xff] %v3156_v39  ;;  %v8105_v8 = vld [vmem:[#allocation73_spill] sm:$0xff] }
 0x29b   : > { %v2614_v42 = vsub.f32 1.0, %v2613_v28  ;;  %v6644_v5 = vpop.eup %4183  ;;  %v6646_v2 = vadd.f32 1.0, %v4182_v12  ;;  %v2610_v58 = vsel %vm6622_vm10, %v2609_v4, %v2605_v38  ;;  %4191 = vpow2.f32 %v3850_v21  ;;  %1577 = vmatmul.bf16.gmra.mxu1 %v8104_v32  ;;  %1666 = vmatmul.bf16.gmra.mxu2 %v8104_v32 }
 0x29c   : > { %v2968_v22 = vmul.f32 %v5999_v19, %v1625_v17  ;;  %v2329_v11 = vadd.f32 %v1539_v9, %v8103_v37  ;;  %v1494_v55 = vpop.f32.mrf.mxu0  ;;  %vm2618_vm14 = vweird.f32 %v6617_v43  ;;  %v2623_v28 = vand.u32 2147483648, %v6581_v40 }
 0x29d   : > { %v2615_v19 = vmul.f32 %v6617_v43, %v2614_v42  ;;  %3288 = vmatmul.bf16.gmra.mxu3 %v3184_v29  ;;  %v3061_v15 = vsub.f32 1.0, %v2610_v58  ;;  %4193 = vrcp.f32 %v6646_v2  ;;  %v1495_v30 = vadd.f32 %v1494_v55, %v4990_v27  ;;  %vm2619_vm0 = vmor %vm2617_vm13, %vm2618_vm14 }
 0x29e   : > { %v6657_v57 = vpop.eup %4185  ;;  %v3000_v60 = vadd.f32 %v2968_v22, %v8105_v8  ;;  %v3865_v48 = vmul.f32 -1.442695, %v2329_v11  ;;  %vm6669_vm15 = vcmp.eq.f32.partialorder %v2621_v23, 8.507059e+37  ;;  %v8108_v22 = vld [vmem:[#allocation9_spill] sm:$0xff]  ;;  %vm2632_vm1 = vweird.f32 %v6619_v31 }
 0x29f   : > { %v4188_v17 = vpop.eup %4187  ;;  %v2616_v39 = vadd.f32 %v6617_v43, %v2615_v19  ;;  %v3093_v21 = vmul.f32 %v6568_v56, %v3061_v15  ;;  %v3125_v9 = vmul.f32 %v2610_v58, %v8108_v22  ;;  %v1707_v37 = vadd.f32 %v1495_v30, %v6038_v51 }
 0x2a0   : > { %v6665_v38 = vpop.eup %4189  ;;  %v6667_v4 = vadd.f32 1.0, %v4188_v17  ;;  %4195 = vpow2.f32 %v3865_v48  ;;  %v1540_v23 = vpop.f32.mrf.mxu1  ;;  %v2624_v58 = vor.u32 1.1754944e-38, %v2623_v28  ;;  %v2109_v48 = vsub.f32 1.0, %v6258_v44 }
 0x2a1   : > { %v1627_v12 = vpop.f32.mrf.mxu2  ;;  %v2628_v29 = vmul.f32 %v6665_v38, %v6619_v31  ;;  %v2620_v56 = vsel %vm2619_vm0, %v6617_v43, %v2616_v39  ;;  %v3157_v32 = vadd.f32 %v3125_v9, %v3093_v21  ;;  %v4192_v19 = vpop.eup %4191  ;;  %v3851_v55 = vmul.f32 -1.442695, %v1707_v37  ;;  %v8109_v43 = vld [vmem:[#allocation75_spill] sm:$0xff]  ;;  %v8110_v39 = vld [vmem:[#allocation76_spill] sm:$0xff] }
 0x2a2   : > { %v1628_v11 = vadd.f32 %v1627_v12, %v5952_v14  ;;  %4197 = vrcp.f32 %v6667_v4  ;;  %v1541_v15 = vadd.f32 %v1540_v23, %v5937_v18  ;;  %v6687_v17 = vadd.f32 1.0, %v4192_v19 }
 0x2a3   : > { %v2629_v8 = vsub.f32 1.0, %v2628_v29  ;;  %4199 = vtanh.f32 %v3000_v60  ;;  %v2625_v40 = vsel %vm6669_vm15, %v2624_v58, %v2620_v56  ;;  %3394 = vst [vmem:[%s6294_s16 + $0x40] sm:$0xff] %v3157_v32  ;;  %v6693_v30 = vpop.eup %4193  ;;  %vm2633_vm2 = vweird.f32 %v6665_v38  ;;  %v8111_v58 = vld [vmem:[#allocation10_spill] sm:$0xff] }
 0x2a4   : > { %v2969_v51 = vmul.f32 %v6050_v26, %v1628_v11  ;;  %v2330_v12 = vadd.f32 %v1541_v15, %v8110_v39  ;;  %v3062_v21 = vsub.f32 1.0, %v2625_v40  ;;  %4201 = vpow2.f32 %v3851_v55  ;;  %v1496_v26 = vpop.f32.mrf.mxu0  ;;  %vm6716_vm3 = vmor %vm2632_vm1, %vm2633_vm2 }
 0x2a5   : > { %v2630_v22 = vmul.f32 %v6665_v38, %v2629_v8  ;;  %v2636_v60 = vand.u32 2147483647, %v6619_v31  ;;  %4203 = vrcp.f32 %v6687_v17  ;;  %v1497_v29 = vadd.f32 %v1496_v26, %v4990_v27 }
 0x2a6   : > { %v3001_v28 = vadd.f32 %v2969_v51, %v8109_v43  ;;  %v4196_v42 = vpop.eup %4195  ;;  %v3866_v9 = vmul.f32 -1.442695, %v2330_v12  ;;  %v3094_v37 = vmul.f32 %v6608_v13, %v3062_v21  ;;  %v3126_v19 = vmul.f32 %v2625_v40, %v8111_v58  ;;  %v8115_v58 = vld [vmem:[#allocation17_spill] sm:$0xff]  ;;  %v8116_v13 = vld [vmem:[#allocation12_spill] sm:$0xff] }
 0x2a7   : > { %v6704_v23 = vadd.f32 1.0, %v4196_v42  ;;  %v2631_v8 = vadd.f32 %v6665_v38, %v2630_v22  ;;  %v2638_v55 = vand.u32 2147483648, %v6619_v31  ;;  %v1708_v15 = vadd.f32 %v1497_v29, %v6072_v53 }
 0x2a8   : > { %v4198_v11 = vpop.eup %4197  ;;  %4205 = vpow2.f32 %v3866_v9  ;;  %v1543_v43 = vpop.f32.mrf.mxu1  ;;  %v3158_v39 = vadd.f32 %v3126_v19, %v3094_v37  ;;  %vm2637_vm4 = vcmp.eq.f32.partialorder %v2636_v60, 8.507059e+37  ;;  %vm2647_vm5 = vweird.f32 %v6667_v4  ;;  %v8114_v37 = vld [vmem:[#allocation78_spill] sm:$0xff] }
 0x2a9   : > { %v1629_v56 = vpop.f32.mrf.mxu2  ;;  %v2643_v51 = vmul.f32 %v4198_v11, %v6667_v4  ;;  %v6720_v40 = vpop.eup %4199  ;;  %4207 = vrcp.f32 %v6704_v23  ;;  %v2635_v53 = vsel %vm6716_vm3, %v6665_v38, %v2631_v8  ;;  %v2639_v12 = vor.u32 1.1754944e-38, %v2638_v55 }
 0x2aa   : > { %v1630_v27 = vadd.f32 %v1629_v56, %v5952_v14  ;;  %v3852_v26 = vmul.f32 -1.442695, %v1708_v15  ;;  %v1544_v22 = vadd.f32 %v1543_v43, %v5937_v18  ;;  %v4202_v31 = vpop.eup %4201  ;;  %4209 = vtanh.f32 %v3001_v28  ;;  %3395 = vst [vmem:[%s6294_s16 + $0x48] sm:$0xff] %v3158_v39 }
 0x2ab   : > { %v2644_v21 = vsub.f32 1.0, %v2643_v51  ;;  %v3185_v42 = vpack.c.bf16 %v3158_v39, %v3157_v32  ;;  %v2640_v9 = vsel %vm2637_vm4, %v2639_v12, %v2635_v53  ;;  %v6729_v29 = vpop.eup %4203  ;;  %1582 = vmatmul.bf16.gmra.mxu1 %v8115_v58  ;;  %1671 = vmatmul.bf16.gmra.mxu2 %v8115_v58  ;;  %vm2648_vm6 = vweird.f32 %v4198_v11 }
 0x2ac   : > { %4211 = vpow2.f32 %v3852_v26  ;;  %v2331_v56 = vadd.f32 %v1544_v22, %v8114_v37  ;;  %v2970_v60 = vmul.f32 %v6091_v62, %v1630_v27  ;;  %v2651_v32 = vand.u32 2147483647, %v6667_v4  ;;  %vm2649_vm7 = vmor %vm2647_vm5, %vm2648_vm6 }
 0x2ad   : > { %v2645_v38 = vmul.f32 %v4198_v11, %v2644_v21  ;;  %3293 = vmatmul.bf16.gmra.mxu3 %v3185_v42  ;;  %v2653_v28 = vand.u32 2147483648, %v6667_v4  ;;  %v3063_v19 = vsub.f32 1.0, %v2640_v9  ;;  %v6737_v55 = vadd.f32 1.0, %v4202_v31  ;;  %v8117_v42 = vld [vmem:[#allocation77_spill] sm:$0xff] }
 0x2ae   : > { %v4206_v8 = vpop.eup %4205  ;;  %v3867_v51 = vmul.f32 -1.442695, %v2331_v56  ;;  %v3127_v43 = vmul.f32 %v2640_v9, %v8116_v13  ;;  %vm2652_vm8 = vcmp.eq.f32.partialorder %v2651_v32, 8.507059e+37  ;;  %v3002_v9 = vadd.f32 %v2970_v60, %v8117_v42  ;;  %v8121_v60 = vld [vmem:[#allocation13_spill] sm:$0xff] }
 0x2af   : > { %v2646_v15 = vadd.f32 %v4198_v11, %v2645_v38  ;;  %v6740_v39 = vpop.eup %4207  ;;  %v6742_v53 = vadd.f32 1.0, %v4206_v8  ;;  %v2654_v62 = vor.u32 1.1754944e-38, %v2653_v28  ;;  %v3095_v27 = vmul.f32 %v6657_v57, %v3063_v19 }
 0x2b0   : > { %v2658_v21 = vmul.f32 %v6740_v39, %v6704_v23  ;;  %4213 = vpow2.f32 %v3867_v51  ;;  %v6750_v31 = vpop.eup %4209  ;;  %v1545_v4 = vpop.f32.mrf.mxu1  ;;  %v8118_v19 = vand.u32 2147483647, %v6087_v34  ;;  %vm2663_vm10 = vweird.f32 %v6740_v39 }
 0x2b1   : > { %v1632_v12 = vpop.f32.mrf.mxu2  ;;  %v2650_v22 = vsel %vm2649_vm7, %v4198_v11, %v2646_v15  ;;  %4215 = vrcp.f32 %v6742_v53  ;;  %v3159_v56 = vadd.f32 %v3127_v43, %v3095_v27  ;;  %v1546_v32 = vadd.f32 %v1545_v4, %v5937_v18  ;;  %v8122_v15 = vld [vmem:[#allocation79_spill] sm:$0xff]  ;;  %v8123_v43 = vld [vmem:[#allocation25_spill] sm:$0xff] }
 0x2b2   : > { %v1633_v26 = vadd.f32 %v1632_v12, %v5952_v14  ;;  %v2655_v37 = vsel %vm2652_vm8, %v2654_v62, %v2650_v22  ;;  %v4212_v58 = vpop.eup %4211  ;;  %v2659_v38 = vsub.f32 1.0, %v2658_v21  ;;  %vm6758_vm9 = vcmp.eq.f32.partialorder %v8118_v19, 8.507059e+37  ;;  %v8128_v11 = vld [vmem:[#allocation15_spill] sm:$0xff] }
 0x2b3   : > { %v3064_v28 = vsub.f32 1.0, %v2655_v37  ;;  %4217 = vrcp.f32 %v6737_v55  ;;  %v6763_v8 = vadd.f32 1.0, %v4212_v58  ;;  %v3128_v51 = vmul.f32 %v2655_v37, %v8121_v60  ;;  %3396 = vst [vmem:[%s6294_s16 + $0x50] sm:$0xff] %v3159_v56 }
 0x2b4   : > { %v2971_v57 = vmul.f32 %v6151_v45, %v1633_v26  ;;  %v2110_v45 = vmul.f32 %v6211_v25, %v2109_v48  ;;  %v2332_v12 = vadd.f32 %v1546_v32, %v8123_v43  ;;  %v2660_v62 = vmul.f32 %v6740_v39, %v2659_v38 }
 0x2b5   : > { %v3096_v34 = vmul.f32 %v6720_v40, %v3064_v28  ;;  %4219 = vtanh.f32 %v3002_v9  ;;  %v2666_v27 = vand.u32 2147483647, %v6704_v23  ;;  %v2668_v21 = vand.u32 2147483648, %v6704_v23 }
 0x2b6   : > { %v3003_v13 = vadd.f32 %v2971_v57, %v8122_v15  ;;  %v4214_v26 = vpop.eup %4213  ;;  %v3868_v44 = vmul.f32 -1.442695, %v2332_v12  ;;  %v2661_v48 = vadd.f32 %v6740_v39, %v2660_v62  ;;  %vm2662_vm11 = vweird.f32 %v6704_v23  ;;  %v8125_v62 = vld [vmem:[#allocation80_spill] sm:$0xff] }
 0x2b7   : > { %v3160_v22 = vadd.f32 %v3128_v51, %v3096_v34  ;;  %v4216_v42 = vpop.eup %4215  ;;  %4221 = vrcp.f32 %v6763_v8  ;;  %v6780_v40 = vadd.f32 1.0, %v4214_v26  ;;  %v2669_v4 = vor.u32 1.1754944e-38, %v2668_v21  ;;  %vm2664_vm13 = vmor %vm2662_vm11, %vm2663_vm10  ;;  %v8135_v21 = vld [vmem:[#allocation32_spill] sm:$0xff] }
 0x2b8   : > { %v2681_v37 = vand.u32 2147483647, %v6742_v53  ;;  %v2673_v58 = vmul.f32 %v4216_v42, %v6742_v53  ;;  %4223 = vpow2.f32 %v3868_v44  ;;  %v1548_v32 = vpop.f32.mrf.mxu1  ;;  %v2665_v28 = vsel %vm2664_vm13, %v6740_v39, %v2661_v48  ;;  %v8129_v44 = vld [vmem:[#allocation26_spill] sm:$0xff] }
 0x2b9   : > { %v1634_v9 = vpop.f32.mrf.mxu2  ;;  %v3186_v57 = vpack.c.bf16 %v3160_v22, %v3159_v56  ;;  %3397 = vst [vmem:[%s6294_s16 + $0x58] sm:$0xff] %v3160_v22  ;;  %v6788_v23 = vpop.eup %4217  ;;  %4225 = vrcp.f32 %v6780_v40  ;;  %vm2667_vm14 = vcmp.eq.f32.partialorder %v2666_v27, 8.507059e+37  ;;  %v2683_v19 = vand.u32 2147483648, %v6742_v53 }
 0x2ba   : > { %v1635_v38 = vadd.f32 %v1634_v9, %v5952_v14  ;;  %v2674_v60 = vsub.f32 1.0, %v2673_v58  ;;  %v1549_v15 = vadd.f32 %v1548_v32, %v5937_v18  ;;  %v2670_v56 = vsel %vm2667_vm14, %v2669_v4, %v2665_v28 }
 0x2bb   : > { %v4220_v43 = vpop.eup %4219  ;;  %4227 = vtanh.f32 %v3003_v13  ;;  %v8124_v12 = vsel %vm6269_vm12, %v6145_v54, %v6245_v63  ;;  %vm2677_vm15 = vweird.f32 %v6742_v53  ;;  %v3065_v34 = vsub.f32 1.0, %v2670_v56 }
 0x2bc   : > { %v2972_v51 = vmul.f32 %v6161_v47, %v1635_v38  ;;  %v6803_v39 = vsel %vm6758_vm9, %v6215_v24, %v8124_v12  ;;  %v2333_v47 = vadd.f32 %v1549_v15, %v8125_v62  ;;  %v2675_v27 = vmul.f32 %v4216_v42, %v2674_v60 }
 0x2bd   : > { %vm2678_vm0 = vweird.f32 %v4216_v42  ;;  %vm6807_vm1 = vcmp.eq.f32.partialorder %v2681_v37, 8.507059e+37  ;;  %v6811_v10 = vpop.eup %4221  ;;  %3298 = vmatmul.bf16.gmra.mxu3 %v3186_v57  ;;  %v2684_v54 = vor.u32 1.1754944e-38, %v2683_v19  ;;  %v3097_v63 = vmul.f32 %v6750_v31, %v3065_v34 }
 0x2be   : > { %v3129_v24 = vmul.f32 %v2670_v56, %v8128_v11  ;;  %v2111_v13 = vadd.f32 %v6211_v25, %v2110_v45  ;;  %v4224_v26 = vpop.eup %4223  ;;  %v3004_v22 = vadd.f32 %v2972_v51, %v8129_v44  ;;  %v3869_v48 = vmul.f32 -1.442695, %v2333_v47  ;;  %vm2679_vm12 = vmor %vm2677_vm15, %vm2678_vm0  ;;  %v8134_v47 = vld [vmem:[#allocation81_spill] sm:$0xff]  ;;  %v8136_v11 = vld [vmem:[#allocation16_spill] sm:$0xff] }
 0x2bf   : > { %v2676_v9 = vadd.f32 %v4216_v42, %v2675_v27  ;;  %v2123_v4 = vmul.f32 %v6308_v3, %v6222_v1  ;;  %v6819_v37 = vpop.eup %4225  ;;  %v6821_v58 = vadd.f32 1.0, %v4224_v26  ;;  %vm2113_vm2 = vweird.f32 %v6211_v25 }
 0x2c0   : > { %v6826_v31 = vadd.f32 %v3129_v24, %v3097_v63  ;;  %v2116_v45 = vand.u32 2147483647, %v6147_v46  ;;  %4229 = vpow2.f32 %v3869_v48  ;;  %vm2112_vm3 = vweird.f32 %v6147_v46  ;;  %v1550_v19 = vpop.f32.mrf.mxu1 }
 0x2c1   : > { %v1637_v38 = vpop.f32.mrf.mxu2  ;;  %v2680_v32 = vsel %vm2679_vm12, %v4216_v42, %v2676_v9  ;;  %v6832_v28 = vpop.eup %4227  ;;  %4231 = vrcp.f32 %v6821_v58  ;;  %v2118_v60 = vand.u32 2147483648, %v6147_v46  ;;  %v2124_v51 = vsub.f32 1.0, %v2123_v4  ;;  %vm6848_vm4 = vmor %vm2112_vm3, %vm2113_vm2 }
 0x2c2   : > { %v1638_v57 = vadd.f32 %v1637_v38, %v5952_v14  ;;  %v2685_v53 = vsel %vm6807_vm1, %v2684_v54, %v2680_v32  ;;  %3398 = vst [vmem:[%s6294_s16 + $0x60] sm:$0xff] %v6826_v31  ;;  %v6842_v15 = vmul.f32 %v6819_v37, %v6780_v40  ;;  %v1551_v56 = vadd.f32 %v1550_v19, %v5937_v18 }
 0x2c3   : > { %v3066_v12 = vsub.f32 1.0, %v2685_v53  ;;  %4233 = vtanh.f32 %v3004_v22  ;;  %v2115_v46 = vsel %vm6848_vm4, %v6211_v25, %v2111_v13  ;;  %vm6855_vm5 = vcmp.eq.f32.partialorder %v2116_v45, 8.507059e+37 }
 0x2c4   : > { %v2973_v42 = vmul.f32 %v6229_v0, %v1638_v57  ;;  %v2125_v0 = vmul.f32 %v6308_v3, %v2124_v51  ;;  %v2334_v54 = vadd.f32 %v1551_v56, %v8135_v21  ;;  %v3130_v24 = vmul.f32 %v2685_v53, %v8136_v11  ;;  %v8139_v21 = vld [vmem:[#allocation33_spill] sm:$0xff] }
 0x2c5   : > { %v3098_v63 = vmul.f32 %v4220_v43, %v3066_v12  ;;  %v2119_v26 = vor.u32 1.1754944e-38, %v2118_v60  ;;  %vm2128_vm6 = vweird.f32 %v6308_v3  ;;  %v2138_v25 = vmul.f32 %v6359_v52, %v6278_v41 }
 0x2c6   : > { %v3005_v27 = vadd.f32 %v2973_v42, %v8134_v47  ;;  %v2126_v44 = vadd.f32 %v6308_v3, %v2125_v0  ;;  %v4230_v13 = vpop.eup %4229  ;;  %v2689_v22 = vsub.f32 1.0, %v6842_v15  ;;  %v3870_v48 = vmul.f32 -1.442695, %v2334_v54 }
 0x2c7   : > { %v3162_v9 = vadd.f32 %v3130_v24, %v3098_v63  ;;  %v2133_v4 = vand.u32 2147483648, %v6222_v1  ;;  %v6869_v38 = vpop.eup %4231  ;;  %v6871_v43 = vadd.f32 1.0, %v4230_v13  ;;  %v2120_v57 = vsel %vm6855_vm5, %v2119_v26, %v2115_v46 }
 0x2c8   : > { %4235 = vtanh.f32 %v3005_v27  ;;  %vm2127_vm7 = vweird.f32 %v6222_v1  ;;  %v2131_v60 = vand.u32 2147483647, %v6222_v1  ;;  %v2703_v42 = vmul.f32 %v6869_v38, %v6821_v58  ;;  %v1553_v56 = vpop.f32.mrf.mxu1 }
 0x2c9   : > { %v1639_v45 = vpop.f32.mrf.mxu2  ;;  %4237 = vpow2.f32 %v3870_v48  ;;  %v3187_v19 = vpack.c.bf16 %v3162_v9, %v6826_v31  ;;  %3399 = vst [vmem:[%s6294_s16 + $0x68] sm:$0xff] %v3162_v9  ;;  %vm6881_vm8 = vmor %vm2127_vm7, %vm2128_vm6  ;;  %v6886_v51 = vpop.eup %4233  ;;  %v2139_v12 = vsub.f32 1.0, %v2138_v25  ;;  %v1554_v46 = vadd.f32 %v1553_v56, %v5937_v18 }
 0x2ca   : > { %v1640_v32 = vadd.f32 %v1639_v45, %v5952_v14  ;;  %4239 = vrcp.f32 %v6871_v43  ;;  %v2130_v31 = vsel %vm6881_vm8, %v6308_v3, %v2126_v44  ;;  %v2134_v62 = vor.u32 1.1754944e-38, %v2133_v4  ;;  %v8140_v3 = vld [vmem:[#allocation34_spill] sm:$0xff] }
 0x2cb   : > { %v2146_v1 = vand.u32 2147483647, %v6278_v41  ;;  %v2140_v0 = vmul.f32 %v6359_v52, %v2139_v12  ;;  %vm2143_vm9 = vweird.f32 %v6359_v52  ;;  %v2148_v47 = vand.u32 2147483648, %v6278_v41 }
 0x2cc   : > { %v2974_v34 = vmul.f32 %v6803_v39, %v1640_v32  ;;  %v2153_v27 = vmul.f32 %v6385_v20, %v6322_v50  ;;  %v2335_v63 = vadd.f32 %v1554_v46, %v8140_v3  ;;  %vm2132_vm10 = vcmp.eq.f32.partialorder %v2131_v60, 8.507059e+37  ;;  %v8146_v3 = vld [vmem:[#allocation35_spill] sm:$0xff] }
 0x2cd   : > { %vm2142_vm11 = vweird.f32 %v6278_v41  ;;  %v2704_v11 = vsub.f32 1.0, %v2703_v42  ;;  %3303 = vmatmul.bf16.gmra.mxu3 %v3187_v19  ;;  %v6907_v24 = vsel %vm2132_vm10, %v2134_v62, %v2130_v31  ;;  %v2141_v26 = vadd.f32 %v6359_v52, %v2140_v0  ;;  %v8145_v31 = vld [vmem:[#allocation52_spill] sm:$0xff] }
 0x2ce   : > { %v3006_v54 = vadd.f32 %v2974_v34, %v8139_v21  ;;  %v6905_v39 = vpop.eup %4235  ;;  %v2154_v44 = vsub.f32 1.0, %v2153_v27  ;;  %v3871_v13 = vmul.f32 -1.442695, %v2335_v63  ;;  %vm6912_vm13 = vmor %vm2142_vm11, %vm2143_vm9  ;;  %vm6916_vm14 = vcmp.eq.f32.partialorder %v2146_v1, 8.507059e+37 }
 0x2cf   : > { %v4238_v25 = vpop.eup %4237  ;;  %v2149_v41 = vor.u32 1.1754944e-38, %v2148_v47  ;;  %v2163_v4 = vand.u32 2147483648, %v6322_v50  ;;  %v2145_v53 = vsel %vm6912_vm13, %v6359_v52, %v2141_v26  ;;  %vm2158_vm15 = vweird.f32 %v6385_v20  ;;  %v8147_v26 = vld [vmem:[#allocation41_spill] sm:$0xff] }
 0x2d0   : > { %v6921_v45 = vpop.eup %4239  ;;  %v6923_v32 = vadd.f32 1.0, %v4238_v25  ;;  %4241 = vtanh.f32 %v3006_v54  ;;  %v2155_v60 = vmul.f32 %v6385_v20, %v2154_v44  ;;  %v2161_v56 = vand.u32 2147483647, %v6322_v50  ;;  %v1555_v46 = vpop.f32.mrf.mxu1 }
 0x2d1   : > { %v1642_v19 = vpop.f32.mrf.mxu2  ;;  %4243 = vpow2.f32 %v3871_v13  ;;  %v2168_v12 = vmul.f32 %v6420_v7, %v8145_v31  ;;  %v6936_v34 = vmul.f32 %v6921_v45, %v6871_v43  ;;  %v6941_v52 = vsel %vm6916_vm14, %v2149_v41, %v2145_v53 }
 0x2d2   : > { %v1643_v42 = vadd.f32 %v1642_v19, %v5952_v14  ;;  %4245 = vrcp.f32 %v6923_v32  ;;  %v6944_v62 = vadd.f32 %v6385_v20, %v2155_v60  ;;  %vm2157_vm0 = vweird.f32 %v6322_v50 }
 0x2d3   : > { %v1556_v0 = vadd.f32 %v1555_v46, %v5937_v18  ;;  %v2690_v47 = vmul.f32 %v6819_v37, %v2689_v22  ;;  %v2164_v27 = vor.u32 1.1754944e-38, %v2163_v4  ;;  %vm2692_vm1 = vweird.f32 %v6780_v40  ;;  %vm6994_vm9 = vmor %vm2157_vm0, %vm2158_vm15 }
 0x2d4   : > { %v2975_v1 = vmul.f32 %v2120_v57, %v1643_v42  ;;  %vm2693_vm12 = vweird.f32 %v6819_v37  ;;  %v2696_v21 = vand.u32 2147483647, %v6780_v40  ;;  %v2698_v54 = vand.u32 2147483648, %v6780_v40 }
 0x2d5   : > { %v2336_v44 = vadd.f32 %v1556_v0, %v8147_v26  ;;  %v2691_v57 = vadd.f32 %v6819_v37, %v2690_v47  ;;  %v2705_v25 = vmul.f32 %v6869_v38, %v2704_v11  ;;  %vm2694_vm2 = vmor %vm2692_vm1, %vm2693_vm12  ;;  %vm2708_vm4 = vweird.f32 %v6869_v38 }
 0x2d6   : > { %v3007_v63 = vadd.f32 %v2975_v1, %v8146_v3  ;;  %v6959_v15 = vpop.eup %4241  ;;  %vm2697_vm3 = vcmp.eq.f32.partialorder %v2696_v21, 8.507059e+37  ;;  %v2699_v22 = vor.u32 1.1754944e-38, %v2698_v54  ;;  %vm6962_vm5 = vcmp.eq.f32.partialorder %v2161_v56, 8.507059e+37 }
 0x2d7   : > { %v2169_v40 = vsub.f32 1.0, %v2168_v12  ;;  %v4244_v48 = vpop.eup %4243  ;;  %v3872_v9 = vmul.f32 -1.442695, %v2336_v44  ;;  %v2695_v41 = vsel %vm2694_vm2, %v6819_v37, %v2691_v57  ;;  %v2706_v4 = vadd.f32 %v6869_v38, %v2705_v25 }
 0x2d8   : > { %vm2707_vm6 = vweird.f32 %v6821_v58  ;;  %v6969_v11 = vpop.eup %4245  ;;  %v6971_v19 = vadd.f32 1.0, %v4244_v48  ;;  %v2700_v60 = vsel %vm2697_vm3, %v2699_v22, %v2695_v41  ;;  %v2711_v56 = vand.u32 2147483647, %v6821_v58  ;;  %v1558_v47 = vpop.f32.mrf.mxu1  ;;  %v8155_v22 = vld [vmem:[#allocation82_spill] sm:$0xff] }
 0x2d9   : > { %v1644_v53 = vpop.f32.mrf.mxu2  ;;  %vm6973_vm7 = vmor %vm2707_vm6, %vm2708_vm4  ;;  %v2713_v12 = vand.u32 2147483648, %v6821_v58  ;;  %v2719_v37 = vsub.f32 1.0, %v6936_v34  ;;  %4247 = vpow2.f32 %v3872_v9  ;;  %v2733_v0 = vmul.f32 %v6969_v11, %v6923_v32  ;;  %v8152_v34 = vld [vmem:[#allocation18_spill] sm:$0xff] }
 0x2da   : > { %v1645_v46 = vadd.f32 %v1644_v53, %v5952_v14  ;;  %v2710_v1 = vsel %vm6973_vm7, %v6869_v38, %v2706_v4  ;;  %4249 = vrcp.f32 %v6971_v19  ;;  %v3067_v54 = vsub.f32 1.0, %v2700_v60  ;;  %v8156_v9 = vld [vmem:[#allocation46_spill] sm:$0xff]  ;;  %v8157_v53 = vld [vmem:[#allocation19_spill] sm:$0xff] }
 0x2db   : > { %v2714_v21 = vor.u32 1.1754944e-38, %v2713_v12  ;;  %v1559_v58 = vadd.f32 %v1558_v47, %v5937_v18  ;;  %vm2712_vm8 = vcmp.eq.f32.partialorder %v2711_v56, 8.507059e+37  ;;  %v3131_v26 = vmul.f32 %v2700_v60, %v8152_v34 }
 0x2dc   : > { %v2976_v3 = vmul.f32 %v6907_v24, %v1645_v46  ;;  %v3099_v57 = vmul.f32 %v6832_v28, %v3067_v54  ;;  %v2160_v24 = vsel %vm6994_vm9, %v6385_v20, %v6944_v62  ;;  %v2170_v25 = vmul.f32 %v6420_v7, %v2169_v40 }
 0x2dd   : > { %v2715_v44 = vsel %vm2712_vm8, %v2714_v21, %v2710_v1  ;;  %4251 = vtanh.f32 %v3007_v63  ;;  %v2337_v50 = vadd.f32 %v1559_v58, %v8156_v9  ;;  %v2734_v4 = vsub.f32 1.0, %v2733_v0 }
 0x2de   : > { %v3008_v48 = vadd.f32 %v2976_v3, %v8155_v22  ;;  %v3068_v41 = vsub.f32 1.0, %v2715_v44  ;;  %v3132_v60 = vmul.f32 %v2715_v44, %v8157_v53  ;;  %v3163_v42 = vadd.f32 %v3131_v26, %v3099_v57  ;;  %v8160_v3 = vld [vmem:[#allocation53_spill] sm:$0xff] }
 0x2df   : > { %v7008_v28 = vadd.f32 %v6420_v7, %v2170_v25  ;;  %v4248_v56 = vpop.eup %4247  ;;  %v3873_v12 = vmul.f32 -1.442695, %v2337_v50  ;;  %v2165_v62 = vsel %vm6962_vm5, %v2164_v27, %v2160_v24  ;;  %vm2173_vm10 = vweird.f32 %v6420_v7  ;;  %v8161_v25 = vld [vmem:[#allocation47_spill] sm:$0xff] }
 0x2e0   : > { %v3100_v20 = vmul.f32 %v6886_v51, %v3068_v41  ;;  %v7014_v63 = vpop.eup %4249  ;;  %v7016_v40 = vadd.f32 1.0, %v4248_v56  ;;  %4253 = vtanh.f32 %v3008_v48  ;;  %3400 = vst [vmem:[%s6294_s16 + $0x70] sm:$0xff] %v3163_v42  ;;  %vm2172_vm11 = vweird.f32 %v8145_v31  ;;  %v1560_v21 = vpop.f32.mrf.mxu1  ;;  %v8162_v48 = vld [vmem:[#allocation48_spill] sm:$0xff] }
 0x2e1   : > { %v1647_v46 = vpop.f32.mrf.mxu2  ;;  %v2178_v1 = vand.u32 2147483648, %v8145_v31  ;;  %4255 = vpow2.f32 %v3873_v12  ;;  %vm7022_vm13 = vmor %vm2172_vm11, %vm2173_vm10  ;;  %v2176_v13 = vand.u32 2147483647, %v8145_v31  ;;  %v7029_v47 = vmul.f32 %v7014_v63, %v6971_v19 }
 0x2e2   : > { %v3164_v0 = vadd.f32 %v3132_v60, %v3100_v20  ;;  %v1648_v51 = vadd.f32 %v1647_v46, %v5952_v14  ;;  %4257 = vrcp.f32 %v7016_v40  ;;  %v2175_v54 = vsel %vm7022_vm13, %v6420_v7, %v7008_v28 }
 0x2e3   : > { %v2183_v58 = vmul.f32 %v6467_v33, %v8160_v3  ;;  %v7038_v34 = vpop.eup %4251  ;;  %v1561_v38 = vadd.f32 %v1560_v21, %v5937_v18  ;;  %v7043_v44 = vor.u32 1.1754944e-38, %v2178_v1  ;;  %v2720_v57 = vmul.f32 %v6921_v45, %v2719_v37 }
 0x2e4   : > { %v3188_v26 = vpack.c.bf16 %v3164_v0, %v3163_v42  ;;  %3401 = vst [vmem:[%s6294_s16 + $0x78] sm:$0xff] %v3164_v0  ;;  %v2977_v31 = vmul.f32 %v6941_v52, %v1648_v51  ;;  %vm2722_vm14 = vweird.f32 %v6871_v43  ;;  %vm2723_vm15 = vweird.f32 %v6921_v45 }
 0x2e5   : > { %v2726_v24 = vand.u32 2147483647, %v6871_v43  ;;  %v2338_v9 = vadd.f32 %v1561_v38, %v8162_v48  ;;  %v2728_v50 = vand.u32 2147483648, %v6871_v43  ;;  %v2735_v52 = vmul.f32 %v6969_v11, %v2734_v4  ;;  %vm2724_vm2 = vmor %vm2722_vm14, %vm2723_vm15 }
 0x2e6   : > { %3308 = vmatmul.bf16.gmra.mxu3 %v3188_v26  ;;  %v3009_v22 = vadd.f32 %v2977_v31, %v8161_v25  ;;  %v7053_v41 = vpop.eup %4253  ;;  %v2721_v53 = vadd.f32 %v6921_v45, %v2720_v57  ;;  %vm2737_vm1 = vweird.f32 %v6923_v32  ;;  %vm2738_vm12 = vweird.f32 %v6969_v11 }
 0x2e7   : > { %vm7056_vm0 = vcmp.eq.f32.partialorder %v2726_v24, 8.507059e+37  ;;  %v4256_v60 = vpop.eup %4255  ;;  %v3874_v42 = vmul.f32 -1.442695, %v2338_v9  ;;  %v2729_v4 = vor.u32 1.1754944e-38, %v2728_v50  ;;  %v2736_v56 = vadd.f32 %v6969_v11, %v2735_v52  ;;  %vm2739_vm3 = vmor %vm2737_vm1, %vm2738_vm12 }
 0x2e8   : > { %4259 = vtanh.f32 %v3009_v22  ;;  %v7067_v12 = vpop.eup %4257  ;;  %v7069_v20 = vadd.f32 1.0, %v4256_v60  ;;  %v2725_v1 = vsel %vm2724_vm2, %v6921_v45, %v2721_v53  ;;  %v2741_v0 = vand.u32 2147483647, %v6923_v32  ;;  %v1563_v38 = vpop.f32.mrf.mxu1  ;;  %v8169_v60 = vld [vmem:[#allocation85_spill] sm:$0xff] }
 0x2e9   : > { %v1649_v46 = vpop.f32.mrf.mxu2  ;;  %v2743_v51 = vand.u32 2147483648, %v6923_v32  ;;  %v7076_v21 = vmul.f32 %v7067_v12, %v7016_v40  ;;  %4261 = vpow2.f32 %v3874_v42  ;;  %v2730_v26 = vsel %vm7056_vm0, %v2729_v4, %v2725_v1  ;;  %v8176_v45 = vld [vmem:[#allocation89_spill] sm:$0xff] }
 0x2ea   : > { %v1650_v43 = vadd.f32 %v1649_v46, %v5952_v14  ;;  %vm7085_vm4 = vcmp.eq.f32.partialorder %v2176_v13, 8.507059e+37  ;;  %v2749_v31 = vsub.f32 1.0, %v7029_v47  ;;  %4263 = vrcp.f32 %v7069_v20  ;;  %v8167_v13 = vld [vmem:[#allocation22_spill] sm:$0xff]  ;;  %v8168_v47 = vld [vmem:[#allocation83_spill] sm:$0xff] }
 0x2eb   : > { %v2740_v57 = vsel %vm2739_vm3, %v6969_v11, %v2736_v56  ;;  %v2744_v24 = vor.u32 1.1754944e-38, %v2743_v51  ;;  %v1564_v22 = vadd.f32 %v1563_v38, %v5937_v18  ;;  %vm2742_vm5 = vcmp.eq.f32.partialorder %v2741_v0, 8.507059e+37  ;;  %v7104_v46 = vld [vmem:[%s7759_s9] ss:$0 sm:$0xff] }
 0x2ec   : > { %v2978_v25 = vmul.f32 %v2165_v62, %v1650_v43  ;;  %v3069_v48 = vsub.f32 1.0, %v2730_v26  ;;  %v2764_v32 = vsub.f32 1.0, %v7076_v21  ;;  %v3133_v50 = vmul.f32 %v2730_v26, %v8167_v13  ;;  %v8170_v62 = vld [vmem:[#allocation23_spill] sm:$0xff] }
 0x2ed   : > { %v2745_v9 = vsel %vm2742_vm5, %v2744_v24, %v2740_v57  ;;  %v2184_v52 = vsub.f32 1.0, %v2183_v58  ;;  %v2339_v42 = vadd.f32 %v1564_v22, %v8169_v60  ;;  %vm2187_vm6 = vweird.f32 %v8160_v3 }
 0x2ee   : > { %v7095_v53 = vpop.eup %4259  ;;  %v3010_v37 = vadd.f32 %v2978_v25, %v8168_v47  ;;  %v3070_v4 = vsub.f32 1.0, %v2745_v9  ;;  %v3101_v11 = vmul.f32 %v6905_v39, %v3069_v48  ;;  %v3134_v56 = vmul.f32 %v2745_v9, %v8170_v62 }
 0x2ef   : > { %v2185_v1 = vmul.f32 %v6467_v33, %v2184_v52  ;;  %vm2188_vm7 = vweird.f32 %v6467_v33  ;;  %v4262_v58 = vpop.eup %4261  ;;  %v3875_v0 = vmul.f32 -1.442695, %v2339_v42  ;;  %v2191_v57 = vand.u32 2147483647, %v8160_v3 }
 0x2f0   : > { %4265 = vtanh.f32 %v3010_v37  ;;  %v3102_v39 = vmul.f32 %v6959_v15, %v3070_v4  ;;  %v3165_v51 = vadd.f32 %v3133_v50, %v3101_v11  ;;  %v7110_v21 = vpop.eup %4263  ;;  %v7112_v43 = vadd.f32 1.0, %v4262_v58  ;;  %v3274_v15 = vpop.f32.mrf.mxu3  ;;  %vm7133_vm8 = vmor %vm2187_vm6, %vm2188_vm7 }
 0x2f1   : > { %v1652_v26 = vpop.f32.mrf.mxu2  ;;  %v2186_v38 = vadd.f32 %v6467_v33, %v2185_v1  ;;  %v2193_v24 = vand.u32 2147483648, %v8160_v3  ;;  %v7119_v25 = vmul.f32 %v7110_v21, %v7069_v20  ;;  %4267 = vpow2.f32 %v3875_v0  ;;  %v1565_v52 = vpop.f32.mrf.mxu1 }
 0x2f2   : > { %v3166_v22 = vadd.f32 %v3134_v56, %v3102_v39  ;;  %3402 = vst [vmem:[%s6294_s16 + $0x80] sm:$0xff] %v3165_v51  ;;  %v1653_v48 = vadd.f32 %v1652_v26, %v5952_v14  ;;  %4269 = vrcp.f32 %v7112_v43  ;;  %v3275_v13 = vadd.f32 %v7104_v46, %v3274_v15 }
 0x2f3   : > { %v2180_v50 = vsel %vm7085_vm4, %v7043_v44, %v2175_v54  ;;  %v2190_v3 = vsel %vm7133_vm8, %v6467_v33, %v2186_v38  ;;  %v1566_v60 = vadd.f32 %v1565_v52, %v5937_v18  ;;  %vm7152_vm9 = vcmp.eq.f32.partialorder %v2191_v57, 8.507059e+37  ;;  %v8175_v33 = vld [vmem:[#allocation88_spill] sm:$0xff] }
 0x2f4   : > { %v3189_v47 = vpack.c.bf16 %v3166_v22, %v3165_v51  ;;  %3403 = vst [vmem:[%s6294_s16 + $0x88] sm:$0xff] %v3166_v22  ;;  %v2979_v37 = vmul.f32 %v2180_v50, %v1653_v48  ;;  %v2779_v7 = vsub.f32 1.0, %v7119_v25  ;;  %v2194_v28 = vor.u32 1.1754944e-38, %v2193_v24 }
 0x2f5   : > { %3354 = vst [vmem:[%s7126_s22] sm:$0xff] %v3275_v13  ;;  %v2750_v27 = vmul.f32 %v7014_v63, %v2749_v31  ;;  %vm2753_vm10 = vweird.f32 %v7014_v63  ;;  %v2340_v4 = vadd.f32 %v1566_v60, %v8176_v45  ;;  %v2756_v11 = vand.u32 2147483647, %v6971_v19 }
 0x2f6   : > { %v7160_v54 = vpop.eup %4265  ;;  %3313 = vmatmul.bf16.gmra.mxu3 %v3189_v47  ;;  %v3011_v44 = vadd.f32 %v2979_v37, %v8175_v33  ;;  %v2758_v62 = vand.u32 2147483648, %v6971_v19  ;;  %vm2752_vm11 = vweird.f32 %v6971_v19  ;;  %v2765_v1 = vmul.f32 %v7067_v12, %v2764_v32 }
 0x2f7   : > { %v2751_v56 = vadd.f32 %v7014_v63, %v2750_v27  ;;  %vm2767_vm13 = vweird.f32 %v7016_v40  ;;  %v4268_v31 = vpop.eup %4267  ;;  %v3876_v58 = vmul.f32 -1.442695, %v2340_v4  ;;  %vm2754_vm14 = vmor %vm2752_vm11, %vm2753_vm10  ;;  %vm2757_vm15 = vcmp.eq.f32.partialorder %v2756_v11, 8.507059e+37  ;;  %v8179_v27 = vld [vmem:[#allocation90_spill] sm:$0xff]  ;;  %v8181_v11 = vld [vmem:[#allocation29_spill] sm:$0xff] }
 0x2f8   : > { %4271 = vtanh.f32 %v3011_v44  ;;  %v2759_v0 = vor.u32 1.1754944e-38, %v2758_v62  ;;  %v7170_v39 = vpop.eup %4269  ;;  %v7172_v51 = vadd.f32 1.0, %v4268_v31  ;;  %v2766_v57 = vadd.f32 %v7067_v12, %v2765_v1  ;;  %v3276_v32 = vpop.f32.mrf.mxu3  ;;  %v8180_v44 = vld [vmem:[#allocation91_spill] sm:$0xff] }
 0x2f9   : > { %v1654_v26 = vpop.f32.mrf.mxu2  ;;  %v2755_v38 = vsel %vm2754_vm14, %v7014_v63, %v2751_v56  ;;  %vm2768_vm0 = vweird.f32 %v7067_v12  ;;  %v7179_v19 = vmul.f32 %v7170_v39, %v7112_v43  ;;  %4273 = vpow2.f32 %v3876_v58  ;;  %v1568_v48 = vpop.f32.mrf.mxu1 }
 0x2fa   : > { %v1655_v24 = vadd.f32 %v1654_v26, %v5952_v14  ;;  %v2760_v22 = vsel %vm2757_vm15, %v2759_v0, %v2755_v38  ;;  %4275 = vrcp.f32 %v7172_v51  ;;  %v3277_v15 = vadd.f32 %v7104_v46, %v3276_v32  ;;  %vm7188_vm1 = vmor %vm2767_vm13, %vm2768_vm0 }
 0x2fb   : > { %v2195_v63 = vsel %vm7152_vm9, %v2194_v28, %v2190_v3  ;;  %v2771_v13 = vand.u32 2147483647, %v7016_v40  ;;  %v1569_v52 = vadd.f32 %v1568_v48, %v5937_v18  ;;  %v2770_v47 = vsel %vm7188_vm1, %v7067_v12, %v2766_v57 }
 0x2fc   : > { %v2980_v50 = vmul.f32 %v2195_v63, %v1655_v24  ;;  %v2773_v37 = vand.u32 2147483648, %v7016_v40  ;;  %v2794_v3 = vsub.f32 1.0, %v7179_v19  ;;  %3355 = vst [vmem:[%s7126_s22 + $0x8] sm:$0xff] %v3277_v15  ;;  %v3071_v60 = vsub.f32 1.0, %v2760_v22 }
 0x2fd   : > { %vm2772_vm12 = vcmp.eq.f32.partialorder %v2771_v13, 8.507059e+37  ;;  %v2198_v42 = vmul.f32 %v6508_v6, %v6469_v59  ;;  %v2341_v45 = vadd.f32 %v1569_v52, %v8180_v44  ;;  %v3135_v62 = vmul.f32 %v2760_v22, %v8181_v11  ;;  %v8182_v22 = vld [vmem:[#allocation30_spill] sm:$0xff] }
 0x2fe   : > { %v7202_v28 = vpop.eup %4271  ;;  %v3012_v33 = vadd.f32 %v2980_v50, %v8179_v27  ;;  %v2774_v4 = vor.u32 1.1754944e-38, %v2773_v37  ;;  %v3103_v12 = vmul.f32 %v7038_v34, %v3071_v60  ;;  %vm2202_vm2 = vweird.f32 %v6469_v59 }
 0x2ff   : > { %v2199_v40 = vsub.f32 1.0, %v2198_v42  ;;  %vm2203_vm3 = vweird.f32 %v6508_v6  ;;  %v4274_v56 = vpop.eup %4273  ;;  %v3877_v1 = vmul.f32 -1.442695, %v2341_v45  ;;  %v2206_v58 = vand.u32 2147483647, %v6469_v59  ;;  %v8183_v45 = vld [vmem:[#allocation93_spill] sm:$0xff] }
 0x300   : > { %4277 = vtanh.f32 %v3012_v33  ;;  %v2775_v31 = vsel %vm2772_vm12, %v2774_v4, %v2770_v47  ;;  %v7211_v0 = vpop.eup %4275  ;;  %v7213_v26 = vadd.f32 1.0, %v4274_v56  ;;  %v3167_v57 = vadd.f32 %v3135_v62, %v3103_v12  ;;  %v3279_v63 = vpop.f32.mrf.mxu3  ;;  %vm2204_vm5 = vmor %vm2202_vm2, %vm2203_vm3 }
 0x301   : > { %v3072_v38 = vsub.f32 1.0, %v2775_v31  ;;  %v1657_v32 = vpop.f32.mrf.mxu2  ;;  %v2208_v34 = vand.u32 2147483648, %v6469_v59  ;;  %v7218_v24 = vmul.f32 %v7211_v0, %v7172_v51  ;;  %4279 = vpow2.f32 %v3877_v1  ;;  %v1570_v52 = vpop.f32.mrf.mxu1 }
 0x302   : > { %v3136_v15 = vmul.f32 %v2775_v31, %v8182_v22  ;;  %v2200_v48 = vmul.f32 %v6508_v6, %v2199_v40  ;;  %4281 = vrcp.f32 %v7213_v26  ;;  %3404 = vst [vmem:[%s6294_s16 + $0x90] sm:$0xff] %v3167_v57  ;;  %v3280_v13 = vadd.f32 %v7104_v46, %v3279_v63  ;;  %v8186_v22 = vld [vmem:[#allocation92_spill] sm:$0xff] }
 0x303   : > { %v3104_v9 = vmul.f32 %v7053_v41, %v3072_v38  ;;  %v1658_v50 = vadd.f32 %v1657_v32, %v5952_v14  ;;  %v2809_v47 = vsub.f32 1.0, %v7218_v24  ;;  %vm2207_vm4 = vcmp.eq.f32.partialorder %v2206_v58, 8.507059e+37 }
 0x304   : > { %v2201_v37 = vadd.f32 %v6508_v6, %v2200_v48  ;;  %v1571_v60 = vadd.f32 %v1570_v52, %v5937_v18  ;;  %3356 = vst [vmem:[%s7126_s22 + $0x10] sm:$0xff] %v3280_v13  ;;  %v2209_v41 = vor.u32 1.1754944e-38, %v2208_v34  ;;  %v2213_v27 = vmul.f32 %v6555_v36, %v6510_v61 }
 0x305   : > { %v3168_v42 = vadd.f32 %v3136_v15, %v3104_v9  ;;  %vm2217_vm6 = vweird.f32 %v6510_v61  ;;  %v2221_v11 = vand.u32 2147483647, %v6510_v61  ;;  %v2223_v62 = vand.u32 2147483648, %v6510_v61 }
 0x306   : > { %v7238_v33 = vpop.eup %4277  ;;  %v2205_v44 = vsel %vm2204_vm5, %v6508_v6, %v2201_v37  ;;  %v2342_v4 = vadd.f32 %v1571_v60, %v8183_v45  ;;  %v2214_v40 = vsub.f32 1.0, %v2213_v27  ;;  %v2780_v56 = vmul.f32 %v7110_v21, %v2779_v7 }
 0x307   : > { %v3190_v12 = vpack.c.bf16 %v3168_v42, %v3167_v57  ;;  %3405 = vst [vmem:[%s6294_s16 + $0x98] sm:$0xff] %v3168_v42  ;;  %v2210_v59 = vsel %vm2207_vm4, %v2209_v41, %v2205_v44  ;;  %v4280_v1 = vpop.eup %4279  ;;  %vm2218_vm7 = vweird.f32 %v6555_v36  ;;  %vm7249_vm8 = vcmp.eq.f32.partialorder %v2221_v11, 8.507059e+37 }
 0x308   : > { %v2981_v31 = vmul.f32 %v2210_v59, %v1658_v50  ;;  %v3878_v58 = vmul.f32 -1.442695, %v2342_v4  ;;  %v7253_v38 = vpop.eup %4281  ;;  %v7255_v32 = vadd.f32 1.0, %v4280_v1  ;;  %v2215_v34 = vmul.f32 %v6555_v36, %v2214_v40  ;;  %v3281_v63 = vpop.f32.mrf.mxu3  ;;  %vm2219_vm10 = vmor %vm2217_vm6, %vm2218_vm7  ;;  %v8189_v4 = vld [vmem:[#allocation95_spill] sm:$0xff] }
 0x309   : > { %3318 = vmatmul.bf16.gmra.mxu3 %v3190_v12  ;;  %v1659_v57 = vpop.f32.mrf.mxu2  ;;  %v2224_v25 = vor.u32 1.1754944e-38, %v2223_v62  ;;  %v2781_v7 = vadd.f32 %v7110_v21, %v2780_v56  ;;  %vm2782_vm9 = vweird.f32 %v7069_v20  ;;  %v3282_v9 = vadd.f32 %v7104_v46, %v3281_v63  ;;  %v1573_v50 = vpop.f32.mrf.mxu1 }
 0x30a   : > { %v3013_v15 = vadd.f32 %v2981_v31, %v8186_v22  ;;  %4283 = vpow2.f32 %v3878_v58  ;;  %v1660_v48 = vadd.f32 %v1659_v57, %v5952_v14  ;;  %v2216_v13 = vadd.f32 %v6555_v36, %v2215_v34  ;;  %v8192_v31 = vld [vmem:[#allocation94_spill] sm:$0xff] }
 0x30b   : > { %4285 = vrcp.f32 %v7255_v32  ;;  %vm2783_vm11 = vweird.f32 %v7110_v21  ;;  %v7272_v52 = vmul.f32 %v7253_v38, %v7213_v26  ;;  %v1574_v37 = vadd.f32 %v1573_v50, %v5937_v18  ;;  %3357 = vst [vmem:[%s7126_s22 + $0x18] sm:$0xff] %v3282_v9  ;;  %v8193_v50 = vld [vmem:[#allocation36_spill] sm:$0xff] }
 0x30c   : > { %4287 = vtanh.f32 %v3013_v15  ;;  %vm7275_vm13 = vmor %vm2782_vm9, %vm2783_vm11  ;;  %v2786_v42 = vand.u32 2147483647, %v7069_v20  ;;  %v2220_v61 = vsel %vm2219_vm10, %v6555_v36, %v2216_v13  ;;  %v2788_v27 = vand.u32 2147483648, %v7069_v20 }
 0x30d   : > { %v2785_v41 = vsel %vm7275_vm13, %v7110_v21, %v2781_v7  ;;  %v2795_v44 = vmul.f32 %v7170_v39, %v2794_v3  ;;  %v2225_v45 = vsel %vm7249_vm8, %v2224_v25, %v2220_v61  ;;  %v2343_v11 = vadd.f32 %v1574_v37, %v8189_v4 }
 0x30e   : > { %vm2787_vm14 = vcmp.eq.f32.partialorder %v2786_v42, 8.507059e+37  ;;  %vm2797_vm15 = vweird.f32 %v7112_v43  ;;  %v2982_v62 = vmul.f32 %v2225_v45, %v1660_v48  ;;  %v2789_v36 = vor.u32 1.1754944e-38, %v2788_v27  ;;  %v8194_v27 = vld [vmem:[#allocation37_spill] sm:$0xff] }
 0x30f   : > { %v2796_v12 = vadd.f32 %v7170_v39, %v2795_v44  ;;  %vm2798_vm0 = vweird.f32 %v7170_v39  ;;  %v3879_v20 = vmul.f32 -1.442695, %v2343_v11  ;;  %v2801_v3 = vand.u32 2147483647, %v7112_v43 }
 0x310   : > { %v4284_v21 = vpop.eup %4283  ;;  %vm7295_vm1 = vmor %vm2797_vm15, %vm2798_vm0  ;;  %v2803_v59 = vand.u32 2147483648, %v7112_v43  ;;  %v2228_v40 = vmul.f32 %v6604_v35, %v6557_v49  ;;  %v3014_v58 = vadd.f32 %v2982_v62, %v8192_v31  ;;  %v2790_v6 = vsel %vm2787_vm14, %v2789_v36, %v2785_v41  ;;  %v3284_v15 = vpop.f32.mrf.mxu3  ;;  %v8197_v31 = vld [vmem:[#allocation96_spill] sm:$0xff] }
 0x311   : > { %v7303_v56 = vpop.eup %4285  ;;  %v7305_v1 = vadd.f32 1.0, %v4284_v21  ;;  %v2800_v57 = vsel %vm7295_vm1, %v7170_v39, %v2796_v12  ;;  %v1662_v34 = vpop.f32.mrf.mxu2  ;;  %v2824_v7 = vsub.f32 1.0, %v7272_v52  ;;  %4289 = vpow2.f32 %v3879_v20 }
 0x312   : > { %v7311_v25 = vpop.eup %4287  ;;  %v7316_v43 = vmul.f32 %v7303_v56, %v7255_v32  ;;  %v2804_v22 = vor.u32 1.1754944e-38, %v2803_v59  ;;  %vm2802_vm12 = vcmp.eq.f32.partialorder %v2801_v3, 8.507059e+37  ;;  %v3073_v63 = vsub.f32 1.0, %v2790_v6  ;;  %v1575_v39 = vpop.f32.mrf.mxu1 }
 0x313   : > { %4291 = vrcp.f32 %v7305_v1  ;;  %v3285_v48 = vadd.f32 %v7104_v46, %v3284_v15  ;;  %v3137_v37 = vmul.f32 %v2790_v6, %v8193_v50  ;;  %v1663_v61 = vadd.f32 %v1662_v34, %v5952_v14 }
 0x314   : > { %v2839_v9 = vsub.f32 1.0, %v7316_v43  ;;  %4293 = vtanh.f32 %v3014_v58  ;;  %v2805_v13 = vsel %vm2802_vm12, %v2804_v22, %v2800_v57  ;;  %v3105_v42 = vmul.f32 %v7095_v53, %v3073_v63 }
 0x315   : > { %v3074_v60 = vsub.f32 1.0, %v2805_v13  ;;  %3358 = vst [vmem:[%s7126_s22 + $0x20] sm:$0xff] %v3285_v48  ;;  %v2229_v41 = vsub.f32 1.0, %v2228_v40  ;;  %v3138_v44 = vmul.f32 %v2805_v13, %v8194_v27  ;;  %vm2233_vm2 = vweird.f32 %v6604_v35 }
 0x316   : > { %v2236_v45 = vand.u32 2147483647, %v6557_v49  ;;  %v2238_v4 = vand.u32 2147483648, %v6557_v49  ;;  %v3169_v62 = vadd.f32 %v3137_v37, %v3105_v42  ;;  %v1576_v53 = vadd.f32 %v1575_v39, %v5937_v18 }
 0x317   : > { %v3106_v11 = vmul.f32 %v7160_v54, %v3074_v60  ;;  %v2230_v36 = vmul.f32 %v6604_v35, %v2229_v41  ;;  %v4290_v12 = vpop.eup %4289  ;;  %vm2232_vm3 = vweird.f32 %v6557_v49  ;;  %v2243_v19 = vmul.f32 %v6644_v5, %v6597_v16 }
 0x318   : > { %vm7333_vm4 = vcmp.eq.f32.partialorder %v2236_v45, 8.507059e+37  ;;  %v2239_v20 = vor.u32 1.1754944e-38, %v2238_v4  ;;  %v7341_v54 = vadd.f32 1.0, %v4290_v12  ;;  %3406 = vst [vmem:[%s6294_s16 + $0xa0] sm:$0xff] %v3169_v62  ;;  %v2344_v58 = vadd.f32 %v1576_v53, %v8197_v31  ;;  %vm2234_vm5 = vmor %vm2232_vm3, %vm2233_vm2  ;;  %v3286_v34 = vpop.f32.mrf.mxu3  ;;  %v8198_v4 = vld [vmem:[#allocation20_spill] sm:$0xff] }
 0x319   : > { %v7339_v3 = vpop.eup %4291  ;;  %v3170_v59 = vadd.f32 %v3138_v44, %v3106_v11  ;;  %v2231_v40 = vadd.f32 %v6604_v35, %v2230_v36  ;;  %v1664_v49 = vpop.f32.mrf.mxu2  ;;  %v2244_v15 = vsub.f32 1.0, %v2243_v19  ;;  %vm2247_vm6 = vweird.f32 %v6597_v16  ;;  %v8199_v36 = vld [vmem:[#allocation21_spill] sm:$0xff] }
 0x31a   : > { %v7346_v6 = vpop.eup %4293  ;;  %v7350_v57 = vmul.f32 %v7339_v3, %v7305_v1  ;;  %v1665_v22 = vadd.f32 %v1664_v49, %v5952_v14  ;;  %4295 = vrcp.f32 %v7341_v54  ;;  %v3880_v39 = vmul.f32 -1.442695, %v2344_v58  ;;  %v1578_v13 = vpop.f32.mrf.mxu1 }
 0x31b   : > { %v3191_v63 = vpack.c.bf16 %v3170_v59, %v3169_v62  ;;  %3407 = vst [vmem:[%s6294_s16 + $0xa8] sm:$0xff] %v3170_v59  ;;  %v2235_v48 = vsel %vm2234_vm5, %v6604_v35, %v2231_v40  ;;  %v3287_v37 = vadd.f32 %v7104_v46, %v3286_v34  ;;  %v2245_v60 = vmul.f32 %v6644_v5, %v2244_v15 }
 0x31c   : > { %v2240_v50 = vsel %vm7333_vm4, %v2239_v20, %v2235_v48  ;;  %vm2248_vm7 = vweird.f32 %v6644_v5  ;;  %4297 = vpow2.f32 %v3880_v39  ;;  %v2251_v41 = vand.u32 2147483647, %v6597_v16  ;;  %v8202_v48 = vld [vmem:[#allocation97_spill] sm:$0xff] }
 0x31d   : > { %3323 = vmatmul.bf16.gmra.mxu3 %v3191_v63  ;;  %v2983_v42 = vmul.f32 %v2240_v50, %v1663_v61  ;;  %v2253_v27 = vand.u32 2147483648, %v6597_v16  ;;  %3359 = vst [vmem:[%s7126_s22 + $0x28] sm:$0xff] %v3287_v37  ;;  %v2246_v35 = vadd.f32 %v6644_v5, %v2245_v60  ;;  %v1579_v44 = vadd.f32 %v1578_v13, %v5937_v18  ;;  %vm2249_vm9 = vmor %vm2247_vm6, %vm2248_vm7 }
 0x31e   : > { %v2810_v45 = vmul.f32 %v7211_v0, %v2809_v47  ;;  %vm2812_vm8 = vweird.f32 %v7172_v51  ;;  %vm2252_vm10 = vcmp.eq.f32.partialorder %v2251_v41, 8.507059e+37  ;;  %vm2813_vm11 = vweird.f32 %v7211_v0 }
 0x31f   : > { %v3015_v11 = vadd.f32 %v2983_v42, %v8198_v4  ;;  %v2254_v61 = vor.u32 1.1754944e-38, %v2253_v27  ;;  %v2250_v62 = vsel %vm2249_vm9, %v6644_v5, %v2246_v35  ;;  %v2345_v53 = vadd.f32 %v1579_v44, %v8199_v36  ;;  %vm7384_vm13 = vmor %vm2812_vm8, %vm2813_vm11  ;;  %v8203_v27 = vld [vmem:[#allocation43_spill] sm:$0xff] }
 0x320   : > { %v2811_v12 = vadd.f32 %v7211_v0, %v2810_v45  ;;  %v2816_v24 = vand.u32 2147483647, %v7172_v51  ;;  %v7381_v47 = vpop.eup %4295  ;;  %v2854_v21 = vsub.f32 1.0, %v7350_v57  ;;  %v2818_v19 = vand.u32 2147483648, %v7172_v51  ;;  %v3289_v34 = vpop.f32.mrf.mxu3 }
 0x321   : > { %v2255_v20 = vsel %vm2252_vm10, %v2254_v61, %v2250_v62  ;;  %v2825_v5 = vmul.f32 %v7253_v38, %v2824_v7  ;;  %v1667_v59 = vpop.f32.mrf.mxu2  ;;  %v7394_v40 = vmul.f32 %v7381_v47, %v7341_v54  ;;  %v3881_v58 = vmul.f32 -1.442695, %v2345_v53 }
 0x322   : > { %v2984_v31 = vmul.f32 %v2255_v20, %v1665_v22  ;;  %v2815_v49 = vsel %vm7384_vm13, %v7211_v0, %v2811_v12  ;;  %v4298_v15 = vpop.eup %4297  ;;  %4299 = vtanh.f32 %v3015_v11  ;;  %vm2817_vm14 = vcmp.eq.f32.partialorder %v2816_v24, 8.507059e+37  ;;  %v1580_v63 = vpop.f32.mrf.mxu1  ;;  %v8204_v20 = vld [vmem:[#allocation44_spill] sm:$0xff] }
 0x323   : > { %v2819_v51 = vor.u32 1.1754944e-38, %v2818_v19  ;;  %v2826_v52 = vadd.f32 %v7253_v38, %v2825_v5  ;;  %v7400_v7 = vadd.f32 1.0, %v4298_v15  ;;  %4301 = vpow2.f32 %v3881_v58 }
 0x324   : > { %v3016_v39 = vadd.f32 %v2984_v31, %v8202_v48  ;;  %vm2827_vm15 = vweird.f32 %v7213_v26  ;;  %vm2828_vm0 = vweird.f32 %v7253_v38  ;;  %v2831_v0 = vand.u32 2147483647, %v7213_v26 }
 0x325   : > { %v2820_v22 = vsel %vm2817_vm14, %v2819_v51, %v2815_v49  ;;  %v2833_v13 = vand.u32 2147483648, %v7213_v26  ;;  %v2869_v50 = vsub.f32 1.0, %v7394_v40  ;;  %4303 = vrcp.f32 %v7400_v7  ;;  %vm2829_vm1 = vmor %vm2827_vm15, %vm2828_vm0 }
 0x326   : > { %v3075_v37 = vsub.f32 1.0, %v2820_v22  ;;  %v3290_v60 = vadd.f32 %v7104_v46, %v3289_v34  ;;  %4305 = vtanh.f32 %v3016_v39  ;;  %v2830_v42 = vsel %vm2829_vm1, %v7253_v38, %v2826_v52 }
 0x327   : > { %v2834_v41 = vor.u32 1.1754944e-38, %v2833_v13  ;;  %v3139_v35 = vmul.f32 %v2820_v22, %v8203_v27  ;;  %vm2832_vm12 = vcmp.eq.f32.partialorder %v2831_v0, 8.507059e+37  ;;  %v1668_v26 = vadd.f32 %v1667_v59, %v5952_v14 }
 0x328   : > { %v3107_v44 = vmul.f32 %v7202_v28, %v3075_v37  ;;  %3360 = vst [vmem:[%s7126_s22 + $0x30] sm:$0xff] %v3290_v60  ;;  %v2258_v45 = vmul.f32 %v6693_v30, %v6646_v2  ;;  %v7417_v4 = vpop.eup %4299  ;;  %vm2262_vm2 = vweird.f32 %v6646_v2  ;;  %v2266_v38 = vand.u32 2147483647, %v6646_v2  ;;  %v3291_v12 = vpop.f32.mrf.mxu3 }
 0x329   : > { %v2835_v11 = vsel %vm2832_vm12, %v2834_v41, %v2830_v42  ;;  %v2268_v61 = vand.u32 2147483648, %v6646_v2  ;;  %v4302_v62 = vpop.eup %4301  ;;  %vm2263_vm3 = vweird.f32 %v6693_v30  ;;  %v1581_v5 = vadd.f32 %v1580_v63, %v5937_v18  ;;  %v1669_v59 = vpop.f32.mrf.mxu2  ;;  %v8207_v63 = vld [vmem:[#allocation99_spill] sm:$0xff] }
 0x32a   : > { %v3076_v36 = vsub.f32 1.0, %v2835_v11  ;;  %v3171_v53 = vadd.f32 %v3139_v35, %v3107_v44  ;;  %v2259_v28 = vsub.f32 1.0, %v2258_v45  ;;  %v7423_v24 = vadd.f32 1.0, %v4302_v62  ;;  %v1583_v39 = vpop.f32.mrf.mxu1  ;;  %vm2264_vm6 = vmor %vm2262_vm2, %vm2263_vm3  ;;  %v8210_v62 = vld [vmem:[#allocation100_spill] sm:$0xff] }
 0x32b   : > { %v3140_v16 = vmul.f32 %v2835_v11, %v8204_v20  ;;  %vm7426_vm4 = vcmp.eq.f32.partialorder %v2266_v38, 8.507059e+37  ;;  %v7431_v31 = vpop.eup %4303  ;;  %v2269_v34 = vor.u32 1.1754944e-38, %v2268_v61  ;;  %v3292_v15 = vadd.f32 %v7104_v46, %v3291_v12 }
 0x32c   : > { %v3108_v58 = vmul.f32 %v7238_v33, %v3076_v36  ;;  %3408 = vst [vmem:[%s6294_s16 + $0xb0] sm:$0xff] %v3171_v53  ;;  %v2260_v49 = vmul.f32 %v6693_v30, %v2259_v28  ;;  %v7437_v51 = vpop.eup %4305  ;;  %v7441_v52 = vmul.f32 %v7431_v31, %v7400_v7  ;;  %4307 = vrcp.f32 %v7423_v24 }
 0x32d   : > { %v2346_v48 = vadd.f32 %v1581_v5, %v8207_v63  ;;  %v2273_v33 = vmul.f32 %v6729_v29, %v6687_v17  ;;  %3361 = vst [vmem:[%s7126_s22 + $0x38] sm:$0xff] %v3292_v15  ;;  %v1670_v13 = vadd.f32 %v1669_v59, %v5952_v14  ;;  %vm2277_vm5 = vweird.f32 %v6687_v17 }
 0x32e   : > { %v3172_v22 = vadd.f32 %v3140_v16, %v3108_v58  ;;  %v2261_v0 = vadd.f32 %v6693_v30, %v2260_v49  ;;  %vm2278_vm7 = vweird.f32 %v6729_v29  ;;  %v2281_v42 = vand.u32 2147483647, %v6687_v17  ;;  %v8211_v16 = vld [vmem:[#allocation98_spill] sm:$0xff] }
 0x32f   : > { %v3882_v37 = vmul.f32 -1.442695, %v2346_v48  ;;  %v2274_v60 = vsub.f32 1.0, %v2273_v33  ;;  %v2283_v35 = vand.u32 2147483648, %v6687_v17  ;;  %v1584_v44 = vadd.f32 %v1583_v39, %v5937_v18  ;;  %vm2279_vm10 = vmor %vm2277_vm5, %vm2278_vm7 }
 0x330   : > { %v3192_v41 = vpack.c.bf16 %v3172_v22, %v3171_v53  ;;  %3409 = vst [vmem:[%s6294_s16 + $0xb8] sm:$0xff] %v3172_v22  ;;  %v2265_v27 = vsel %vm2264_vm6, %v6693_v30, %v2261_v0  ;;  %v2884_v45 = vsub.f32 1.0, %v7441_v52  ;;  %vm7465_vm8 = vcmp.eq.f32.partialorder %v2281_v42, 8.507059e+37  ;;  %v3294_v53 = vpop.f32.mrf.mxu3 }
 0x331   : > { %v2270_v2 = vsel %vm7426_vm4, %v2269_v34, %v2265_v27  ;;  %4309 = vpow2.f32 %v3882_v37  ;;  %v2275_v11 = vmul.f32 %v6729_v29, %v2274_v60  ;;  %v2347_v30 = vadd.f32 %v1584_v44, %v8210_v62  ;;  %v1672_v34 = vpop.f32.mrf.mxu2 }
 0x332   : > { %3328 = vmatmul.bf16.gmra.mxu3 %v3192_v41  ;;  %v2985_v38 = vmul.f32 %v2270_v2, %v1668_v26  ;;  %v2840_v36 = vmul.f32 %v7303_v56, %v2839_v9  ;;  %v7473_v28 = vpop.eup %4307  ;;  %v2284_v20 = vor.u32 1.1754944e-38, %v2283_v35  ;;  %vm2843_vm9 = vweird.f32 %v7303_v56  ;;  %v1585_v27 = vpop.f32.mrf.mxu1  ;;  %v8217_v2 = vld [vmem:[#allocation49_spill] sm:$0xff] }
 0x333   : > { %v2276_v12 = vadd.f32 %v6729_v29, %v2275_v11  ;;  %v2846_v26 = vand.u32 2147483647, %v7255_v32  ;;  %v3883_v43 = vmul.f32 -1.442695, %v2347_v30  ;;  %vm2842_vm11 = vweird.f32 %v7255_v32 }
 0x334   : > { %v3017_v19 = vadd.f32 %v2985_v38, %v8211_v16  ;;  %v2841_v9 = vadd.f32 %v7303_v56, %v2840_v36  ;;  %v7487_v5 = vmul.f32 %v7473_v28, %v7423_v24  ;;  %vm7490_vm13 = vmor %vm2842_vm11, %vm2843_vm9  ;;  %v2848_v49 = vand.u32 2147483648, %v7255_v32  ;;  %v8218_v16 = vld [vmem:[#allocation50_spill] sm:$0xff] }
 0x335   : > { %v2280_v59 = vsel %vm2279_vm10, %v6729_v29, %v2276_v12  ;;  %v2855_v17 = vmul.f32 %v7339_v3, %v2854_v21  ;;  %vm2847_vm14 = vcmp.eq.f32.partialorder %v2846_v26, 8.507059e+37  ;;  %vm2857_vm15 = vweird.f32 %v7305_v1  ;;  %v8214_v21 = vld [vmem:[#allocation24_spill] sm:$0xff] }
 0x336   : > { %4311 = vtanh.f32 %v3017_v19  ;;  %v2285_v15 = vsel %vm7465_vm8, %v2284_v20, %v2280_v59  ;;  %v2845_v63 = vsel %vm7490_vm13, %v7303_v56, %v2841_v9  ;;  %v2849_v33 = vor.u32 1.1754944e-38, %v2848_v49  ;;  %v8221_v59 = vld [vmem:[#allocation51_spill] sm:$0xff] }
 0x337   : > { %v4310_v29 = vpop.eup %4309  ;;  %v2986_v48 = vmul.f32 %v2285_v15, %v1670_v13  ;;  %4313 = vpow2.f32 %v3883_v43  ;;  %v2856_v32 = vadd.f32 %v7339_v3, %v2855_v17  ;;  %vm2858_vm0 = vweird.f32 %v7339_v3 }
 0x338   : > { %v7504_v39 = vadd.f32 1.0, %v4310_v29  ;;  %v2861_v57 = vand.u32 2147483647, %v7305_v1  ;;  %v2850_v0 = vsel %vm2847_vm14, %v2849_v33, %v2845_v63  ;;  %vm7510_vm1 = vmor %vm2857_vm15, %vm2858_vm0  ;;  %v2863_v13 = vand.u32 2147483648, %v7305_v1  ;;  %v3296_v35 = vpop.f32.mrf.mxu3 }
 0x339   : > { %v3018_v22 = vadd.f32 %v2986_v48, %v8214_v21  ;;  %v3295_v37 = vadd.f32 %v7104_v46, %v3294_v53  ;;  %v2899_v60 = vsub.f32 1.0, %v7487_v5  ;;  %v2860_v42 = vsel %vm7510_vm1, %v7339_v3, %v2856_v32  ;;  %v1674_v49 = vpop.f32.mrf.mxu2 }
 0x33a   : > { %4315 = vrcp.f32 %v7504_v39  ;;  %v3077_v41 = vsub.f32 1.0, %v2850_v0  ;;  %vm2862_vm12 = vcmp.eq.f32.partialorder %v2861_v57, 8.507059e+37  ;;  %v2864_v44 = vor.u32 1.1754944e-38, %v2863_v13 }
 0x33b   : > { %4317 = vtanh.f32 %v3018_v22  ;;  %v3141_v11 = vmul.f32 %v2850_v0, %v8217_v2  ;;  %3362 = vst [vmem:[%s7126_s22 + $0x40] sm:$0xff] %v3295_v37  ;;  %v1673_v61 = vadd.f32 %v1672_v34, %v5952_v14  ;;  %v2288_v62 = vmul.f32 %v6788_v23, %v6737_v55 }
 0x33c   : > { %v7523_v1 = vpop.eup %4311  ;;  %v3109_v38 = vmul.f32 %v7311_v25, %v3077_v41  ;;  %vm2292_vm2 = vweird.f32 %v6737_v55  ;;  %v2865_v30 = vsel %vm2862_vm12, %v2864_v44, %v2860_v42  ;;  %v2296_v36 = vand.u32 2147483647, %v6737_v55 }
 0x33d   : > { %v4314_v3 = vpop.eup %4313  ;;  %v2298_v53 = vand.u32 2147483648, %v6737_v55  ;;  %v1586_v12 = vadd.f32 %v1585_v27, %v5937_v18  ;;  %v3078_v26 = vsub.f32 1.0, %v2865_v30  ;;  %vm2293_vm3 = vweird.f32 %v6788_v23 }
 0x33e   : > { %v7533_v20 = vadd.f32 1.0, %v4314_v3  ;;  %v3173_v25 = vadd.f32 %v3141_v11, %v3109_v38  ;;  %v3142_v19 = vmul.f32 %v2865_v30, %v8218_v16  ;;  %v2289_v43 = vsub.f32 1.0, %v2288_v62  ;;  %vm2294_vm7 = vmor %vm2292_vm2, %vm2293_vm3 }
 0x33f   : > { %vm7537_vm4 = vcmp.eq.f32.partialorder %v2296_v36, 8.507059e+37  ;;  %v2348_v58 = vadd.f32 %v1586_v12, %v8221_v59  ;;  %v3110_v18 = vmul.f32 %v7346_v6, %v3078_v26  ;;  %v2299_v34 = vor.u32 1.1754944e-38, %v2298_v53 }
 0x340   : > { %v7542_v17 = vpop.eup %4315  ;;  %4319 = vrcp.f32 %v7533_v20  ;;  %3410 = vst [vmem:[%s6294_s16 + $0xc0] sm:$0xff] %v3173_v25  ;;  %v3297_v15 = vadd.f32 %v7104_v46, %v3296_v35  ;;  %v2290_v48 = vmul.f32 %v6788_v23, %v2289_v43  ;;  %v2303_v32 = vmul.f32 %v6811_v10, %v6763_v8  ;;  %v3299_v22 = vpop.f32.mrf.mxu3 }
 0x341   : > { %v7548_v63 = vpop.eup %4317  ;;  %v7552_v29 = vmul.f32 %v7542_v17, %v7504_v39  ;;  %v3884_v33 = vmul.f32 -1.442695, %v2348_v58  ;;  %v3174_v57 = vadd.f32 %v3142_v19, %v3110_v18  ;;  %v1675_v6 = vadd.f32 %v1674_v49, %v5952_v14  ;;  %v8229_v58 = vld [vmem:[#allocation102_spill] sm:$0xff] }
 0x342   : > { %3363 = vst [vmem:[%s7126_s22 + $0x48] sm:$0xff] %v3297_v15  ;;  %vm2307_vm5 = vweird.f32 %v6763_v8  ;;  %v2311_v21 = vand.u32 2147483647, %v6763_v8  ;;  %v2291_v0 = vadd.f32 %v6788_v23, %v2290_v48  ;;  %v2304_v56 = vsub.f32 1.0, %v2303_v32 }
 0x343   : > { %4321 = vpow2.f32 %v3884_v33  ;;  %vm2308_vm6 = vweird.f32 %v6811_v10  ;;  %v2914_v13 = vsub.f32 1.0, %v7552_v29  ;;  %v3193_v37 = vpack.c.bf16 %v3174_v57, %v3173_v25  ;;  %3411 = vst [vmem:[%s6294_s16 + $0xc8] sm:$0xff] %v3174_v57 }
 0x344   : > { %v2313_v14 = vand.u32 2147483648, %v6763_v8  ;;  %v2870_v42 = vmul.f32 %v7381_v47, %v2869_v50  ;;  %v2295_v41 = vsel %vm2294_vm7, %v6788_v23, %v2291_v0  ;;  %v2305_v27 = vmul.f32 %v6811_v10, %v2304_v56  ;;  %vm2309_vm13 = vmor %vm2307_vm5, %vm2308_vm6 }
 0x345   : > { %vm7575_vm8 = vcmp.eq.f32.partialorder %v2311_v21, 8.507059e+37  ;;  %vm2873_vm9 = vweird.f32 %v7381_v47  ;;  %3333 = vmatmul.bf16.gmra.mxu3 %v3193_v37  ;;  %v2300_v55 = vsel %vm7537_vm4, %v2299_v34, %v2295_v41  ;;  %vm2872_vm10 = vweird.f32 %v7341_v54  ;;  %v8230_v34 = vld [vmem:[#allocation27_spill] sm:$0xff] }
 0x346   : > { %v7580_v44 = vpop.eup %4319  ;;  %v2871_v40 = vadd.f32 %v7381_v47, %v2870_v42  ;;  %v2876_v23 = vand.u32 2147483647, %v7341_v54  ;;  %v2987_v50 = vmul.f32 %v2300_v55, %v1673_v61  ;;  %v2306_v2 = vadd.f32 %v6811_v10, %v2305_v27  ;;  %vm7588_vm11 = vmor %vm2872_vm10, %vm2873_vm9 }
 0x347   : > { %v2314_v11 = vor.u32 1.1754944e-38, %v2313_v14  ;;  %v2878_v62 = vand.u32 2147483648, %v7341_v54  ;;  %v7595_v3 = vmul.f32 %v7580_v44, %v7533_v20  ;;  %v2885_v30 = vmul.f32 %v7431_v31, %v2884_v45  ;;  %v8226_v54 = vld [vmem:[#allocation101_spill] sm:$0xff] }
 0x348   : > { %v2875_v61 = vsel %vm7588_vm11, %v7381_v47, %v2871_v40  ;;  %vm2877_vm14 = vcmp.eq.f32.partialorder %v2876_v23, 8.507059e+37  ;;  %v3019_v53 = vadd.f32 %v2987_v50, %v8226_v54  ;;  %v2310_v12 = vsel %vm2309_vm13, %v6811_v10, %v2306_v2  ;;  %v3301_v52 = vpop.f32.mrf.mxu3  ;;  %v7669_v40 = vld [vmem:[%s7759_s9] ss:$0 sm:$0xff] }
 0x349   : > { %v4322_v36 = vpop.eup %4321  ;;  %v2879_v26 = vor.u32 1.1754944e-38, %v2878_v62  ;;  %vm2887_vm15 = vweird.f32 %v7400_v7  ;;  %v2315_v8 = vsel %vm7575_vm8, %v2314_v11, %v2310_v12  ;;  %v2886_v47 = vadd.f32 %v7431_v31, %v2885_v30 }
 0x34a   : > { %v7610_v25 = vadd.f32 1.0, %v4322_v36  ;;  %vm2888_vm0 = vweird.f32 %v7431_v31  ;;  %4323 = vtanh.f32 %v3019_v53  ;;  %v2988_v45 = vmul.f32 %v2315_v8, %v1675_v6 }
 0x34b   : > { %v2880_v16 = vsel %vm2877_vm14, %v2879_v26, %v2875_v61  ;;  %v2891_v19 = vand.u32 2147483647, %v7400_v7  ;;  %v2929_v10 = vsub.f32 1.0, %v7595_v3  ;;  %vm7619_vm1 = vmor %vm2887_vm15, %vm2888_vm0  ;;  %v2893_v9 = vand.u32 2147483648, %v7400_v7  ;;  %v8234_v3 = vld [vmem:[#allocation39_spill] sm:$0xff] }
 0x34c   : > { %4325 = vrcp.f32 %v7610_v25  ;;  %v3079_v59 = vsub.f32 1.0, %v2880_v16  ;;  %v7625_v49 = vadd.f32 %v2988_v45, %v8229_v58  ;;  %v2890_v18 = vsel %vm7619_vm1, %v7431_v31, %v2886_v47  ;;  %v8237_v47 = vld [vmem:[#allocation40_spill] sm:$0xff] }
 0x34d   : > { %v3143_v15 = vmul.f32 %v2880_v16, %v8230_v34  ;;  %v3300_v48 = vadd.f32 %v7104_v46, %v3299_v22  ;;  %v2894_v33 = vor.u32 1.1754944e-38, %v2893_v9  ;;  %v3302_v57 = vadd.f32 %v7104_v46, %v3301_v52 }
 0x34e   : > { %v3111_v32 = vmul.f32 %v7417_v4, %v3079_v59  ;;  %v2900_v7 = vmul.f32 %v7473_v28, %v2899_v60  ;;  %vm2892_vm12 = vcmp.eq.f32.partialorder %v2891_v19, 8.507059e+37  ;;  %vm2902_vm2 = vweird.f32 %v7423_v24  ;;  %v8231_v60 = vld [vmem:[#allocation28_spill] sm:$0xff] }
 0x34f   : > { %3364 = vst [vmem:[%s7126_s22 + $0x50] sm:$0xff] %v3300_v48  ;;  %vm2903_vm3 = vweird.f32 %v7473_v28  ;;  %v2906_v31 = vand.u32 2147483647, %v7423_v24  ;;  %v2895_v6 = vsel %vm2892_vm12, %v2894_v33, %v2890_v18  ;;  %v2908_v46 = vand.u32 2147483648, %v7423_v24 }
 0x350   : > { %v3175_v21 = vadd.f32 %v3143_v15, %v3111_v32  ;;  %3365 = vst [vmem:[%s7126_s22 + $0x58] sm:$0xff] %v3302_v57  ;;  %v2901_v4 = vadd.f32 %v7473_v28, %v2900_v7  ;;  %v7644_v22 = vpop.eup %4323  ;;  %v3080_v5 = vsub.f32 1.0, %v2895_v6  ;;  %v3144_v0 = vmul.f32 %v2895_v6, %v8231_v60  ;;  %vm2904_vm4 = vmor %vm2902_vm2, %vm2903_vm3  ;;  %v3304_v24 = vpop.f32.mrf.mxu3  ;;  %v8239_v6 = vld [vmem:[#allocation87_spill] sm:$0xff] }
 0x351   : > { %vm2907_vm5 = vcmp.eq.f32.partialorder %v2906_v31, 8.507059e+37  ;;  %v2915_v56 = vmul.f32 %v7542_v17, %v2914_v13  ;;  %v2909_v42 = vor.u32 1.1754944e-38, %v2908_v46  ;;  %vm2917_vm6 = vweird.f32 %v7504_v39 }
 0x352   : > { %v7650_v37 = vpop.eup %4325  ;;  %3412 = vst [vmem:[%s6294_s16 + $0xd0] sm:$0xff] %v3175_v21  ;;  %v2905_v14 = vsel %vm2904_vm4, %v7473_v28, %v2901_v4  ;;  %vm2918_vm7 = vweird.f32 %v7542_v17  ;;  %v3112_v27 = vmul.f32 %v7437_v51, %v3080_v5  ;;  %v2921_v13 = vand.u32 2147483647, %v7504_v39 }
 0x353   : > { %v2943_v41 = vmul.f32 %v7650_v37, %v7610_v25  ;;  %v2916_v29 = vadd.f32 %v7542_v17, %v2915_v56  ;;  %v2910_v35 = vsel %vm2907_vm5, %v2909_v42, %v2905_v14  ;;  %vm7661_vm8 = vmor %vm2917_vm6, %vm2918_vm7  ;;  %v2923_v55 = vand.u32 2147483648, %v7504_v39 }
 0x354   : > { %v3305_v51 = vadd.f32 %v7669_v40, %v3304_v24  ;;  %v2930_v23 = vmul.f32 %v7580_v44, %v2929_v10  ;;  %v3176_v2 = vadd.f32 %v3144_v0, %v3112_v27  ;;  %vm2922_vm9 = vcmp.eq.f32.partialorder %v2921_v13, 8.507059e+37 }
 0x355   : > { %v2944_v50 = vsub.f32 1.0, %v2943_v41  ;;  %v2920_v11 = vsel %vm7661_vm8, %v7542_v17, %v2916_v29  ;;  %v2924_v38 = vor.u32 1.1754944e-38, %v2923_v55  ;;  %v3081_v62 = vsub.f32 1.0, %v2910_v35 }
 0x356   : > { %v3145_v39 = vmul.f32 %v2910_v35, %v8234_v3  ;;  %3366 = vst [vmem:[%s7126_s22 + $0x60] sm:$0xff] %v3305_v51  ;;  %v2931_v61 = vadd.f32 %v7580_v44, %v2930_v23  ;;  %v3194_v30 = vpack.c.bf16 %v3176_v2, %v3175_v21  ;;  %vm2932_vm10 = vweird.f32 %v7533_v20 }
 0x357   : > { %3413 = vst [vmem:[%s6294_s16 + $0xd8] sm:$0xff] %v3176_v2  ;;  %vm2933_vm11 = vweird.f32 %v7580_v44  ;;  %v2936_v36 = vand.u32 2147483647, %v7533_v20  ;;  %v2925_v54 = vsel %vm2922_vm9, %v2924_v38, %v2920_v11  ;;  %v3113_v53 = vmul.f32 %v7523_v1, %v3081_v62 }
 0x358   : > { %vm7684_vm13 = vmor %vm2932_vm10, %vm2933_vm11  ;;  %v2938_v12 = vand.u32 2147483648, %v7533_v20  ;;  %v2945_v26 = vmul.f32 %v7650_v37, %v2944_v50  ;;  %3338 = vmatmul.bf16.gmra.mxu3 %v3194_v30  ;;  %v3082_v8 = vsub.f32 1.0, %v2925_v54  ;;  %v3146_v52 = vmul.f32 %v2925_v54, %v8237_v47  ;;  %v3306_v16 = vpop.f32.mrf.mxu3 }
 0x359   : > { %v2935_v45 = vsel %vm7684_vm13, %v7580_v44, %v2931_v61  ;;  %vm2937_vm14 = vcmp.eq.f32.partialorder %v2936_v36, 8.507059e+37  ;;  %v3177_v1 = vadd.f32 %v3145_v39, %v3113_v53  ;;  %vm2947_vm15 = vweird.f32 %v7610_v25 }
 0x35a   : > { %v2939_v19 = vor.u32 1.1754944e-38, %v2938_v12  ;;  %v2946_v10 = vadd.f32 %v7650_v37, %v2945_v26  ;;  %v3114_v20 = vmul.f32 %v7548_v63, %v3082_v8  ;;  %v3307_v43 = vadd.f32 %v7669_v40, %v3306_v16 }
 0x35b   : > { %vm2948_vm0 = vweird.f32 %v7650_v37  ;;  %v2951_v9 = vand.u32 2147483647, %v7610_v25  ;;  %4327 = vtanh.f32 %v7625_v49  ;;  %3414 = vst [vmem:[%s6294_s16 + $0xe0] sm:$0xff] %v3177_v1  ;;  %v2953_v59 = vand.u32 2147483648, %v7610_v25  ;;  %v8238_v49 = vld [vmem:[#allocation86_spill] sm:$0xff] }
 0x35c   : > { %v2940_v44 = vsel %vm2937_vm14, %v2939_v19, %v2935_v45  ;;  %vm2949_vm1 = vmor %vm2947_vm15, %vm2948_vm0  ;;  %v3178_v58 = vadd.f32 %v3146_v52, %v3114_v20  ;;  %3367 = vst [vmem:[%s7126_s22 + $0x68] sm:$0xff] %v3307_v43 }
 0x35d   : > { %v2950_v18 = vsel %vm2949_vm1, %v7650_v37, %v2946_v10  ;;  %v3083_v34 = vsub.f32 1.0, %v2940_v44  ;;  %v2954_v63 = vor.u32 1.1754944e-38, %v2953_v59  ;;  %vm2952_vm12 = vcmp.eq.f32.partialorder %v2951_v9, 8.507059e+37 }
 0x35e   : > { %v3195_v15 = vpack.c.bf16 %v3178_v58, %v3177_v1  ;;  %3415 = vst [vmem:[%s6294_s16 + $0xe8] sm:$0xff] %v3178_v58  ;;  %v3147_v33 = vmul.f32 %v2940_v44, %v8238_v49 }
 0x35f   : > { %v3115_v48 = vmul.f32 %v7644_v22, %v3083_v34  ;;  %v2955_v32 = vsel %vm2952_vm12, %v2954_v63, %v2950_v18 }
 0x360   : > { %v3084_v57 = vsub.f32 1.0, %v2955_v32  ;;  %v3148_v21 = vmul.f32 %v2955_v32, %v8239_v6 }
 0x361   : > { %v3179_v25 = vadd.f32 %v3147_v33, %v3115_v48  ;;  %v4328_v7 = vpop.eup %4327 }
 0x362   : > { %v3116_v31 = vmul.f32 %v4328_v7, %v3084_v57 }
 0x363   : > { %3416 = vst [vmem:[%s6294_s16 + $0xf0] sm:$0xff] %v3179_v25 }
 0x364   : > { %v3180_v4 = vadd.f32 %v3148_v21, %v3116_v31 }
 0x366   : > { %v3196_v46 = vpack.c.bf16 %v3180_v4, %v3179_v25  ;;  %3417 = vst [vmem:[%s6294_s16 + $0xf8] sm:$0xff] %v3180_v4 }
 0x368   : > { %3343 = vmatmul.bf16.gmra.mxu3 %v3195_v15 }
 0x369   : > { %v3309_v5 = vpop.f32.mrf.mxu3 }
 0x36a   : > { %v3310_v22 = vadd.f32 %v7669_v40, %v3309_v5 }
 0x36c   : > { %3368 = vst [vmem:[%s7126_s22 + $0x70] sm:$0xff] %v3310_v22 }
 0x371   : > { %v3311_v60 = vpop.f32.mrf.mxu3 }
 0x372   : > { %v3312_v0 = vadd.f32 %v7669_v40, %v3311_v60 }
 0x374   : > { %3369 = vst [vmem:[%s7126_s22 + $0x78] sm:$0xff] %v3312_v0 }
 0x378   : > { %3348 = vmatmul.bf16.gmra.mxu3 %v3196_v46 }
 0x379   : > { %v3314_v56 = vpop.f32.mrf.mxu3 }
 0x37a   : > { %v3315_v37 = vadd.f32 %v7669_v40, %v3314_v56 }
 0x37c   : > { %3370 = vst [vmem:[%s7126_s22 + $0x80] sm:$0xff] %v3315_v37 }
 0x381   : > { %v3316_v14 = vpop.f32.mrf.mxu3 }
 0x382   : > { %v3317_v42 = vadd.f32 %v7669_v40, %v3316_v14 }
 0x384   : > { %3371 = vst [vmem:[%s7126_s22 + $0x88] sm:$0xff] %v3317_v42 }
 0x38c   : > { %v3319_v24 = vpop.f32.mrf.mxu3 }
 0x38d   : > { %v3320_v41 = vadd.f32 %v7669_v40, %v3319_v24 }
 0x38f   : > { %3372 = vst [vmem:[%s7126_s22 + $0x90] sm:$0xff] %v3320_v41 }
 0x394   : > { %v3321_v27 = vpop.f32.mrf.mxu3 }
 0x395   : > { %v3322_v29 = vadd.f32 %v7669_v40, %v3321_v27 }
 0x397   : > { %3373 = vst [vmem:[%s7126_s22 + $0x98] sm:$0xff] %v3322_v29 }
 0x3a0   : > { %v3324_v13 = vpop.f32.mrf.mxu3 }
 0x3a1   : > { %v3325_v35 = vadd.f32 %v7669_v40, %v3324_v13 }
 0x3a3   : > { %3374 = vst [vmem:[%s7126_s22 + $0xa0] sm:$0xff] %v3325_v35 }
 0x3a8   : > { %v3326_v28 = vpop.f32.mrf.mxu3 }
 0x3a9   : > { %v3327_v55 = vadd.f32 %v7669_v40, %v3326_v28 }
 0x3ab   : > { %3375 = vst [vmem:[%s7126_s22 + $0xa8] sm:$0xff] %v3327_v55 }
 0x3b5   : > { %v3329_v51 = vpop.f32.mrf.mxu3 }
 0x3b6   : > { %v3330_v23 = vadd.f32 %v7669_v40, %v3329_v51 }
 0x3b8   : > { %3376 = vst [vmem:[%s7126_s22 + $0xb0] sm:$0xff] %v3330_v23 }
 0x3bd   : > { %v3331_v50 = vpop.f32.mrf.mxu3 }
 0x3be   : > { %v3332_v2 = vadd.f32 %v7669_v40, %v3331_v50 }
 0x3c0   : > { %3377 = vst [vmem:[%s7126_s22 + $0xb8] sm:$0xff] %v3332_v2 }
 0x3c8   : > { %v3334_v11 = vpop.f32.mrf.mxu3 }
 0x3c9   : > { %v3335_v38 = vadd.f32 %v7669_v40, %v3334_v11 }
 0x3cb   : > { %3378 = vst [vmem:[%s7126_s22 + $0xc0] sm:$0xff] %v3335_v38 }
 0x3d0   : > { %v3336_v62 = vpop.f32.mrf.mxu3 }
 0x3d1   : > { %v3337_v3 = vadd.f32 %v7669_v40, %v3336_v62 }
 0x3d3   : > { %3379 = vst [vmem:[%s7126_s22 + $0xc8] sm:$0xff] %v3337_v3 }
 0x3db   : > { %v3339_v39 = vpop.f32.mrf.mxu3 }
 0x3dc   : > { %v3340_v61 = vadd.f32 %v7669_v40, %v3339_v39 }
 0x3de   : > { %3380 = vst [vmem:[%s7126_s22 + $0xd0] sm:$0xff] %v3340_v61 }
 0x3e3   : > { %v3341_v30 = vpop.f32.mrf.mxu3 }
 0x3e4   : > { %v3342_v36 = vadd.f32 %v7669_v40, %v3341_v30 }
 0x3e6   : > { %3381 = vst [vmem:[%s7126_s22 + $0xd8] sm:$0xff] %v3342_v36 }
 0x3eb   : > { %v3344_v54 = vpop.f32.mrf.mxu3 }
 0x3ec   : > { %v3345_v53 = vadd.f32 %v7669_v40, %v3344_v54 }
 0x3ee   : > { %3382 = vst [vmem:[%s7126_s22 + $0xe0] sm:$0xff] %v3345_v53 }
 0x3f3   : > { %v3346_v17 = vpop.f32.mrf.mxu3 }
 0x3f4   : > { %v3347_v12 = vadd.f32 %v7669_v40, %v3346_v17 }
 0x3f6   : > { %3383 = vst [vmem:[%s7126_s22 + $0xe8] sm:$0xff] %v3347_v12 }
 0x3fb   : > { %v3349_v26 = vpop.f32.mrf.mxu3 }
 0x3fc   : > { %v3350_v8 = vadd.f32 %v7669_v40, %v3349_v26 }
 0x3fe   : > { %3384 = vst [vmem:[%s7126_s22 + $0xf0] sm:$0xff] %v3350_v8 }
 0x403   : > { %v3351_v47 = vpop.f32.mrf.mxu3 }
 0x404   : > { %v3352_v52 = vadd.f32 %v7669_v40, %v3351_v47 }
 0x406   : > { %3385 = vst [vmem:[%s7126_s22 + $0xf8] sm:$0xff] %v3352_v52 }
 0x407 PF: > { %s22_s17 = sadd.s32 1, %s4338_s17  }
 0x408   : > { %p19_p4 = scmp.ge.s32.totalorder %s22_s17, 4  }
 0x40a   :  { %21 = sbr.rel (!%p19_p4) target bundleno = 1 (0x1), region = 105 }

</bundles_post_ra>
